<compile_context>
chip_gen: v6e
topology: v6e:2x2x1
jax: 0.10.0
libtpu: 0.0.40
codegen_flags: <defaults>
</compile_context>

<pallas_src>
import functools

import numpy as np
import jax
import jax.numpy as jnp
from jax.experimental import pallas as pl
from jax.experimental.pallas import tpu as pltpu


_VMEM = pl.BlockSpec(memory_space=pltpu.MemorySpace.VMEM)


def _round_up(x, m):
    return -(-x // m) * m


@functools.lru_cache(maxsize=None)
def _compiler_params():
    """Generation-aware scoped-VMEM cap: 48 MiB on v5e/v6e, 32 MiB on v7x."""
    cap = None
    try:
        cap = getattr(pltpu.get_tpu_info(), "vmem_capacity_bytes", None)
    except Exception:
        cap = None
    if not cap:
        cap = 64 * 1024 * 1024          # conservative (v7x-sized) fallback
    return pltpu.CompilerParams(vmem_limit_bytes=min(48 * 1024 * 1024, cap // 2))


# ----------------------------------------------------------------------------
# Pallas kernels
# ----------------------------------------------------------------------------
def conv_pool_kernel(p_ref, w_ref, b_ref, o_ref, *, m_pad):
    """Fused Conv2d (transposed im2col matmul) + bias + ReLU + 2x2 max-pool.

    p_ref: (Kp, 4*Mp) bf16  transposed im2col patches, pool-position-major on LANES:
           column q*Mp + m is the patch of pooled output pixel m at position q of the
           2x2 pool window.  Mp is a multiple of 128 -> lane-dense compute & stores.
    w_ref: (Cp, Kp) bf16;  b_ref: (Cp, 1) f32;  o_ref: (Cp, Mp) bf16.
    """
    # ONE MXU matmul covering all 4 pool positions, then a cheap lane-dense VPU max
    # across the 4 aligned lane-blocks of the result.
    s = jnp.dot(w_ref[...], p_ref[...], preferred_element_type=jnp.float32)
    m = jnp.maximum(jnp.maximum(s[:, :m_pad], s[:, m_pad:2 * m_pad]),
                    jnp.maximum(s[:, 2 * m_pad:3 * m_pad], s[:, 3 * m_pad:]))
    # maxpool(relu(conv + b)) == relu(max(conv) + b): bias-add and ReLU are monotone
    # per-channel, so they commute with the window max.  Epilogue stays f32; the
    # final store casts to bf16 (halves activation HBM traffic).
    o_ref[...] = jnp.maximum(m + b_ref[...], 0.0).astype(o_ref.dtype)


def head_kernel(p_ref, w3_ref, b3_ref, w1_ref, b1_ref, w2_ref, b2_ref, o_ref,
                *, n_pix, bpad, batch, h1p):
    """conv3 + bias + ReLU + 2x2 pool + flatten + fc1 + ReLU + fc2 in one kernel.

    p_ref : (4*n_pix*bpad, K3p) bf16, rows ordered (pool position q, spatial s,
            batch padded to bpad); padding rows/columns are zero.
    w3_ref: (K3p, C3) bf16;  b3_ref: (1, C3) f32
    w1_ref: (C3, n_pix*h1p) bf16, fc1 weight expanded per spatial position:
            w1_ref[c, s*h1p + j] = fc1_weight[j, c*n_pix + s]  (the PyTorch NCHW
            .view(-1, 16*4*4) feature ordering folded in on the host).
    b1_ref: (1, h1p) f32;  w2_ref: (h1p, 2) bf16;  b2_ref: (1, 2) f32
    o_ref : (batch, 2) f32
    """
    mq = n_pix * bpad
    s = jnp.dot(p_ref[...], w3_ref[...], preferred_element_type=jnp.float32)
    m = jnp.maximum(jnp.maximum(s[:mq], s[mq:2 * mq]),
                    jnp.maximum(s[2 * mq:3 * mq], s[3 * mq:]))
    y = jnp.maximum(m + b3_ref[...], 0.0)        # (n_pix*bpad, C3), rows (s, b)

    # fc1 contracts over (channel c, spatial s).  Instead of 16 tiny (bpad, C3) @
    # (C3, 120) dots (pure MXU drain latency) or an in-kernel (s,b,c)->(b,(s,c))
    # relayout, do ONE matmul against the spatially expanded weight and sum the 16
    # diagonal (bpad, h1p) blocks of the result; block offsets (si*bpad, si*h1p) are
    # (8,128)-aligned, so this is a single MXU push plus 16 cheap aligned VPU adds.
    z = jnp.dot(y.astype(jnp.bfloat16), w1_ref[...],
                preferred_element_type=jnp.float32)   # (n_pix*bpad, n_pix*h1p)
    h = z[:bpad, :h1p]
    for si in range(1, n_pix):
        h = h + z[si * bpad:(si + 1) * bpad, si * h1p:(si + 1) * h1p]
    h = jnp.maximum(h + b1_ref[...], 0.0)             # (bpad, h1p)
    out = jnp.dot(h.astype(jnp.bfloat16), w2_ref[...],
                  preferred_element_type=jnp.float32) + b2_ref[...]
    o_ref[...] = out[:batch].astype(o_ref.dtype)


# ----------------------------------------------------------------------------
# Host-side (XLA) glue: transposed, pool-position-split im2col, channel-first
# ----------------------------------------------------------------------------
def _pool_patches_cf(a, KH, KW):
    """a: (C, B, H, W) channel-first -> list of 4 (C*KH*KW, B*Hp*Wp) transposed patch
    matrices, one per 2x2 pool-window position; row order (c, kh, kw), column order
    (b, hp, wp)."""
    C, B, H, W = a.shape
    Hp, Wp = (H - KH + 1) // 2, (W - KW + 1) // 2
    mats = []
    for dy in range(2):
        for dx in range(2):
            taps = [
                a[:, :, dy + kh:dy + kh + 2 * Hp - 1:2,
                  dx + kw:dx + kw + 2 * Wp - 1:2]
                for kh in range(KH) for kw in range(KW)
            ]
            p = jnp.stack(taps, axis=1)                  # (C, KH*KW, B, Hp, Wp)
            mats.append(p.reshape(C * KH * KW, B * Hp * Wp))
    return mats, (Hp, Wp)


def conv_relu_pool(a, w, b):
    """a: (Cin, B, H, W) channel-first; w: (Cout, Cin, KH, KW) OIHW; b: (Cout,)
    -> (Cout, B, Hp, Wp) channel-first bf16 (stays channel-first; no NCHW round-trip)."""
    Cout, Cin, KH, KW = w.shape
    B = a.shape[1]
    mats, (Hp, Wp) = _pool_patches_cf(a, KH, KW)
    K, M = Cin * KH * KW, B * Hp * Wp
    Kp = _round_up(K, 16)        # sublane-aligned bf16 tiles for P^T
    Mp = _round_up(M, 128)       # lane-dense columns (padding columns are zero)
    Cp = _round_up(Cout, 8)
    P = jnp.concatenate(
        [jnp.pad(m, ((0, Kp - K), (0, Mp - M))) for m in mats], axis=1
    ).astype(jnp.bfloat16)                                        # (Kp, 4*Mp)
    wm = jnp.pad(w.reshape(Cout, K),
                 ((0, Cp - Cout), (0, Kp - K))).astype(jnp.bfloat16)   # (Cp, Kp)
    bm = jnp.pad(b.reshape(Cout, 1).astype(jnp.float32), ((0, Cp - Cout), (0, 0)))

    out = pl.pallas_call(
        functools.partial(conv_pool_kernel, m_pad=Mp),
        out_shape=jax.ShapeDtypeStruct((Cp, Mp), jnp.bfloat16),   # bf16 writeback
        in_specs=[_VMEM, _VMEM, _VMEM],
        out_specs=_VMEM,
        compiler_params=_compiler_params(),
    )(P, wm, bm)
    return out[:Cout, :M].reshape(Cout, B, Hp, Wp)


def conv_fc_head(a, params):
    """Fused last conv block + fc1 + ReLU + fc2.  a: (16, B, 13, 13) -> (B, 2) f32."""
    w3, b3 = params["w3"], params["b3"]
    Cout, Cin, KH, KW = w3.shape                 # (16, 16, 6, 6)
    B = a.shape[1]
    bpad = _round_up(B, 8)
    mats, (Hp, Wp) = _pool_patches_cf(a, KH, KW)
    n_pix = Hp * Wp                              # 4*4 = 16
    K = Cin * KH * KW                            # 576
    Kp = _round_up(K, 128)                       # lane dim of P3 -> 640

    blocks = []
    for m in mats:
        q = m.reshape(K, B, n_pix).transpose(2, 1, 0)            # (n_pix, B, K)
        q = jnp.pad(q, ((0, 0), (0, bpad - B), (0, Kp - K)))     # zero padding
        blocks.append(q.reshape(n_pix * bpad, Kp))
    P = jnp.concatenate(blocks, axis=0).astype(jnp.bfloat16)     # (4*n_pix*bpad, Kp)

    w3m = jnp.pad(w3.reshape(Cout, K).T, ((0, Kp - K), (0, 0))).astype(jnp.bfloat16)
    b3m = b3.reshape(1, Cout).astype(jnp.float32)

    fw1, fb1, fw2, fb2 = params["fw1"], params["fb1"], params["fw2"], params["fb2"]
    H1 = fw1.shape[0]                            # 120
    H1p = _round_up(H1, 128)                     # 128
    # Spatially expanded fc1 weight: w1e[c, s*H1p + j] = fw1[j, c*n_pix + s]
    # (folds the PyTorch NCHW .view(-1, 16*4*4) feature order in on the host).
    w1e = fw1.reshape(H1, Cout, n_pix).transpose(1, 2, 0)        # (c, s, j)
    w1e = jnp.pad(w1e, ((0, 0), (0, 0), (0, H1p - H1)))
    w1e = w1e.reshape(Cout, n_pix * H1p).astype(jnp.bfloat16)    # (16, 2048)
    b1m = jnp.pad(fb1.reshape(1, H1).astype(jnp.float32), ((0, 0), (0, H1p - H1)))
    w2m = jnp.pad(fw2.T, ((0, H1p - H1), (0, 0))).astype(jnp.bfloat16)   # (H1p, 2)
    b2m = fb2.reshape(1, -1).astype(jnp.float32)

    return pl.pallas_call(
        functools.partial(head_kernel, n_pix=n_pix, bpad=bpad, batch=B, h1p=H1p),
        out_shape=jax.ShapeDtypeStruct((B, fw2.shape[0]), jnp.float32),
        in_specs=[_VMEM] * 7,
        out_specs=_VMEM,
        compiler_params=_compiler_params(),
    )(P, w3m, b3m, w1e, b1m, w2m, b2m)


def three_layer_cnn_forward(x, params):
    """x: (B, 3, 64, 64) NCHW f32 (the spatial size fc1's 16*4*4 input implies)."""
    a = x.transpose(1, 0, 2, 3)                          # one-time NCHW -> channel-first
    a = conv_relu_pool(a, params["w1"], params["b1"])    # (6,  B, 30, 30) bf16
    a = conv_relu_pool(a, params["w2"], params["b2"])    # (16, B, 13, 13) bf16
    return conv_fc_head(a, params)                       # (B, 2) f32


# ----------------------------------------------------------------------------
# Pure-JAX reference (mirrors the PyTorch forward) for a sanity check
# ----------------------------------------------------------------------------
def reference_forward(x, params):
    def conv(x, w, b):
        y = jax.lax.conv_general_dilated(
            x, w, window_strides=(1, 1), padding="VALID",
            dimension_numbers=("NCHW", "OIHW", "NCHW"),
        )
        return y + b[None, :, None, None]

    def pool(x):
        return jax.lax.reduce_window(
            x, -jnp.inf, jax.lax.max, (1, 1, 2, 2), (1, 1, 2, 2), "VALID"
        )

    x = pool(jax.nn.relu(conv(x, params["w1"], params["b1"])))
    x = pool(jax.nn.relu(conv(x, params["w2"], params["b2"])))
    x = pool(jax.nn.relu(conv(x, params["w3"], params["b3"])))
    x = x.reshape(x.shape[0], 16 * 4 * 4)
    x = jax.nn.relu(x @ params["fw1"].T + params["fb1"])
    return x @ params["fw2"].T + params["fb2"]


# ----------------------------------------------------------------------------
def make_params(key):
    def u(k, shape, fan_in):
        bound = 1.0 / np.sqrt(fan_in)
        return jax.random.uniform(k, shape, jnp.float32, -bound, bound)

    ks = jax.random.split(key, 10)
    return {
        "w1": u(ks[0], (6, 3, 5, 5), 3 * 5 * 5),
        "b1": u(ks[1], (6,), 3 * 5 * 5),
        "w2": u(ks[2], (16, 6, 5, 5), 6 * 5 * 5),
        "b2": u(ks[3], (16,), 6 * 5 * 5),
        "w3": u(ks[4], (16, 16, 6, 6), 16 * 6 * 6),
        "b3": u(ks[5], (16,), 16 * 6 * 6),
        "fw1": u(ks[6], (120, 256), 256),
        "fb1": u(ks[7], (120,), 256),
        "fw2": u(ks[8], (2, 120), 120),
        "fb2": u(ks[9], (2,), 120),
    }


if __name__ == "__main__":
    key = jax.random.PRNGKey(0)
    pkey, xkey = jax.random.split(key)
    params = make_params(pkey)

    # batch=2, 3-channel 64x64 images (the spatial size the forward/fc1 implies)
    x = jax.random.normal(xkey, (2, 3, 64, 64), jnp.float32)

    fwd = jax.jit(three_layer_cnn_forward)
    out = jax.block_until_ready(fwd(x, params))
    assert out.shape == (2, 2) and out.dtype == jnp.float32

    ref = jax.block_until_ready(reference_forward(x, params))
    np.testing.assert_allclose(np.asarray(out), np.asarray(ref), rtol=2e-2, atol=2e-2)

    print("KERNEL_OK")
</pallas_src>

<mosaic_0001>
module attributes {stable_mosaic.version = 11 : i64} {
  func.func @conv_pool_kernel(%arg0: memref<80x7680xbf16, #tpu.memory_space<vmem>>, %arg1: memref<8x80xbf16, #tpu.memory_space<vmem>>, %arg2: memref<8x1xf32, #tpu.memory_space<vmem>>, %arg3: memref<8x1920xbf16, #tpu.memory_space<vmem>>) attributes {dimension_semantics = [], scalar_prefetch = 0 : i64, scratch_operands = 0 : i64, tpu.core_type = #tpu.core_type<tc>} {
    %c0 = arith.constant 0 : index
    %c0_0 = arith.constant 0 : index
    %0 = vector.load %arg1[%c0, %c0_0] : memref<8x80xbf16, #tpu.memory_space<vmem>>, vector<8x80xbf16>
    %c0_1 = arith.constant 0 : index
    %c0_2 = arith.constant 0 : index
    %1 = vector.load %arg0[%c0_1, %c0_2] : memref<80x7680xbf16, #tpu.memory_space<vmem>>, vector<80x7680xbf16>
    %cst = arith.constant dense<0.000000e+00> : vector<8x7680xf32>
    %2 = tpu.matmul %0, %1, %cst {dimension_numbers = #tpu.dot_dimension_numbers<[1], [0], [0], [1], [0, 0, 1, 1], [], []>} : vector<8x80xbf16>, vector<80x7680xbf16>, vector<8x7680xf32> -> vector<8x7680xf32>
    %3 = vector.extract_strided_slice %2 {offsets = [0, 0], sizes = [8, 1920], strides = [1, 1]} : vector<8x7680xf32> to vector<8x1920xf32>
    %4 = vector.extract_strided_slice %2 {offsets = [0, 1920], sizes = [8, 1920], strides = [1, 1]} : vector<8x7680xf32> to vector<8x1920xf32>
    %5 = arith.maximumf %3, %4 : vector<8x1920xf32>
    %6 = vector.extract_strided_slice %2 {offsets = [0, 3840], sizes = [8, 1920], strides = [1, 1]} : vector<8x7680xf32> to vector<8x1920xf32>
    %7 = vector.extract_strided_slice %2 {offsets = [0, 5760], sizes = [8, 1920], strides = [1, 1]} : vector<8x7680xf32> to vector<8x1920xf32>
    %8 = arith.maximumf %6, %7 : vector<8x1920xf32>
    %9 = arith.maximumf %5, %8 : vector<8x1920xf32>
    %c0_3 = arith.constant 0 : index
    %c0_4 = arith.constant 0 : index
    %10 = vector.load %arg2[%c0_3, %c0_4] : memref<8x1xf32, #tpu.memory_space<vmem>>, vector<8x1xf32>
    %11 = vector.broadcast %10 : vector<8x1xf32> to vector<8x1920xf32>
    %12 = arith.addf %9, %11 : vector<8x1920xf32>
    %cst_5 = arith.constant 0.000000e+00 : f32
    %13 = vector.broadcast %cst_5 : f32 to vector<8x1920xf32>
    %14 = arith.maximumf %12, %13 : vector<8x1920xf32>
    %15 = arith.truncf %14 : vector<8x1920xf32> to vector<8x1920xbf16>
    %c0_6 = arith.constant 0 : index
    %c0_7 = arith.constant 0 : index
    %16 = vector.load %arg3[%c0_6, %c0_7] : memref<8x1920xbf16, #tpu.memory_space<vmem>>, vector<8x1920xbf16>
    tpu.vector_store %arg3[%c0_6, %c0_7], %15 {strides = array<i32>} : memref<8x1920xbf16, #tpu.memory_space<vmem>>, vector<8x1920xbf16>,
    return
  }
}

module attributes {stable_mosaic.version = 11 : i64} {
  func.func @conv_pool_kernel(%arg0: memref<160x1536xbf16, #tpu.memory_space<vmem>>, %arg1: memref<16x160xbf16, #tpu.memory_space<vmem>>, %arg2: memref<16x1xf32, #tpu.memory_space<vmem>>, %arg3: memref<16x384xbf16, #tpu.memory_space<vmem>>) attributes {dimension_semantics = [], scalar_prefetch = 0 : i64, scratch_operands = 0 : i64, tpu.core_type = #tpu.core_type<tc>} {
    %c0 = arith.constant 0 : index
    %c0_0 = arith.constant 0 : index
    %0 = vector.load %arg1[%c0, %c0_0] : memref<16x160xbf16, #tpu.memory_space<vmem>>, vector<16x160xbf16>
    %c0_1 = arith.constant 0 : index
    %c0_2 = arith.constant 0 : index
    %1 = vector.load %arg0[%c0_1, %c0_2] : memref<160x1536xbf16, #tpu.memory_space<vmem>>, vector<160x1536xbf16>
    %cst = arith.constant dense<0.000000e+00> : vector<16x1536xf32>
    %2 = tpu.matmul %0, %1, %cst {dimension_numbers = #tpu.dot_dimension_numbers<[1], [0], [0], [1], [0, 0, 1, 1], [], []>} : vector<16x160xbf16>, vector<160x1536xbf16>, vector<16x1536xf32> -> vector<16x1536xf32>
    %3 = vector.extract_strided_slice %2 {offsets = [0, 0], sizes = [16, 384], strides = [1, 1]} : vector<16x1536xf32> to vector<16x384xf32>
    %4 = vector.extract_strided_slice %2 {offsets = [0, 384], sizes = [16, 384], strides = [1, 1]} : vector<16x1536xf32> to vector<16x384xf32>
    %5 = arith.maximumf %3, %4 : vector<16x384xf32>
    %6 = vector.extract_strided_slice %2 {offsets = [0, 768], sizes = [16, 384], strides = [1, 1]} : vector<16x1536xf32> to vector<16x384xf32>
    %7 = vector.extract_strided_slice %2 {offsets = [0, 1152], sizes = [16, 384], strides = [1, 1]} : vector<16x1536xf32> to vector<16x384xf32>
    %8 = arith.maximumf %6, %7 : vector<16x384xf32>
    %9 = arith.maximumf %5, %8 : vector<16x384xf32>
    %c0_3 = arith.constant 0 : index
    %c0_4 = arith.constant 0 : index
    %10 = vector.load %arg2[%c0_3, %c0_4] : memref<16x1xf32, #tpu.memory_space<vmem>>, vector<16x1xf32>
    %11 = vector.broadcast %10 : vector<16x1xf32> to vector<16x384xf32>
    %12 = arith.addf %9, %11 : vector<16x384xf32>
    %cst_5 = arith.constant 0.000000e+00 : f32
    %13 = vector.broadcast %cst_5 : f32 to vector<16x384xf32>
    %14 = arith.maximumf %12, %13 : vector<16x384xf32>
    %15 = arith.truncf %14 : vector<16x384xf32> to vector<16x384xbf16>
    %c0_6 = arith.constant 0 : index
    %c0_7 = arith.constant 0 : index
    %16 = vector.load %arg3[%c0_6, %c0_7] : memref<16x384xbf16, #tpu.memory_space<vmem>>, vector<16x384xbf16>
    tpu.vector_store %arg3[%c0_6, %c0_7], %15 {strides = array<i32>} : memref<16x384xbf16, #tpu.memory_space<vmem>>, vector<16x384xbf16>,
    return
  }
}

module attributes {stable_mosaic.version = 11 : i64} {
  func.func @head_kernel(%arg0: memref<512x640xbf16, #tpu.memory_space<vmem>>, %arg1: memref<640x16xbf16, #tpu.memory_space<vmem>>, %arg2: memref<1x16xf32, #tpu.memory_space<vmem>>, %arg3: memref<16x2048xbf16, #tpu.memory_space<vmem>>, %arg4: memref<1x128xf32, #tpu.memory_space<vmem>>, %arg5: memref<128x2xbf16, #tpu.memory_space<vmem>>, %arg6: memref<1x2xf32, #tpu.memory_space<vmem>>, %arg7: memref<2x2xf32, #tpu.memory_space<vmem>>) attributes {dimension_semantics = [], scalar_prefetch = 0 : i64, scratch_operands = 0 : i64, tpu.core_type = #tpu.core_type<tc>} {
    %c0 = arith.constant 0 : index
    %c0_0 = arith.constant 0 : index
    %0 = vector.load %arg0[%c0, %c0_0] : memref<512x640xbf16, #tpu.memory_space<vmem>>, vector<512x640xbf16>
    %c0_1 = arith.constant 0 : index
    %c0_2 = arith.constant 0 : index
    %1 = vector.load %arg1[%c0_1, %c0_2] : memref<640x16xbf16, #tpu.memory_space<vmem>>, vector<640x16xbf16>
    %cst = arith.constant dense<0.000000e+00> : vector<512x16xf32>
    %2 = tpu.matmul %0, %1, %cst {dimension_numbers = #tpu.dot_dimension_numbers<[1], [0], [0], [1], [0, 0, 1, 1], [], []>} : vector<512x640xbf16>, vector<640x16xbf16>, vector<512x16xf32> -> vector<512x16xf32>
    %3 = vector.extract_strided_slice %2 {offsets = [0, 0], sizes = [128, 16], strides = [1, 1]} : vector<512x16xf32> to vector<128x16xf32>
    %4 = vector.extract_strided_slice %2 {offsets = [128, 0], sizes = [128, 16], strides = [1, 1]} : vector<512x16xf32> to vector<128x16xf32>
    %5 = arith.maximumf %3, %4 : vector<128x16xf32>
    %6 = vector.extract_strided_slice %2 {offsets = [256, 0], sizes = [128, 16], strides = [1, 1]} : vector<512x16xf32> to vector<128x16xf32>
    %7 = vector.extract_strided_slice %2 {offsets = [384, 0], sizes = [128, 16], strides = [1, 1]} : vector<512x16xf32> to vector<128x16xf32>
    %8 = arith.maximumf %6, %7 : vector<128x16xf32>
    %9 = arith.maximumf %5, %8 : vector<128x16xf32>
    %c0_3 = arith.constant 0 : index
    %c0_4 = arith.constant 0 : index
    %10 = vector.load %arg2[%c0_3, %c0_4] : memref<1x16xf32, #tpu.memory_space<vmem>>, vector<1x16xf32>
    %11 = vector.broadcast %10 : vector<1x16xf32> to vector<128x16xf32>
    %12 = arith.addf %9, %11 : vector<128x16xf32>
    %cst_5 = arith.constant 0.000000e+00 : f32
    %13 = vector.broadcast %cst_5 : f32 to vector<128x16xf32>
    %14 = arith.maximumf %12, %13 : vector<128x16xf32>
    %15 = arith.truncf %14 : vector<128x16xf32> to vector<128x16xbf16>
    %c0_6 = arith.constant 0 : index
    %c0_7 = arith.constant 0 : index
    %16 = vector.load %arg3[%c0_6, %c0_7] : memref<16x2048xbf16, #tpu.memory_space<vmem>>, vector<16x2048xbf16>
    %cst_8 = arith.constant dense<0.000000e+00> : vector<128x2048xf32>
    %17 = tpu.matmul %15, %16, %cst_8 {dimension_numbers = #tpu.dot_dimension_numbers<[1], [0], [0], [1], [0, 0, 1, 1], [], []>} : vector<128x16xbf16>, vector<16x2048xbf16>, vector<128x2048xf32> -> vector<128x2048xf32>
    %18 = vector.extract_strided_slice %17 {offsets = [0, 0], sizes = [8, 128], strides = [1, 1]} : vector<128x2048xf32> to vector<8x128xf32>
    %19 = vector.extract_strided_slice %17 {offsets = [8, 128], sizes = [8, 128], strides = [1, 1]} : vector<128x2048xf32> to vector<8x128xf32>
    %20 = arith.addf %18, %19 : vector<8x128xf32>
    %21 = vector.extract_strided_slice %17 {offsets = [16, 256], sizes = [8, 128], strides = [1, 1]} : vector<128x2048xf32> to vector<8x128xf32>
    %22 = arith.addf %20, %21 : vector<8x128xf32>
    %23 = vector.extract_strided_slice %17 {offsets = [24, 384], sizes = [8, 128], strides = [1, 1]} : vector<128x2048xf32> to vector<8x128xf32>
    %24 = arith.addf %22, %23 : vector<8x128xf32>
    %25 = vector.extract_strided_slice %17 {offsets = [32, 512], sizes = [8, 128], strides = [1, 1]} : vector<128x2048xf32> to vector<8x128xf32>
    %26 = arith.addf %24, %25 : vector<8x128xf32>
    %27 = vector.extract_strided_slice %17 {offsets = [40, 640], sizes = [8, 128], strides = [1, 1]} : vector<128x2048xf32> to vector<8x128xf32>
    %28 = arith.addf %26, %27 : vector<8x128xf32>
    %29 = vector.extract_strided_slice %17 {offsets = [48, 768], sizes = [8, 128], strides = [1, 1]} : vector<128x2048xf32> to vector<8x128xf32>
    %30 = arith.addf %28, %29 : vector<8x128xf32>
    %31 = vector.extract_strided_slice %17 {offsets = [56, 896], sizes = [8, 128], strides = [1, 1]} : vector<128x2048xf32> to vector<8x128xf32>
    %32 = arith.addf %30, %31 : vector<8x128xf32>
    %33 = vector.extract_strided_slice %17 {offsets = [64, 1024], sizes = [8, 128], strides = [1, 1]} : vector<128x2048xf32> to vector<8x128xf32>
    %34 = arith.addf %32, %33 : vector<8x128xf32>
    %35 = vector.extract_strided_slice %17 {offsets = [72, 1152], sizes = [8, 128], strides = [1, 1]} : vector<128x2048xf32> to vector<8x128xf32>
    %36 = arith.addf %34, %35 : vector<8x128xf32>
    %37 = vector.extract_strided_slice %17 {offsets = [80, 1280], sizes = [8, 128], strides = [1, 1]} : vector<128x2048xf32> to vector<8x128xf32>
    %38 = arith.addf %36, %37 : vector<8x128xf32>
    %39 = vector.extract_strided_slice %17 {offsets = [88, 1408], sizes = [8, 128], strides = [1, 1]} : vector<128x2048xf32> to vector<8x128xf32>
    %40 = arith.addf %38, %39 : vector<8x128xf32>
    %41 = vector.extract_strided_slice %17 {offsets = [96, 1536], sizes = [8, 128], strides = [1, 1]} : vector<128x2048xf32> to vector<8x128xf32>
    %42 = arith.addf %40, %41 : vector<8x128xf32>
    %43 = vector.extract_strided_slice %17 {offsets = [104, 1664], sizes = [8, 128], strides = [1, 1]} : vector<128x2048xf32> to vector<8x128xf32>
    %44 = arith.addf %42, %43 : vector<8x128xf32>
    %45 = vector.extract_strided_slice %17 {offsets = [112, 1792], sizes = [8, 128], strides = [1, 1]} : vector<128x2048xf32> to vector<8x128xf32>
    %46 = arith.addf %44, %45 : vector<8x128xf32>
    %47 = vector.extract_strided_slice %17 {offsets = [120, 1920], sizes = [8, 128], strides = [1, 1]} : vector<128x2048xf32> to vector<8x128xf32>
    %48 = arith.addf %46, %47 : vector<8x128xf32>
    %c0_9 = arith.constant 0 : index
    %c0_10 = arith.constant 0 : index
    %49 = vector.load %arg4[%c0_9, %c0_10] : memref<1x128xf32, #tpu.memory_space<vmem>>, vector<1x128xf32>
    %50 = vector.broadcast %49 : vector<1x128xf32> to vector<8x128xf32>
    %51 = arith.addf %48, %50 : vector<8x128xf32>
    %cst_11 = arith.constant 0.000000e+00 : f32
    %52 = vector.broadcast %cst_11 : f32 to vector<8x128xf32>
    %53 = arith.maximumf %51, %52 : vector<8x128xf32>
    %54 = arith.truncf %53 : vector<8x128xf32> to vector<8x128xbf16>
    %c0_12 = arith.constant 0 : index
    %c0_13 = arith.constant 0 : index
    %55 = vector.load %arg5[%c0_12, %c0_13] : memref<128x2xbf16, #tpu.memory_space<vmem>>, vector<128x2xbf16>
    %cst_14 = arith.constant dense<0.000000e+00> : vector<8x2xf32>
    %56 = tpu.matmul %54, %55, %cst_14 {dimension_numbers = #tpu.dot_dimension_numbers<[1], [0], [0], [1], [0, 0, 1, 1], [], []>} : vector<8x128xbf16>, vector<128x2xbf16>, vector<8x2xf32> -> vector<8x2xf32>
    %c0_15 = arith.constant 0 : index
    %c0_16 = arith.constant 0 : index
    %57 = vector.load %arg6[%c0_15, %c0_16] : memref<1x2xf32, #tpu.memory_space<vmem>>, vector<1x2xf32>
    %58 = vector.broadcast %57 : vector<1x2xf32> to vector<8x2xf32>
    %59 = arith.addf %56, %58 : vector<8x2xf32>
    %60 = vector.extract_strided_slice %59 {offsets = [0, 0], sizes = [2, 2], strides = [1, 1]} : vector<8x2xf32> to vector<2x2xf32>
    %c0_17 = arith.constant 0 : index
    %c0_18 = arith.constant 0 : index
    %61 = vector.load %arg7[%c0_17, %c0_18] : memref<2x2xf32, #tpu.memory_space<vmem>>, vector<2x2xf32>
    tpu.vector_store %arg7[%c0_17, %c0_18], %60 {strides = array<i32>} : memref<2x2xf32, #tpu.memory_space<vmem>>, vector<2x2xf32>,
    return
  }
}

</mosaic_0001>

<bundles_post_ra>
// kernel: three_layer_cnn_forward.3
= control target key start
LH: loop header
LB: loop body
LE: loop exit
PB: predicated region body
PF: predicated region fallthrough
CT: control target
= control target key end

     0   :  { %v4003_v1 = vmov 0   ;;  %vm1816_vm0 = vcmask 654336   ;;  %s5198_s0 = inlined_call_operand.vmem [shape: bf16[80,7680], index: 0, kind: input, shape index: {}]   ;;  %s5199_s1 = inlined_call_operand.vmem [shape: bf16[8,80], index: 1, kind: input, shape index: {}]   ;;  %s5200_s2 = inlined_call_operand.vmem [shape: f32[8,1], index: 2, kind: input, shape index: {}]   ;;  %s5201_s3 = inlined_call_operand.vmem [shape: bf16[8,1920], index: 3, kind: output, shape index: {}]  }
   0x1   :  { %v3552_v0 = vld [vmem:[%s5198_s0 + $0x784] ss:$240 sps:$4 sm:$0xff]   ;;  %1852 = vmatprep.mubr.bf16.mxu0 %v4003_v1  ;;  %1893 = vmatprep.mubr.bf16.mxu1 %v4003_v1  ;;  %v3554_v2 = vld [vmem:[%s5198_s0 + $0x78c] ss:$240 sps:$4 sm:$0xff]   ;;  %v3556_v3 = vld [vmem:[%s5198_s0 + $0x780] ss:$240 sps:$4 sm:$0xff]  }
   0x2   :  { %3551 = vset.pattern.permute.xlu0 %v4003_v1  ;;  %1826 = vmatprep.subr.bf16.mxu0 %v3552_v0  ;;  %v3557_v4 = vld [vmem:[%s5198_s0 + $0x788] ss:$240 sps:$4 sm:$0xff]   ;;  %v3558_v5 = vld [vmem:[%s5198_s0 + $0x5a4] ss:$240 sps:$4 sm:$0xff]   ;;  %v3560_v6 = vld [vmem:[%s5198_s0 + $0x5ac] ss:$240 sps:$4 sm:$0xff]  }
   0x3   :  { %1867 = vmatprep.subr.bf16.mxu1 %v3554_v2  ;;  %1827 = vmatpush1.bf16.msra.mxu0 %v3556_v3  ;;  %v3562_v7 = vld [vmem:[%s5198_s0 + $0x5a0] ss:$240 sps:$4 sm:$0xff]   ;;  %v3563_v8 = vld [vmem:[%s5198_s0 + $0x5a8] ss:$240 sps:$4 sm:$0xff]   ;;  %v3564_v9 = vld [vmem:[%s5198_s0 + $0x3c4] ss:$240 sps:$4 sm:$0xff]  }
   0x4   :  { %1868 = vmatpush1.bf16.msra.mxu1 %v3557_v4  ;;  %1828 = vmatprep.subr.bf16.mxu0 %v3558_v5  ;;  %v3566_v10 = vld [vmem:[%s5198_s0 + $0x3cc] ss:$240 sps:$4 sm:$0xff]   ;;  %v3568_v11 = vld [vmem:[%s5198_s0 + $0x3c0] ss:$240 sps:$4 sm:$0xff]   ;;  %v3569_v12 = vld [vmem:[%s5198_s0 + $0x3c8] ss:$240 sps:$4 sm:$0xff]  }
   0x5   :  { %1869 = vmatprep.subr.bf16.mxu1 %v3560_v6  ;;  %v3570_v13 = vld [vmem:[%s5198_s0 + $0x1e4] ss:$240 sps:$4 sm:$0xff]   ;;  %v3572_v14 = vld [vmem:[%s5198_s0 + $0x1ec] ss:$240 sps:$4 sm:$0xff]   ;;  %v3574_v15 = vld [vmem:[%s5198_s0 + $0x1e0] ss:$240 sps:$4 sm:$0xff]  }
   0x6   :  { %v3575_v16 = vld [vmem:[%s5198_s0 + $0x1e8] ss:$240 sps:$4 sm:$0xff]   ;;  %v3576_v17 = vld [vmem:[%s5198_s0 + $0x4] ss:$240 sps:$4 sm:$0xff]   ;;  %v3578_v18 = vld [vmem:[%s5198_s0 + $0xc] ss:$240 sps:$4 sm:$0xff]  }
   0x7   :  { %1829 = vmatpush1.bf16.msra.mxu0 %v3562_v7  ;;  %v3580_v19 = vld [vmem:[%s5198_s0] ss:$240 sps:$4 sm:$0xff]   ;;  %v3581_v20 = vld [vmem:[%s5198_s0 + $0x8] ss:$240 sps:$4 sm:$0xff]   ;;  %v3584_v21 = vld [vmem:[%s5198_s0 + $0x794] ss:$240 sps:$4 sm:$0xff]  }
   0x8   :  { %1870 = vmatpush1.bf16.msra.mxu1 %v3563_v8  ;;  %1830 = vmatprep.subr.bf16.mxu0 %v3564_v9  ;;  %v3587_v22 = vld [vmem:[%s5198_s0 + $0x79c] ss:$240 sps:$4 sm:$0xff]   ;;  %v4096_v23 = vld [vmem:[%s5199_s1] sm:$0xf]  ;;  %v3585_v25 = vld [vmem:[%s5198_s0 + $0x798] ss:$240 sps:$4 sm:$0xff]  }
   0x9   :  { %1871 = vmatprep.subr.bf16.mxu1 %v3566_v10  ;;  %v3582_v24 = vld [vmem:[%s5198_s0 + $0x790] ss:$240 sps:$4 sm:$0xff]   ;;  %v3590_v26 = vld [vmem:[%s5198_s0 + $0x5b4] ss:$240 sps:$4 sm:$0xff]   ;;  %v3593_v27 = vld [vmem:[%s5198_s0 + $0x5bc] ss:$240 sps:$4 sm:$0xff]  }
   0xa   :  { %v3588_v28 = vld [vmem:[%s5198_s0 + $0x5b0] ss:$240 sps:$4 sm:$0xff]   ;;  %v3591_v29 = vld [vmem:[%s5198_s0 + $0x5b8] ss:$240 sps:$4 sm:$0xff]   ;;  %v3596_v30 = vld [vmem:[%s5198_s0 + $0x3d4] ss:$240 sps:$4 sm:$0xff]  }
   0xb   :  { %1831 = vmatpush1.bf16.msra.mxu0 %v3568_v11  ;;  %v3599_v31 = vld [vmem:[%s5198_s0 + $0x3dc] ss:$240 sps:$4 sm:$0xff]   ;;  %v3594_v32 = vld [vmem:[%s5198_s0 + $0x3d0] ss:$240 sps:$4 sm:$0xff]   ;;  %v3597_v33 = vld [vmem:[%s5198_s0 + $0x3d8] ss:$240 sps:$4 sm:$0xff]  }
   0xc   :  { %1872 = vmatpush1.bf16.msra.mxu1 %v3569_v12  ;;  %1832 = vmatprep.subr.bf16.mxu0 %v3570_v13  ;;  %v3602_v34 = vld [vmem:[%s5198_s0 + $0x1f4] ss:$240 sps:$4 sm:$0xff]   ;;  %v3605_v35 = vld [vmem:[%s5198_s0 + $0x1fc] ss:$240 sps:$4 sm:$0xff]   ;;  %v3600_v36 = vld [vmem:[%s5198_s0 + $0x1f0] ss:$240 sps:$4 sm:$0xff]  }
   0xd   :  { %1873 = vmatprep.subr.bf16.mxu1 %v3572_v14  ;;  %v3603_v37 = vld [vmem:[%s5198_s0 + $0x1f8] ss:$240 sps:$4 sm:$0xff]   ;;  %v3608_v38 = vld [vmem:[%s5198_s0 + $0x14] ss:$240 sps:$4 sm:$0xff]   ;;  %v3611_v39 = vld [vmem:[%s5198_s0 + $0x1c] ss:$240 sps:$4 sm:$0xff]  }
   0xe   :  { %v3606_v40 = vld [vmem:[%s5198_s0 + $0x10] ss:$240 sps:$4 sm:$0xff]   ;;  %v3609_v41 = vld [vmem:[%s5198_s0 + $0x18] ss:$240 sps:$4 sm:$0xff]   ;;  %v3614_v42 = vld [vmem:[%s5198_s0 + $0x7a4] ss:$240 sps:$4 sm:$0xff]  }
   0xf   :  { %1833 = vmatpush1.bf16.msra.mxu0 %v3574_v15  ;;  %v3617_v43 = vld [vmem:[%s5198_s0 + $0x7ac] ss:$240 sps:$4 sm:$0xff]   ;;  %v3612_v44 = vld [vmem:[%s5198_s0 + $0x7a0] ss:$240 sps:$4 sm:$0xff]   ;;  %v3615_v45 = vld [vmem:[%s5198_s0 + $0x7a8] ss:$240 sps:$4 sm:$0xff]  }
  0x10   :  { %1874 = vmatpush1.bf16.msra.mxu1 %v3575_v16  ;;  %1834 = vmatprep.subr.bf16.mxu0 %v3576_v17  ;;  %v3620_v46 = vld [vmem:[%s5198_s0 + $0x5c4] ss:$240 sps:$4 sm:$0xff]   ;;  %v3623_v47 = vld [vmem:[%s5198_s0 + $0x5cc] ss:$240 sps:$4 sm:$0xff]   ;;  %v3618_v48 = vld [vmem:[%s5198_s0 + $0x5c0] ss:$240 sps:$4 sm:$0xff]  }
  0x11   :  { %1875 = vmatprep.subr.bf16.mxu1 %v3578_v18  ;;  %v3621_v49 = vld [vmem:[%s5198_s0 + $0x5c8] ss:$240 sps:$4 sm:$0xff]   ;;  %v3626_v50 = vld [vmem:[%s5198_s0 + $0x3e4] ss:$240 sps:$4 sm:$0xff]   ;;  %v3629_v51 = vld [vmem:[%s5198_s0 + $0x3ec] ss:$240 sps:$4 sm:$0xff]  }
  0x12   :  { %v3624_v52 = vld [vmem:[%s5198_s0 + $0x3e0] ss:$240 sps:$4 sm:$0xff]   ;;  %v3627_v53 = vld [vmem:[%s5198_s0 + $0x3e8] ss:$240 sps:$4 sm:$0xff]   ;;  %v3632_v54 = vld [vmem:[%s5198_s0 + $0x204] ss:$240 sps:$4 sm:$0xff]  }
  0x13   :  { %1835 = vmatpush1.bf16.msra.mxu0 %v3580_v19  ;;  %v3635_v55 = vld [vmem:[%s5198_s0 + $0x20c] ss:$240 sps:$4 sm:$0xff]   ;;  %v3630_v56 = vld [vmem:[%s5198_s0 + $0x200] ss:$240 sps:$4 sm:$0xff]   ;;  %v3633_v57 = vld [vmem:[%s5198_s0 + $0x208] ss:$240 sps:$4 sm:$0xff]  }
  0x14   :  { %1876 = vmatpush1.bf16.msra.mxu1 %v3581_v20  ;;  %1908 = vmatprep.subr.bf16.mxu0 %v3584_v21  ;;  %v3638_v58 = vld [vmem:[%s5198_s0 + $0x24] ss:$240 sps:$4 sm:$0xff]   ;;  %v3641_v59 = vld [vmem:[%s5198_s0 + $0x2c] ss:$240 sps:$4 sm:$0xff]   ;;  %v3636_v60 = vld [vmem:[%s5198_s0 + $0x20] ss:$240 sps:$4 sm:$0xff]  }
  0x15   :  { %1949 = vmatprep.subr.bf16.mxu1 %v3587_v22  ;;  %v3639_v61 = vld [vmem:[%s5198_s0 + $0x28] ss:$240 sps:$4 sm:$0xff]   ;;  %v3644_v62 = vld [vmem:[%s5198_s0 + $0x7b4] ss:$240 sps:$4 sm:$0xff]   ;;  %v3647_v63 = vld [vmem:[%s5198_s0 + $0x7bc] ss:$240 sps:$4 sm:$0xff]  }
  0x16   :  { %3504 = vmatmul.mubr.msk.bf16.vlgmr.msra.gmra.mxu0 %vm1816_vm0, %v4096_v23  ;;  %v3642_v0 = vld [vmem:[%s5198_s0 + $0x7b0] ss:$240 sps:$4 sm:$0xff]   ;;  %v3645_v2 = vld [vmem:[%s5198_s0 + $0x7b8] ss:$240 sps:$4 sm:$0xff]   ;;  %v3650_v3 = vld [vmem:[%s5198_s0 + $0x5d4] ss:$240 sps:$4 sm:$0xff]  }
  0x17   :  { %3505 = vmatmul.mubr.msk.bf16.vlgmr.msra.gmra.mxu1 %vm1816_vm0, %v4096_v23  ;;  %1909 = vmatpush1.bf16.msra.mxu0 %v3582_v24  ;;  %v3653_v4 = vld [vmem:[%s5198_s0 + $0x5dc] ss:$240 sps:$4 sm:$0xff]   ;;  %v3648_v5 = vld [vmem:[%s5198_s0 + $0x5d0] ss:$240 sps:$4 sm:$0xff]   ;;  %v3651_v6 = vld [vmem:[%s5198_s0 + $0x5d8] ss:$240 sps:$4 sm:$0xff]  }
  0x18   :  { %1950 = vmatpush1.bf16.msra.mxu1 %v3585_v25  ;;  %1910 = vmatprep.subr.bf16.mxu0 %v3590_v26  ;;  %v3656_v7 = vld [vmem:[%s5198_s0 + $0x3f4] ss:$240 sps:$4 sm:$0xff]   ;;  %v3659_v8 = vld [vmem:[%s5198_s0 + $0x3fc] ss:$240 sps:$4 sm:$0xff]   ;;  %v3654_v9 = vld [vmem:[%s5198_s0 + $0x3f0] ss:$240 sps:$4 sm:$0xff]  }
  0x19   :  { %1951 = vmatprep.subr.bf16.mxu1 %v3593_v27  ;;  %1934 = vmatprep.mubr.bf16.mxu0 %v4003_v1  ;;  %v3657_v10 = vld [vmem:[%s5198_s0 + $0x3f8] ss:$240 sps:$4 sm:$0xff]   ;;  %v3662_v11 = vld [vmem:[%s5198_s0 + $0x214] ss:$240 sps:$4 sm:$0xff]   ;;  %v3665_v12 = vld [vmem:[%s5198_s0 + $0x21c] ss:$240 sps:$4 sm:$0xff]  }
  0x1a   :  { %1975 = vmatprep.mubr.bf16.mxu1 %v4003_v1  ;;  %v3660_v13 = vld [vmem:[%s5198_s0 + $0x210] ss:$240 sps:$4 sm:$0xff]   ;;  %v3663_v14 = vld [vmem:[%s5198_s0 + $0x218] ss:$240 sps:$4 sm:$0xff]   ;;  %v3668_v15 = vld [vmem:[%s5198_s0 + $0x34] ss:$240 sps:$4 sm:$0xff]  }
  0x1b   :  { %1911 = vmatpush1.bf16.msra.mxu0 %v3588_v28  ;;  %v3671_v16 = vld [vmem:[%s5198_s0 + $0x3c] ss:$240 sps:$4 sm:$0xff]   ;;  %v3666_v17 = vld [vmem:[%s5198_s0 + $0x30] ss:$240 sps:$4 sm:$0xff]   ;;  %v3669_v18 = vld [vmem:[%s5198_s0 + $0x38] ss:$240 sps:$4 sm:$0xff]  }
  0x1c   :  { %1952 = vmatpush1.bf16.msra.mxu1 %v3591_v29  ;;  %1912 = vmatprep.subr.bf16.mxu0 %v3596_v30  ;;  %v3674_v19 = vld [vmem:[%s5198_s0 + $0x7c4] ss:$240 sps:$4 sm:$0xff]   ;;  %v3677_v20 = vld [vmem:[%s5198_s0 + $0x7cc] ss:$240 sps:$4 sm:$0xff]   ;;  %v3672_v21 = vld [vmem:[%s5198_s0 + $0x7c0] ss:$240 sps:$4 sm:$0xff]  }
  0x1d   :  { %1953 = vmatprep.subr.bf16.mxu1 %v3599_v31  ;;  %v3675_v22 = vld [vmem:[%s5198_s0 + $0x7c8] ss:$240 sps:$4 sm:$0xff]   ;;  %v3680_v24 = vld [vmem:[%s5198_s0 + $0x5e4] ss:$240 sps:$4 sm:$0xff]   ;;  %v3683_v25 = vld [vmem:[%s5198_s0 + $0x5ec] ss:$240 sps:$4 sm:$0xff]  }
  0x1e   :  { %v3678_v26 = vld [vmem:[%s5198_s0 + $0x5e0] ss:$240 sps:$4 sm:$0xff]   ;;  %v3681_v27 = vld [vmem:[%s5198_s0 + $0x5e8] ss:$240 sps:$4 sm:$0xff]   ;;  %v3686_v28 = vld [vmem:[%s5198_s0 + $0x404] ss:$240 sps:$4 sm:$0xff]  }
  0x1f   :  { %1913 = vmatpush1.bf16.msra.mxu0 %v3594_v32  ;;  %v3689_v29 = vld [vmem:[%s5198_s0 + $0x40c] ss:$240 sps:$4 sm:$0xff]   ;;  %v3684_v30 = vld [vmem:[%s5198_s0 + $0x400] ss:$240 sps:$4 sm:$0xff]   ;;  %v3687_v31 = vld [vmem:[%s5198_s0 + $0x408] ss:$240 sps:$4 sm:$0xff]  }
  0x20   :  { %1954 = vmatpush1.bf16.msra.mxu1 %v3597_v33  ;;  %1914 = vmatprep.subr.bf16.mxu0 %v3602_v34  ;;  %v3692_v32 = vld [vmem:[%s5198_s0 + $0x224] ss:$240 sps:$4 sm:$0xff]   ;;  %v3695_v33 = vld [vmem:[%s5198_s0 + $0x22c] ss:$240 sps:$4 sm:$0xff]   ;;  %v3690_v34 = vld [vmem:[%s5198_s0 + $0x220] ss:$240 sps:$4 sm:$0xff]  }
  0x21   :  { %1955 = vmatprep.subr.bf16.mxu1 %v3605_v35  ;;  %v3693_v35 = vld [vmem:[%s5198_s0 + $0x228] ss:$240 sps:$4 sm:$0xff]  }
  0x23   :  { %1915 = vmatpush1.bf16.msra.mxu0 %v3600_v36  ;;  %v3698_v36 = vld [vmem:[%s5198_s0 + $0x44] ss:$240 sps:$4 sm:$0xff]  }
  0x24   :  { %1956 = vmatpush1.bf16.msra.mxu1 %v3603_v37  ;;  %1916 = vmatprep.subr.bf16.mxu0 %v3608_v38  ;;  %v3701_v37 = vld [vmem:[%s5198_s0 + $0x4c] ss:$240 sps:$4 sm:$0xff]   ;;  %v3696_v38 = vld [vmem:[%s5198_s0 + $0x40] ss:$240 sps:$4 sm:$0xff]  }
  0x25   :  { %1957 = vmatprep.subr.bf16.mxu1 %v3611_v39  ;;  %v3699_v39 = vld [vmem:[%s5198_s0 + $0x48] ss:$240 sps:$4 sm:$0xff]  }
  0x27   :  { %1917 = vmatpush1.bf16.msra.mxu0 %v3606_v40  ;;  %v3704_v40 = vld [vmem:[%s5198_s0 + $0x7d4] ss:$240 sps:$4 sm:$0xff]  }
  0x28   :  { %1958 = vmatpush1.bf16.msra.mxu1 %v3609_v41  ;;  %1990 = vmatprep.subr.bf16.mxu0 %v3614_v42  ;;  %v3707_v41 = vld [vmem:[%s5198_s0 + $0x7dc] ss:$240 sps:$4 sm:$0xff]   ;;  %v3702_v42 = vld [vmem:[%s5198_s0 + $0x7d0] ss:$240 sps:$4 sm:$0xff]  }
  0x29   :  { %2031 = vmatprep.subr.bf16.mxu1 %v3617_v43  ;;  %v3705_v43 = vld [vmem:[%s5198_s0 + $0x7d8] ss:$240 sps:$4 sm:$0xff]  }
  0x2a   :  { %3506 = vmatmul.mubr.msk.bf16.vlgmr.msra.gmra.mxu0 %vm1816_vm0, %v4096_v23 }
  0x2b   :  { %3507 = vmatmul.mubr.msk.bf16.vlgmr.msra.gmra.mxu1 %vm1816_vm0, %v4096_v23  ;;  %1991 = vmatpush1.bf16.msra.mxu0 %v3612_v44  ;;  %v3710_v44 = vld [vmem:[%s5198_s0 + $0x5f4] ss:$240 sps:$4 sm:$0xff]  }
  0x2c   :  { %2032 = vmatpush1.bf16.msra.mxu1 %v3615_v45  ;;  %1992 = vmatprep.subr.bf16.mxu0 %v3620_v46  ;;  %v3713_v45 = vld [vmem:[%s5198_s0 + $0x5fc] ss:$240 sps:$4 sm:$0xff]   ;;  %v3708_v46 = vld [vmem:[%s5198_s0 + $0x5f0] ss:$240 sps:$4 sm:$0xff]  }
  0x2d   :  { %2033 = vmatprep.subr.bf16.mxu1 %v3623_v47  ;;  %2016 = vmatprep.mubr.bf16.mxu0 %v4003_v1  ;;  %v3711_v47 = vld [vmem:[%s5198_s0 + $0x5f8] ss:$240 sps:$4 sm:$0xff]  }
  0x2e   :  { %2057 = vmatprep.mubr.bf16.mxu1 %v4003_v1 }
  0x2f   :  { %1993 = vmatpush1.bf16.msra.mxu0 %v3618_v48  ;;  %v3716_v48 = vld [vmem:[%s5198_s0 + $0x414] ss:$240 sps:$4 sm:$0xff]  }
  0x30   :  { %2034 = vmatpush1.bf16.msra.mxu1 %v3621_v49  ;;  %1994 = vmatprep.subr.bf16.mxu0 %v3626_v50  ;;  %v3719_v49 = vld [vmem:[%s5198_s0 + $0x41c] ss:$240 sps:$4 sm:$0xff]   ;;  %v3714_v50 = vld [vmem:[%s5198_s0 + $0x410] ss:$240 sps:$4 sm:$0xff]  }
  0x31   :  { %2035 = vmatprep.subr.bf16.mxu1 %v3629_v51  ;;  %v3717_v51 = vld [vmem:[%s5198_s0 + $0x418] ss:$240 sps:$4 sm:$0xff]  }
  0x33   :  { %1995 = vmatpush1.bf16.msra.mxu0 %v3624_v52  ;;  %v3722_v52 = vld [vmem:[%s5198_s0 + $0x234] ss:$240 sps:$4 sm:$0xff]  }
  0x34   :  { %2036 = vmatpush1.bf16.msra.mxu1 %v3627_v53  ;;  %1996 = vmatprep.subr.bf16.mxu0 %v3632_v54  ;;  %v3725_v53 = vld [vmem:[%s5198_s0 + $0x23c] ss:$240 sps:$4 sm:$0xff]   ;;  %v3720_v54 = vld [vmem:[%s5198_s0 + $0x230] ss:$240 sps:$4 sm:$0xff]  }
  0x35   :  { %2037 = vmatprep.subr.bf16.mxu1 %v3635_v55  ;;  %v3723_v55 = vld [vmem:[%s5198_s0 + $0x238] ss:$240 sps:$4 sm:$0xff]  }
  0x37   :  { %1997 = vmatpush1.bf16.msra.mxu0 %v3630_v56  ;;  %v3728_v56 = vld [vmem:[%s5198_s0 + $0x54] ss:$240 sps:$4 sm:$0xff]  }
  0x38   :  { %2038 = vmatpush1.bf16.msra.mxu1 %v3633_v57  ;;  %1998 = vmatprep.subr.bf16.mxu0 %v3638_v58  ;;  %v3731_v57 = vld [vmem:[%s5198_s0 + $0x5c] ss:$240 sps:$4 sm:$0xff]   ;;  %v3726_v58 = vld [vmem:[%s5198_s0 + $0x50] ss:$240 sps:$4 sm:$0xff]  }
  0x39   :  { %2039 = vmatprep.subr.bf16.mxu1 %v3641_v59  ;;  %v3729_v59 = vld [vmem:[%s5198_s0 + $0x58] ss:$240 sps:$4 sm:$0xff]  }
  0x3b   :  { %1999 = vmatpush1.bf16.msra.mxu0 %v3636_v60  ;;  %v3734_v60 = vld [vmem:[%s5198_s0 + $0x7e4] ss:$240 sps:$4 sm:$0xff]  }
  0x3c   :  { %2040 = vmatpush1.bf16.msra.mxu1 %v3639_v61  ;;  %2072 = vmatprep.subr.bf16.mxu0 %v3644_v62  ;;  %v3737_v61 = vld [vmem:[%s5198_s0 + $0x7ec] ss:$240 sps:$4 sm:$0xff]   ;;  %v3732_v62 = vld [vmem:[%s5198_s0 + $0x7e0] ss:$240 sps:$4 sm:$0xff]  }
  0x3d   :  { %2113 = vmatprep.subr.bf16.mxu1 %v3647_v63  ;;  %v3735_v63 = vld [vmem:[%s5198_s0 + $0x7e8] ss:$240 sps:$4 sm:$0xff]  }
  0x3e   :  { %3508 = vmatmul.mubr.msk.bf16.vlgmr.msra.gmra.mxu0 %vm1816_vm0, %v4096_v23 }
  0x3f   :  { %3509 = vmatmul.mubr.msk.bf16.vlgmr.msra.gmra.mxu1 %vm1816_vm0, %v4096_v23  ;;  %2073 = vmatpush1.bf16.msra.mxu0 %v3642_v0  ;;  %v3740_v0 = vld [vmem:[%s5198_s0 + $0x604] ss:$240 sps:$4 sm:$0xff]  }
  0x40   :  { %2114 = vmatpush1.bf16.msra.mxu1 %v3645_v2  ;;  %2074 = vmatprep.subr.bf16.mxu0 %v3650_v3  ;;  %v3743_v2 = vld [vmem:[%s5198_s0 + $0x60c] ss:$240 sps:$4 sm:$0xff]   ;;  %v3738_v3 = vld [vmem:[%s5198_s0 + $0x600] ss:$240 sps:$4 sm:$0xff]  }
  0x41   :  { %2115 = vmatprep.subr.bf16.mxu1 %v3653_v4  ;;  %2098 = vmatprep.mubr.bf16.mxu0 %v4003_v1  ;;  %v3741_v4 = vld [vmem:[%s5198_s0 + $0x608] ss:$240 sps:$4 sm:$0xff]  }
  0x42   :  { %2139 = vmatprep.mubr.bf16.mxu1 %v4003_v1 }
  0x43   :  { %2075 = vmatpush1.bf16.msra.mxu0 %v3648_v5  ;;  %v3746_v5 = vld [vmem:[%s5198_s0 + $0x424] ss:$240 sps:$4 sm:$0xff]  }
  0x44   :  { %2116 = vmatpush1.bf16.msra.mxu1 %v3651_v6  ;;  %2076 = vmatprep.subr.bf16.mxu0 %v3656_v7  ;;  %v3749_v6 = vld [vmem:[%s5198_s0 + $0x42c] ss:$240 sps:$4 sm:$0xff]   ;;  %v3744_v7 = vld [vmem:[%s5198_s0 + $0x420] ss:$240 sps:$4 sm:$0xff]  }
  0x45   :  { %2117 = vmatprep.subr.bf16.mxu1 %v3659_v8  ;;  %v3747_v8 = vld [vmem:[%s5198_s0 + $0x428] ss:$240 sps:$4 sm:$0xff]  }
  0x47   :  { %2077 = vmatpush1.bf16.msra.mxu0 %v3654_v9  ;;  %v3752_v9 = vld [vmem:[%s5198_s0 + $0x244] ss:$240 sps:$4 sm:$0xff]  }
  0x48   :  { %2118 = vmatpush1.bf16.msra.mxu1 %v3657_v10  ;;  %2078 = vmatprep.subr.bf16.mxu0 %v3662_v11  ;;  %v3755_v10 = vld [vmem:[%s5198_s0 + $0x24c] ss:$240 sps:$4 sm:$0xff]   ;;  %v3750_v11 = vld [vmem:[%s5198_s0 + $0x240] ss:$240 sps:$4 sm:$0xff]  }
  0x49   :  { %2119 = vmatprep.subr.bf16.mxu1 %v3665_v12  ;;  %v3753_v12 = vld [vmem:[%s5198_s0 + $0x248] ss:$240 sps:$4 sm:$0xff]  }
  0x4b   :  { %2079 = vmatpush1.bf16.msra.mxu0 %v3660_v13  ;;  %v3758_v13 = vld [vmem:[%s5198_s0 + $0x64] ss:$240 sps:$4 sm:$0xff]  }
  0x4c   :  { %2120 = vmatpush1.bf16.msra.mxu1 %v3663_v14  ;;  %2080 = vmatprep.subr.bf16.mxu0 %v3668_v15  ;;  %v3761_v14 = vld [vmem:[%s5198_s0 + $0x6c] ss:$240 sps:$4 sm:$0xff]   ;;  %v3756_v15 = vld [vmem:[%s5198_s0 + $0x60] ss:$240 sps:$4 sm:$0xff]  }
  0x4d   :  { %2121 = vmatprep.subr.bf16.mxu1 %v3671_v16  ;;  %v3759_v16 = vld [vmem:[%s5198_s0 + $0x68] ss:$240 sps:$4 sm:$0xff]  }
  0x4f   :  { %2081 = vmatpush1.bf16.msra.mxu0 %v3666_v17  ;;  %v3764_v17 = vld [vmem:[%s5198_s0 + $0x7f4] ss:$240 sps:$4 sm:$0xff]  }
  0x50   :  { %2122 = vmatpush1.bf16.msra.mxu1 %v3669_v18  ;;  %2154 = vmatprep.subr.bf16.mxu0 %v3674_v19  ;;  %v3767_v18 = vld [vmem:[%s5198_s0 + $0x7fc] ss:$240 sps:$4 sm:$0xff]   ;;  %v3762_v19 = vld [vmem:[%s5198_s0 + $0x7f0] ss:$240 sps:$4 sm:$0xff]  }
  0x51   :  { %2195 = vmatprep.subr.bf16.mxu1 %v3677_v20  ;;  %v3765_v20 = vld [vmem:[%s5198_s0 + $0x7f8] ss:$240 sps:$4 sm:$0xff]  }
  0x52   :  { %3510 = vmatmul.mubr.msk.bf16.vlgmr.msra.gmra.mxu0 %vm1816_vm0, %v4096_v23 }
  0x53   :  { %3511 = vmatmul.mubr.msk.bf16.vlgmr.msra.gmra.mxu1 %vm1816_vm0, %v4096_v23  ;;  %2155 = vmatpush1.bf16.msra.mxu0 %v3672_v21  ;;  %v3770_v21 = vld [vmem:[%s5198_s0 + $0x614] ss:$240 sps:$4 sm:$0xff]  }
  0x54   :  { %2196 = vmatpush1.bf16.msra.mxu1 %v3675_v22  ;;  %2156 = vmatprep.subr.bf16.mxu0 %v3680_v24  ;;  %v3773_v22 = vld [vmem:[%s5198_s0 + $0x61c] ss:$240 sps:$4 sm:$0xff]   ;;  %v3768_v24 = vld [vmem:[%s5198_s0 + $0x610] ss:$240 sps:$4 sm:$0xff]  }
  0x55   :  { %2197 = vmatprep.subr.bf16.mxu1 %v3683_v25  ;;  %2180 = vmatprep.mubr.bf16.mxu0 %v4003_v1  ;;  %v3771_v25 = vld [vmem:[%s5198_s0 + $0x618] ss:$240 sps:$4 sm:$0xff]  }
  0x56   :  { %2221 = vmatprep.mubr.bf16.mxu1 %v4003_v1 }
  0x57   :  { %2157 = vmatpush1.bf16.msra.mxu0 %v3678_v26  ;;  %v3776_v26 = vld [vmem:[%s5198_s0 + $0x434] ss:$240 sps:$4 sm:$0xff]  }
  0x58   :  { %2198 = vmatpush1.bf16.msra.mxu1 %v3681_v27  ;;  %2158 = vmatprep.subr.bf16.mxu0 %v3686_v28  ;;  %v3774_v27 = vld [vmem:[%s5198_s0 + $0x430] ss:$240 sps:$4 sm:$0xff]   ;;  %v3777_v28 = vld [vmem:[%s5198_s0 + $0x438] ss:$240 sps:$4 sm:$0xff]  }
  0x59   :  { %2199 = vmatprep.subr.bf16.mxu1 %v3689_v29  ;;  %v3782_v29 = vld [vmem:[%s5198_s0 + $0x254] ss:$240 sps:$4 sm:$0xff]  }
  0x5b   :  { %2159 = vmatpush1.bf16.msra.mxu0 %v3684_v30  ;;  %v3785_v30 = vld [vmem:[%s5198_s0 + $0x25c] ss:$240 sps:$4 sm:$0xff]  }
  0x5c   :  { %2200 = vmatpush1.bf16.msra.mxu1 %v3687_v31  ;;  %2160 = vmatprep.subr.bf16.mxu0 %v3692_v32  ;;  %v3780_v31 = vld [vmem:[%s5198_s0 + $0x250] ss:$240 sps:$4 sm:$0xff]   ;;  %v3783_v32 = vld [vmem:[%s5198_s0 + $0x258] ss:$240 sps:$4 sm:$0xff]  }
  0x5d   :  { %2201 = vmatprep.subr.bf16.mxu1 %v3695_v33  ;;  %v3788_v33 = vld [vmem:[%s5198_s0 + $0x74] ss:$240 sps:$4 sm:$0xff]  }
  0x5f   :  { %2161 = vmatpush1.bf16.msra.mxu0 %v3690_v34  ;;  %v3791_v34 = vld [vmem:[%s5198_s0 + $0x7c] ss:$240 sps:$4 sm:$0xff]  }
  0x60   :  { %2202 = vmatpush1.bf16.msra.mxu1 %v3693_v35  ;;  %2162 = vmatprep.subr.bf16.mxu0 %v3698_v36  ;;  %v3786_v35 = vld [vmem:[%s5198_s0 + $0x70] ss:$240 sps:$4 sm:$0xff]   ;;  %v3789_v36 = vld [vmem:[%s5198_s0 + $0x78] ss:$240 sps:$4 sm:$0xff]  }
  0x61   :  { %2203 = vmatprep.subr.bf16.mxu1 %v3701_v37  ;;  %v3794_v37 = vld [vmem:[%s5198_s0 + $0x804] ss:$240 sps:$4 sm:$0xff]  }
  0x63   :  { %2163 = vmatpush1.bf16.msra.mxu0 %v3696_v38  ;;  %v3797_v38 = vld [vmem:[%s5198_s0 + $0x80c] ss:$240 sps:$4 sm:$0xff]  }
  0x64   :  { %2204 = vmatpush1.bf16.msra.mxu1 %v3699_v39  ;;  %2236 = vmatprep.subr.bf16.mxu0 %v3704_v40  ;;  %v3792_v39 = vld [vmem:[%s5198_s0 + $0x800] ss:$240 sps:$4 sm:$0xff]   ;;  %v3795_v40 = vld [vmem:[%s5198_s0 + $0x808] ss:$240 sps:$4 sm:$0xff]  }
  0x65   :  { %2277 = vmatprep.subr.bf16.mxu1 %v3707_v41  ;;  %v3800_v41 = vld [vmem:[%s5198_s0 + $0x624] ss:$240 sps:$4 sm:$0xff]  }
  0x66   :  { %3512 = vmatmul.mubr.msk.bf16.vlgmr.msra.gmra.mxu0 %vm1816_vm0, %v4096_v23 }
  0x67   :  { %3513 = vmatmul.mubr.msk.bf16.vlgmr.msra.gmra.mxu1 %vm1816_vm0, %v4096_v23  ;;  %2237 = vmatpush1.bf16.msra.mxu0 %v3702_v42  ;;  %v3803_v42 = vld [vmem:[%s5198_s0 + $0x62c] ss:$240 sps:$4 sm:$0xff]  }
  0x68   :  { %2278 = vmatpush1.bf16.msra.mxu1 %v3705_v43  ;;  %2238 = vmatprep.subr.bf16.mxu0 %v3710_v44  ;;  %v4575_v43 = vld [vmem:[%s5199_s1] sm:$0xf] }
  0x69   :  { %2279 = vmatprep.subr.bf16.mxu1 %v3713_v45  ;;  %2262 = vmatprep.mubr.bf16.mxu0 %v4003_v1  ;;  %v3798_v44 = vld [vmem:[%s5198_s0 + $0x620] ss:$240 sps:$4 sm:$0xff]   ;;  %v3801_v45 = vld [vmem:[%s5198_s0 + $0x628] ss:$240 sps:$4 sm:$0xff]  }
  0x6a   :  { %2303 = vmatprep.mubr.bf16.mxu1 %v4003_v1 }
  0x6b   :  { %2239 = vmatpush1.bf16.msra.mxu0 %v3708_v46  ;;  %v3806_v46 = vld [vmem:[%s5198_s0 + $0x444] ss:$240 sps:$4 sm:$0xff]  }
  0x6c   :  { %2280 = vmatpush1.bf16.msra.mxu1 %v3711_v47  ;;  %2240 = vmatprep.subr.bf16.mxu0 %v3716_v48  ;;  %v3809_v47 = vld [vmem:[%s5198_s0 + $0x44c] ss:$240 sps:$4 sm:$0xff]   ;;  %v3804_v48 = vld [vmem:[%s5198_s0 + $0x440] ss:$240 sps:$4 sm:$0xff]  }
  0x6d   :  { %2281 = vmatprep.subr.bf16.mxu1 %v3719_v49  ;;  %v3807_v49 = vld [vmem:[%s5198_s0 + $0x448] ss:$240 sps:$4 sm:$0xff]  }
  0x6f   :  { %2241 = vmatpush1.bf16.msra.mxu0 %v3714_v50  ;;  %v3812_v50 = vld [vmem:[%s5198_s0 + $0x264] ss:$240 sps:$4 sm:$0xff]  }
  0x70   :  { %2282 = vmatpush1.bf16.msra.mxu1 %v3717_v51  ;;  %2242 = vmatprep.subr.bf16.mxu0 %v3722_v52  ;;  %v3815_v51 = vld [vmem:[%s5198_s0 + $0x26c] ss:$240 sps:$4 sm:$0xff]   ;;  %v3810_v52 = vld [vmem:[%s5198_s0 + $0x260] ss:$240 sps:$4 sm:$0xff]  }
  0x71   :  { %2283 = vmatprep.subr.bf16.mxu1 %v3725_v53  ;;  %v3813_v53 = vld [vmem:[%s5198_s0 + $0x268] ss:$240 sps:$4 sm:$0xff]  }
  0x73   :  { %2243 = vmatpush1.bf16.msra.mxu0 %v3720_v54  ;;  %v3818_v54 = vld [vmem:[%s5198_s0 + $0x84] ss:$240 sps:$4 sm:$0xff]  }
  0x74   :  { %2284 = vmatpush1.bf16.msra.mxu1 %v3723_v55  ;;  %2244 = vmatprep.subr.bf16.mxu0 %v3728_v56  ;;  %v3821_v55 = vld [vmem:[%s5198_s0 + $0x8c] ss:$240 sps:$4 sm:$0xff]   ;;  %v3816_v56 = vld [vmem:[%s5198_s0 + $0x80] ss:$240 sps:$4 sm:$0xff]  }
  0x75   :  { %2285 = vmatprep.subr.bf16.mxu1 %v3731_v57  ;;  %v3819_v57 = vld [vmem:[%s5198_s0 + $0x88] ss:$240 sps:$4 sm:$0xff]  }
  0x77   :  { %2245 = vmatpush1.bf16.msra.mxu0 %v3726_v58  ;;  %v3824_v58 = vld [vmem:[%s5198_s0 + $0x814] ss:$240 sps:$4 sm:$0xff]  }
  0x78   :  { %2286 = vmatpush1.bf16.msra.mxu1 %v3729_v59  ;;  %2318 = vmatprep.subr.bf16.mxu0 %v3734_v60  ;;  %v3827_v59 = vld [vmem:[%s5198_s0 + $0x81c] ss:$240 sps:$4 sm:$0xff]   ;;  %v3822_v60 = vld [vmem:[%s5198_s0 + $0x810] ss:$240 sps:$4 sm:$0xff]  }
  0x79   :  { %2359 = vmatprep.subr.bf16.mxu1 %v3737_v61  ;;  %v3825_v61 = vld [vmem:[%s5198_s0 + $0x818] ss:$240 sps:$4 sm:$0xff]  }
  0x7a   :  { %3514 = vmatmul.mubr.msk.bf16.vlgmr.msra.gmra.mxu0 %vm1816_vm0, %v4096_v23 }
  0x7b   :  { %3515 = vmatmul.mubr.msk.bf16.vlgmr.msra.gmra.mxu1 %vm1816_vm0, %v4096_v23  ;;  %2319 = vmatpush1.bf16.msra.mxu0 %v3732_v62  ;;  %v3830_v62 = vld [vmem:[%s5198_s0 + $0x634] ss:$240 sps:$4 sm:$0xff]  }
  0x7c   :  { %2360 = vmatpush1.bf16.msra.mxu1 %v3735_v63  ;;  %2320 = vmatprep.subr.bf16.mxu0 %v3740_v0  ;;  %v3833_v63 = vld [vmem:[%s5198_s0 + $0x63c] ss:$240 sps:$4 sm:$0xff]   ;;  %v3828_v0 = vld [vmem:[%s5198_s0 + $0x630] ss:$240 sps:$4 sm:$0xff]  }
  0x7d   :  { %2361 = vmatprep.subr.bf16.mxu1 %v3743_v2  ;;  %2344 = vmatprep.mubr.bf16.mxu0 %v4003_v1  ;;  %v3831_v2 = vld [vmem:[%s5198_s0 + $0x638] ss:$240 sps:$4 sm:$0xff]  }
  0x7e   :  { %2385 = vmatprep.mubr.bf16.mxu1 %v4003_v1 }
  0x7f   :  { %2321 = vmatpush1.bf16.msra.mxu0 %v3738_v3  ;;  %v3836_v3 = vld [vmem:[%s5198_s0 + $0x454] ss:$240 sps:$4 sm:$0xff]  }
  0x80   :  { %2362 = vmatpush1.bf16.msra.mxu1 %v3741_v4  ;;  %2322 = vmatprep.subr.bf16.mxu0 %v3746_v5  ;;  %v3839_v4 = vld [vmem:[%s5198_s0 + $0x45c] ss:$240 sps:$4 sm:$0xff]   ;;  %v3834_v5 = vld [vmem:[%s5198_s0 + $0x450] ss:$240 sps:$4 sm:$0xff]  }
  0x81   :  { %2363 = vmatprep.subr.bf16.mxu1 %v3749_v6  ;;  %v3837_v6 = vld [vmem:[%s5198_s0 + $0x458] ss:$240 sps:$4 sm:$0xff]  }
  0x83   :  { %2323 = vmatpush1.bf16.msra.mxu0 %v3744_v7  ;;  %v3842_v7 = vld [vmem:[%s5198_s0 + $0x274] ss:$240 sps:$4 sm:$0xff]  }
  0x84   :  { %2364 = vmatpush1.bf16.msra.mxu1 %v3747_v8  ;;  %2324 = vmatprep.subr.bf16.mxu0 %v3752_v9  ;;  %v3845_v8 = vld [vmem:[%s5198_s0 + $0x27c] ss:$240 sps:$4 sm:$0xff]   ;;  %v3840_v9 = vld [vmem:[%s5198_s0 + $0x270] ss:$240 sps:$4 sm:$0xff]  }
  0x85   :  { %2365 = vmatprep.subr.bf16.mxu1 %v3755_v10  ;;  %v3843_v10 = vld [vmem:[%s5198_s0 + $0x278] ss:$240 sps:$4 sm:$0xff]  }
  0x87   :  { %2325 = vmatpush1.bf16.msra.mxu0 %v3750_v11  ;;  %v3848_v11 = vld [vmem:[%s5198_s0 + $0x94] ss:$240 sps:$4 sm:$0xff]  }
  0x88   :  { %2366 = vmatpush1.bf16.msra.mxu1 %v3753_v12  ;;  %2326 = vmatprep.subr.bf16.mxu0 %v3758_v13  ;;  %v3851_v12 = vld [vmem:[%s5198_s0 + $0x9c] ss:$240 sps:$4 sm:$0xff]   ;;  %v3846_v13 = vld [vmem:[%s5198_s0 + $0x90] ss:$240 sps:$4 sm:$0xff]  }
  0x89   :  { %2367 = vmatprep.subr.bf16.mxu1 %v3761_v14  ;;  %v3849_v14 = vld [vmem:[%s5198_s0 + $0x98] ss:$240 sps:$4 sm:$0xff]  }
  0x8b   :  { %2327 = vmatpush1.bf16.msra.mxu0 %v3756_v15  ;;  %v3854_v15 = vld [vmem:[%s5198_s0 + $0x824] ss:$240 sps:$4 sm:$0xff]  }
  0x8c   :  { %2368 = vmatpush1.bf16.msra.mxu1 %v3759_v16  ;;  %2400 = vmatprep.subr.bf16.mxu0 %v3764_v17  ;;  %v3857_v16 = vld [vmem:[%s5198_s0 + $0x82c] ss:$240 sps:$4 sm:$0xff]   ;;  %v3852_v17 = vld [vmem:[%s5198_s0 + $0x820] ss:$240 sps:$4 sm:$0xff]  }
  0x8d   :  { %2441 = vmatprep.subr.bf16.mxu1 %v3767_v18  ;;  %v3855_v18 = vld [vmem:[%s5198_s0 + $0x828] ss:$240 sps:$4 sm:$0xff]  }
  0x8e   :  { %3516 = vmatmul.mubr.msk.bf16.vlgmr.msra.gmra.mxu0 %vm1816_vm0, %v4096_v23 }
  0x8f   :  { %3517 = vmatmul.mubr.msk.bf16.vlgmr.msra.gmra.mxu1 %vm1816_vm0, %v4096_v23  ;;  %2401 = vmatpush1.bf16.msra.mxu0 %v3762_v19  ;;  %v3779_v23 = vld [vmem:[%s5198_s0 + $0x43c] ss:$240 sps:$4 sm:$0xff]   ;;  %v3095_v19 = vld [vmem:[%s5200_s2] sm:$0xff] }
  0x90   :  { %2442 = vmatpush1.bf16.msra.mxu1 %v3765_v20  ;;  %2402 = vmatprep.subr.bf16.mxu0 %v3770_v21  ;;  %v3860_v20 = vld [vmem:[%s5198_s0 + $0x644] ss:$240 sps:$4 sm:$0xff]   ;;  %v3863_v21 = vld [vmem:[%s5198_s0 + $0x64c] ss:$240 sps:$4 sm:$0xff]  }
  0x91   :  { %2443 = vmatprep.subr.bf16.mxu1 %v3773_v22  ;;  %2426 = vmatprep.mubr.bf16.mxu0 %v4003_v1  ;;  %v3858_v22 = vld [vmem:[%s5198_s0 + $0x640] ss:$240 sps:$4 sm:$0xff]  }
  0x92   :  { %2467 = vmatprep.mubr.bf16.mxu1 %v4003_v1  ;;  %3098 = vperm.xlu0 %3551, %v3095_v19   ;;  %v3929_v19 = vld [vmem:[%s5198_s0 + $0x48c] ss:$240 sps:$4 sm:$0xff]  }
  0x93   :  { %2403 = vmatpush1.bf16.msra.mxu0 %v3768_v24  ;;  %v3861_v24 = vld [vmem:[%s5198_s0 + $0x648] ss:$240 sps:$4 sm:$0xff]  }
  0x94   :  { %2444 = vmatpush1.bf16.msra.mxu1 %v3771_v25  ;;  %2404 = vmatprep.subr.bf16.mxu0 %v3776_v26  ;;  %v3866_v25 = vld [vmem:[%s5198_s0 + $0x464] ss:$240 sps:$4 sm:$0xff]   ;;  %v3869_v26 = vld [vmem:[%s5198_s0 + $0x46c] ss:$240 sps:$4 sm:$0xff]  }
  0x95   :  { %2445 = vmatprep.subr.bf16.mxu1 %v3779_v23  ;;  %v3864_v23 = vld [vmem:[%s5198_s0 + $0x460] ss:$240 sps:$4 sm:$0xff]  }
  0x97   :  { %2405 = vmatpush1.bf16.msra.mxu0 %v3774_v27  ;;  %v3867_v27 = vld [vmem:[%s5198_s0 + $0x468] ss:$240 sps:$4 sm:$0xff]  }
  0x98   :  { %2446 = vmatpush1.bf16.msra.mxu1 %v3777_v28  ;;  %2406 = vmatprep.subr.bf16.mxu0 %v3782_v29  ;;  %v3872_v28 = vld [vmem:[%s5198_s0 + $0x284] ss:$240 sps:$4 sm:$0xff]   ;;  %v3875_v29 = vld [vmem:[%s5198_s0 + $0x28c] ss:$240 sps:$4 sm:$0xff]  }
  0x99   :  { %2447 = vmatprep.subr.bf16.mxu1 %v3785_v30  ;;  %v3870_v30 = vld [vmem:[%s5198_s0 + $0x280] ss:$240 sps:$4 sm:$0xff]  }
  0x9b   :  { %2407 = vmatpush1.bf16.msra.mxu0 %v3780_v31  ;;  %v3873_v31 = vld [vmem:[%s5198_s0 + $0x288] ss:$240 sps:$4 sm:$0xff]  }
  0x9c   :  { %2448 = vmatpush1.bf16.msra.mxu1 %v3783_v32  ;;  %2408 = vmatprep.subr.bf16.mxu0 %v3788_v33  ;;  %v3878_v32 = vld [vmem:[%s5198_s0 + $0xa4] ss:$240 sps:$4 sm:$0xff]   ;;  %v3881_v33 = vld [vmem:[%s5198_s0 + $0xac] ss:$240 sps:$4 sm:$0xff]  }
  0x9d   :  { %2449 = vmatprep.subr.bf16.mxu1 %v3791_v34 }
  0x9f   :  { %2409 = vmatpush1.bf16.msra.mxu0 %v3786_v35 }
  0xa0   :  { %2450 = vmatpush1.bf16.msra.mxu1 %v3789_v36  ;;  %2482 = vmatprep.subr.bf16.mxu0 %v3794_v37  ;;  %v3876_v36 = vld [vmem:[%s5198_s0 + $0xa0] ss:$240 sps:$4 sm:$0xff]   ;;  %v3879_v37 = vld [vmem:[%s5198_s0 + $0xa8] ss:$240 sps:$4 sm:$0xff]  }
  0xa1   :  { %2523 = vmatprep.subr.bf16.mxu1 %v3797_v38 }
  0xa2   :  { %3518 = vmatmul.mubr.msk.bf16.vlgmr.msra.gmra.mxu0 %vm1816_vm0, %v4575_v43 }
  0xa3   :  { %3519 = vmatmul.mubr.msk.bf16.vlgmr.msra.gmra.mxu1 %vm1816_vm0, %v4575_v43  ;;  %2483 = vmatpush1.bf16.msra.mxu0 %v3792_v39 }
  0xa4   :  { %2524 = vmatpush1.bf16.msra.mxu1 %v3795_v40  ;;  %2484 = vmatprep.subr.bf16.mxu0 %v3800_v41  ;;  %v3884_v40 = vld [vmem:[%s5198_s0 + $0x834] ss:$240 sps:$4 sm:$0xff]   ;;  %v3887_v41 = vld [vmem:[%s5198_s0 + $0x83c] ss:$240 sps:$4 sm:$0xff]  }
  0xa5   :  { %2525 = vmatprep.subr.bf16.mxu1 %v3803_v42  ;;  %2508 = vmatprep.mubr.bf16.mxu0 %v4003_v1 }
  0xa6   :  { %2549 = vmatprep.mubr.bf16.mxu1 %v4003_v1 }
  0xa7   :  { %2485 = vmatpush1.bf16.msra.mxu0 %v3798_v44 }
  0xa8   :  { %2526 = vmatpush1.bf16.msra.mxu1 %v3801_v45  ;;  %2486 = vmatprep.subr.bf16.mxu0 %v3806_v46  ;;  %v3882_v45 = vld [vmem:[%s5198_s0 + $0x830] ss:$240 sps:$4 sm:$0xff]   ;;  %v3885_v46 = vld [vmem:[%s5198_s0 + $0x838] ss:$240 sps:$4 sm:$0xff]  }
  0xa9   :  { %2527 = vmatprep.subr.bf16.mxu1 %v3809_v47 }
  0xab   :  { %2487 = vmatpush1.bf16.msra.mxu0 %v3804_v48 }
  0xac   :  { %2528 = vmatpush1.bf16.msra.mxu1 %v3807_v49  ;;  %2488 = vmatprep.subr.bf16.mxu0 %v3812_v50  ;;  %v3890_v49 = vld [vmem:[%s5198_s0 + $0x654] ss:$240 sps:$4 sm:$0xff]   ;;  %v3893_v50 = vld [vmem:[%s5198_s0 + $0x65c] ss:$240 sps:$4 sm:$0xff]  }
  0xad   :  { %2529 = vmatprep.subr.bf16.mxu1 %v3815_v51  ;;  %v3888_v51 = vld [vmem:[%s5198_s0 + $0x650] ss:$240 sps:$4 sm:$0xff]  }
  0xaf   :  { %2489 = vmatpush1.bf16.msra.mxu0 %v3810_v52  ;;  %v3891_v52 = vld [vmem:[%s5198_s0 + $0x658] ss:$240 sps:$4 sm:$0xff]  }
  0xb0   :  { %2530 = vmatpush1.bf16.msra.mxu1 %v3813_v53  ;;  %2490 = vmatprep.subr.bf16.mxu0 %v3818_v54  ;;  %v3896_v53 = vld [vmem:[%s5198_s0 + $0x474] ss:$240 sps:$4 sm:$0xff]   ;;  %v3899_v54 = vld [vmem:[%s5198_s0 + $0x47c] ss:$240 sps:$4 sm:$0xff]  }
  0xb1   :  { %2531 = vmatprep.subr.bf16.mxu1 %v3821_v55  ;;  %v3894_v55 = vld [vmem:[%s5198_s0 + $0x470] ss:$240 sps:$4 sm:$0xff]  }
  0xb3   :  { %2491 = vmatpush1.bf16.msra.mxu0 %v3816_v56  ;;  %v3897_v56 = vld [vmem:[%s5198_s0 + $0x478] ss:$240 sps:$4 sm:$0xff]  }
  0xb4   :  { %2532 = vmatpush1.bf16.msra.mxu1 %v3819_v57  ;;  %2564 = vmatprep.subr.bf16.mxu0 %v3824_v58  ;;  %v3902_v57 = vld [vmem:[%s5198_s0 + $0x294] ss:$240 sps:$4 sm:$0xff]   ;;  %v3905_v58 = vld [vmem:[%s5198_s0 + $0x29c] ss:$240 sps:$4 sm:$0xff]  }
  0xb5   :  { %2605 = vmatprep.subr.bf16.mxu1 %v3827_v59  ;;  %v3900_v59 = vld [vmem:[%s5198_s0 + $0x290] ss:$240 sps:$4 sm:$0xff]  }
  0xb6   :  { %3520 = vmatmul.mubr.msk.bf16.vlgmr.msra.gmra.mxu0 %vm1816_vm0, %v4575_v43 }
  0xb7   :  { %3521 = vmatmul.mubr.msk.bf16.vlgmr.msra.gmra.mxu1 %vm1816_vm0, %v4575_v43  ;;  %2565 = vmatpush1.bf16.msra.mxu0 %v3822_v60  ;;  %v3903_v60 = vld [vmem:[%s5198_s0 + $0x298] ss:$240 sps:$4 sm:$0xff]  }
  0xb8   :  { %2606 = vmatpush1.bf16.msra.mxu1 %v3825_v61  ;;  %2566 = vmatprep.subr.bf16.mxu0 %v3830_v62  ;;  %v3908_v61 = vld [vmem:[%s5198_s0 + $0xb4] ss:$240 sps:$4 sm:$0xff]   ;;  %v3911_v62 = vld [vmem:[%s5198_s0 + $0xbc] ss:$240 sps:$4 sm:$0xff]  }
  0xb9   :  { %2607 = vmatprep.subr.bf16.mxu1 %v3833_v63  ;;  %2590 = vmatprep.mubr.bf16.mxu0 %v4003_v1 }
  0xba   :  { %2631 = vmatprep.mubr.bf16.mxu1 %v4003_v1 }
  0xbb   :  { %2567 = vmatpush1.bf16.msra.mxu0 %v3828_v0 }
  0xbc   :  { %2608 = vmatpush1.bf16.msra.mxu1 %v3831_v2  ;;  %2568 = vmatprep.subr.bf16.mxu0 %v3836_v3  ;;  %v3906_v2 = vld [vmem:[%s5198_s0 + $0xb0] ss:$240 sps:$4 sm:$0xff]   ;;  %v3909_v3 = vld [vmem:[%s5198_s0 + $0xb8] ss:$240 sps:$4 sm:$0xff]  }
  0xbd   :  { %2609 = vmatprep.subr.bf16.mxu1 %v3839_v4 }
  0xbf   :  { %2569 = vmatpush1.bf16.msra.mxu0 %v3834_v5 }
  0xc0   :  { %2610 = vmatpush1.bf16.msra.mxu1 %v3837_v6  ;;  %2570 = vmatprep.subr.bf16.mxu0 %v3842_v7  ;;  %v3914_v6 = vld [vmem:[%s5198_s0 + $0x844] ss:$240 sps:$4 sm:$0xff]   ;;  %v3917_v7 = vld [vmem:[%s5198_s0 + $0x84c] ss:$240 sps:$4 sm:$0xff]  }
  0xc1   :  { %2611 = vmatprep.subr.bf16.mxu1 %v3845_v8 }
  0xc3   :  { %2571 = vmatpush1.bf16.msra.mxu0 %v3840_v9 }
  0xc4   :  { %2612 = vmatpush1.bf16.msra.mxu1 %v3843_v10  ;;  %2572 = vmatprep.subr.bf16.mxu0 %v3848_v11  ;;  %v3912_v10 = vld [vmem:[%s5198_s0 + $0x840] ss:$240 sps:$4 sm:$0xff]   ;;  %v3915_v11 = vld [vmem:[%s5198_s0 + $0x848] ss:$240 sps:$4 sm:$0xff]  }
  0xc5   :  { %2613 = vmatprep.subr.bf16.mxu1 %v3851_v12 }
  0xc7   :  { %2573 = vmatpush1.bf16.msra.mxu0 %v3846_v13 }
  0xc8   :  { %2614 = vmatpush1.bf16.msra.mxu1 %v3849_v14  ;;  %2646 = vmatprep.subr.bf16.mxu0 %v3854_v15  ;;  %v3920_v14 = vld [vmem:[%s5198_s0 + $0x664] ss:$240 sps:$4 sm:$0xff]   ;;  %v3923_v15 = vld [vmem:[%s5198_s0 + $0x66c] ss:$240 sps:$4 sm:$0xff]  }
  0xc9   :  { %2687 = vmatprep.subr.bf16.mxu1 %v3857_v16  ;;  %v3918_v16 = vld [vmem:[%s5198_s0 + $0x660] ss:$240 sps:$4 sm:$0xff]  }
  0xca   :  { %3522 = vmatmul.mubr.msk.bf16.vlgmr.msra.gmra.mxu0 %vm1816_vm0, %v4575_v43 }
  0xcb   :  { %3523 = vmatmul.mubr.msk.bf16.vlgmr.msra.gmra.mxu1 %vm1816_vm0, %v4575_v43  ;;  %2647 = vmatpush1.bf16.msra.mxu0 %v3852_v17  ;;  %v3921_v17 = vld [vmem:[%s5198_s0 + $0x668] ss:$240 sps:$4 sm:$0xff]  }
  0xcc   :  { %2688 = vmatpush1.bf16.msra.mxu1 %v3855_v18  ;;  %2648 = vmatprep.subr.bf16.mxu0 %v3860_v20  ;;  %v3926_v18 = vld [vmem:[%s5198_s0 + $0x484] ss:$240 sps:$4 sm:$0xff]   ;;  %v3924_v20 = vld [vmem:[%s5198_s0 + $0x480] ss:$240 sps:$4 sm:$0xff]  }
  0xcd   :  { %2689 = vmatprep.subr.bf16.mxu1 %v3863_v21  ;;  %2672 = vmatprep.mubr.bf16.mxu0 %v4003_v1  ;;  %v3927_v21 = vld [vmem:[%s5198_s0 + $0x488] ss:$240 sps:$4 sm:$0xff]  }
  0xce   :  { %2713 = vmatprep.mubr.bf16.mxu1 %v4003_v1 }
  0xcf   :  { %2649 = vmatpush1.bf16.msra.mxu0 %v3858_v22  ;;  %v3932_v22 = vld [vmem:[%s5198_s0 + $0x2a4] ss:$240 sps:$4 sm:$0xff]  }
  0xd0   :  { %2690 = vmatpush1.bf16.msra.mxu1 %v3861_v24  ;;  %2650 = vmatprep.subr.bf16.mxu0 %v3866_v25  ;;  %v3935_v24 = vld [vmem:[%s5198_s0 + $0x2ac] ss:$240 sps:$4 sm:$0xff]   ;;  %v3930_v25 = vld [vmem:[%s5198_s0 + $0x2a0] ss:$240 sps:$4 sm:$0xff]  }
  0xd1   :  { %2691 = vmatprep.subr.bf16.mxu1 %v3869_v26  ;;  %v3933_v26 = vld [vmem:[%s5198_s0 + $0x2a8] ss:$240 sps:$4 sm:$0xff]  }
  0xd3   :  { %2651 = vmatpush1.bf16.msra.mxu0 %v3864_v23  ;;  %v3938_v23 = vld [vmem:[%s5198_s0 + $0xc4] ss:$240 sps:$4 sm:$0xff]  }
  0xd4   :  { %2692 = vmatpush1.bf16.msra.mxu1 %v3867_v27  ;;  %2652 = vmatprep.subr.bf16.mxu0 %v3872_v28  ;;  %v3941_v27 = vld [vmem:[%s5198_s0 + $0xcc] ss:$240 sps:$4 sm:$0xff]  }
  0xd5   :  { %2693 = vmatprep.subr.bf16.mxu1 %v3875_v29 }
  0xd6   :  { %v4754_v34 = vpop.f32.mrf.mxu0 }
  0xd7   :  { %v4756_v35 = vpop.f32.mrf.mxu1  ;;  %2653 = vmatpush1.bf16.msra.mxu0 %v3870_v30  ;;  %v3936_v30 = vld [vmem:[%s5198_s0 + $0xc0] ss:$240 sps:$4 sm:$0xff]  }
  0xd8   :  { %2694 = vmatpush1.bf16.msra.mxu1 %v3873_v31  ;;  %v4764_v38 = vpop.f32.mrf.mxu0  ;;  %2654 = vmatprep.subr.bf16.mxu0 %v3878_v32  ;;  %v3939_v31 = vld [vmem:[%s5198_s0 + $0xc8] ss:$240 sps:$4 sm:$0xff]  }
  0xd9   :  { %v4766_v39 = vpop.f32.mrf.mxu1  ;;  %2695 = vmatprep.subr.bf16.mxu1 %v3881_v33 }
  0xda   :  { %v1858_v42 = vpop.f32.mrf.mxu0 }
  0xdb   :  { %v1899_v44 = vpop.f32.mrf.mxu1  ;;  %2655 = vmatpush1.bf16.msra.mxu0 %v3876_v36  ;;  %v3944_v36 = vld [vmem:[%s5198_s0 + $0x854] ss:$240 sps:$4 sm:$0xff]   ;;  %v3942_v42 = vld [vmem:[%s5198_s0 + $0x850] ss:$240 sps:$4 sm:$0xff]  }
  0xdc   :  { %2696 = vmatpush1.bf16.msra.mxu1 %v3879_v37  ;;  %v1859_v47 = vpop.f32.mrf.mxu0  ;;  %2728 = vmatprep.subr.bf16.mxu0 %v3884_v40  ;;  %v3947_v37 = vld [vmem:[%s5198_s0 + $0x85c] ss:$240 sps:$4 sm:$0xff]   ;;  %v3945_v44 = vld [vmem:[%s5198_s0 + $0x858] ss:$240 sps:$4 sm:$0xff]  }
  0xdd   :  { %v1900_v48 = vpop.f32.mrf.mxu1  ;;  %2769 = vmatprep.subr.bf16.mxu1 %v3887_v41  ;;  %v3950_v47 = vld [vmem:[%s5198_s0 + $0x674] ss:$240 sps:$4 sm:$0xff]  }
  0xde   :  { %3524 = vmatmul.mubr.msk.bf16.vlgmr.msra.gmra.mxu0 %vm1816_vm0, %v4575_v43  ;;  %v3953_v48 = vld [vmem:[%s5198_s0 + $0x67c] ss:$240 sps:$4 sm:$0xff]  }
  0xdf   :  { %3525 = vmatmul.mubr.msk.bf16.vlgmr.msra.gmra.mxu1 %vm1816_vm0, %v4575_v43  ;;  %2729 = vmatpush1.bf16.msra.mxu0 %v3882_v45 }
  0xe0   :  { %2770 = vmatpush1.bf16.msra.mxu1 %v3885_v46  ;;  %2730 = vmatprep.subr.bf16.mxu0 %v3890_v49  ;;  %v3948_v49 = vld [vmem:[%s5198_s0 + $0x670] ss:$240 sps:$4 sm:$0xff]  }
  0xe1   :  { %2771 = vmatprep.subr.bf16.mxu1 %v3893_v50  ;;  %2754 = vmatprep.mubr.bf16.mxu0 %v4003_v1  ;;  %v3951_v50 = vld [vmem:[%s5198_s0 + $0x678] ss:$240 sps:$4 sm:$0xff]  }
  0xe2   :  { %2795 = vmatprep.mubr.bf16.mxu1 %v4003_v1 }
  0xe3   :  { %2731 = vmatpush1.bf16.msra.mxu0 %v3888_v51  ;;  %v3956_v51 = vld [vmem:[%s5198_s0 + $0x494] ss:$240 sps:$4 sm:$0xff]  }
  0xe4   :  { %2772 = vmatpush1.bf16.msra.mxu1 %v3891_v52  ;;  %2732 = vmatprep.subr.bf16.mxu0 %v3896_v53  ;;  %v3959_v52 = vld [vmem:[%s5198_s0 + $0x49c] ss:$240 sps:$4 sm:$0xff]   ;;  %v3954_v53 = vld [vmem:[%s5198_s0 + $0x490] ss:$240 sps:$4 sm:$0xff]  }
  0xe5   :  { %2773 = vmatprep.subr.bf16.mxu1 %v3899_v54  ;;  %v3957_v54 = vld [vmem:[%s5198_s0 + $0x498] ss:$240 sps:$4 sm:$0xff]  }
  0xe7   :  { %2733 = vmatpush1.bf16.msra.mxu0 %v3894_v55  ;;  %v3962_v55 = vld [vmem:[%s5198_s0 + $0x2b4] ss:$240 sps:$4 sm:$0xff]  }
  0xe8   :  { %2774 = vmatpush1.bf16.msra.mxu1 %v3897_v56  ;;  %2734 = vmatprep.subr.bf16.mxu0 %v3902_v57  ;;  %v3965_v56 = vld [vmem:[%s5198_s0 + $0x2bc] ss:$240 sps:$4 sm:$0xff]   ;;  %v3960_v57 = vld [vmem:[%s5198_s0 + $0x2b0] ss:$240 sps:$4 sm:$0xff]  }
  0xe9   :  { %2775 = vmatprep.subr.bf16.mxu1 %v3905_v58  ;;  %v3963_v58 = vld [vmem:[%s5198_s0 + $0x2b8] ss:$240 sps:$4 sm:$0xff]  }
  0xea   :  { %v4828_v63 = vpop.f32.mrf.mxu0 }
  0xeb   :  { %v4830_v0 = vpop.f32.mrf.mxu1  ;;  %2735 = vmatpush1.bf16.msra.mxu0 %v3900_v59  ;;  %v3968_v59 = vld [vmem:[%s5198_s0 + $0xd4] ss:$240 sps:$4 sm:$0xff]  }
  0xec   :  { %2776 = vmatpush1.bf16.msra.mxu1 %v3903_v60  ;;  %v4838_v4 = vpop.f32.mrf.mxu0  ;;  %2736 = vmatprep.subr.bf16.mxu0 %v3908_v61  ;;  %v3971_v60 = vld [vmem:[%s5198_s0 + $0xdc] ss:$240 sps:$4 sm:$0xff]  }
  0xed   :  { %v4840_v5 = vpop.f32.mrf.mxu1  ;;  %2777 = vmatprep.subr.bf16.mxu1 %v3911_v62 }
  0xee   :  { %v1940_v8 = vpop.f32.mrf.mxu0 }
  0xef   :  { %v1981_v9 = vpop.f32.mrf.mxu1  ;;  %2737 = vmatpush1.bf16.msra.mxu0 %v3906_v2  ;;  %v3966_v2 = vld [vmem:[%s5198_s0 + $0xd0] ss:$240 sps:$4 sm:$0xff]   ;;  %v3974_v8 = vld [vmem:[%s5198_s0 + $0x864] ss:$240 sps:$4 sm:$0xff]  }
  0xf0   :  { %2778 = vmatpush1.bf16.msra.mxu1 %v3909_v3  ;;  %v1941_v12 = vpop.f32.mrf.mxu0  ;;  %2810 = vmatprep.subr.bf16.mxu0 %v3914_v6  ;;  %v3969_v3 = vld [vmem:[%s5198_s0 + $0xd8] ss:$240 sps:$4 sm:$0xff]   ;;  %v3977_v9 = vld [vmem:[%s5198_s0 + $0x86c] ss:$240 sps:$4 sm:$0xff]  }
  0xf1   :  { %v1982_v13 = vpop.f32.mrf.mxu1  ;;  %2851 = vmatprep.subr.bf16.mxu1 %v3917_v7 }
  0xf2   :  { %3526 = vmatmul.mubr.msk.bf16.vlgmr.msra.gmra.mxu0 %vm1816_vm0, %v4575_v43  ;;  %v3972_v13 = vld [vmem:[%s5198_s0 + $0x860] ss:$240 sps:$4 sm:$0xff]  }
  0xf3   :  { %3527 = vmatmul.mubr.msk.bf16.vlgmr.msra.gmra.mxu1 %vm1816_vm0, %v4575_v43  ;;  %2811 = vmatpush1.bf16.msra.mxu0 %v3912_v10 }
  0xf4   :  { %2852 = vmatpush1.bf16.msra.mxu1 %v3915_v11  ;;  %2812 = vmatprep.subr.bf16.mxu0 %v3920_v14  ;;  %v3975_v14 = vld [vmem:[%s5198_s0 + $0x868] ss:$240 sps:$4 sm:$0xff]  }
  0xf5   :  { %2853 = vmatprep.subr.bf16.mxu1 %v3923_v15  ;;  %2836 = vmatprep.mubr.bf16.mxu0 %v4003_v1 }
  0xf6   :  { %2877 = vmatprep.mubr.bf16.mxu1 %v4003_v1 }
  0xf7   :  { %2813 = vmatpush1.bf16.msra.mxu0 %v3918_v16 }
  0xf8   :  { %2854 = vmatpush1.bf16.msra.mxu1 %v3921_v17  ;;  %2814 = vmatprep.subr.bf16.mxu0 %v3926_v18  ;;  %v3980_v17 = vld [vmem:[%s5198_s0 + $0x684] ss:$240 sps:$4 sm:$0xff]   ;;  %v3983_v18 = vld [vmem:[%s5198_s0 + $0x68c] ss:$240 sps:$4 sm:$0xff]  }
  0xf9   :  { %2855 = vmatprep.subr.bf16.mxu1 %v3929_v19  ;;  %v3978_v19 = vld [vmem:[%s5198_s0 + $0x680] ss:$240 sps:$4 sm:$0xff]  }
  0xfb   :  { %2815 = vmatpush1.bf16.msra.mxu0 %v3924_v20  ;;  %v3981_v20 = vld [vmem:[%s5198_s0 + $0x688] ss:$240 sps:$4 sm:$0xff]  }
  0xfc   :  { %2856 = vmatpush1.bf16.msra.mxu1 %v3927_v21  ;;  %2816 = vmatprep.subr.bf16.mxu0 %v3932_v22  ;;  %v3986_v21 = vld [vmem:[%s5198_s0 + $0x4a4] ss:$240 sps:$4 sm:$0xff]   ;;  %v3989_v22 = vld [vmem:[%s5198_s0 + $0x4ac] ss:$240 sps:$4 sm:$0xff]  }
  0xfd   :  { %2857 = vmatprep.subr.bf16.mxu1 %v3935_v24  ;;  %v3984_v24 = vld [vmem:[%s5198_s0 + $0x4a0] ss:$240 sps:$4 sm:$0xff]  }
  0xfe   :  { %v4902_v28 = vpop.f32.mrf.mxu0 }
  0xff   :  { %v4904_v29 = vpop.f32.mrf.mxu1  ;;  %2817 = vmatpush1.bf16.msra.mxu0 %v3930_v25  ;;  %v3987_v25 = vld [vmem:[%s5198_s0 + $0x4a8] ss:$240 sps:$4 sm:$0xff]  }
 0x100   :  { %2858 = vmatpush1.bf16.msra.mxu1 %v3933_v26  ;;  %v4912_v32 = vpop.f32.mrf.mxu0  ;;  %2818 = vmatprep.subr.bf16.mxu0 %v3938_v23  ;;  %v3992_v26 = vld [vmem:[%s5198_s0 + $0x2c4] ss:$240 sps:$4 sm:$0xff]   ;;  %v3990_v23 = vld [vmem:[%s5198_s0 + $0x2c0] ss:$240 sps:$4 sm:$0xff]  }
 0x101   :  { %v4914_v33 = vpop.f32.mrf.mxu1  ;;  %2859 = vmatprep.subr.bf16.mxu1 %v3941_v27  ;;  %v3993_v27 = vld [vmem:[%s5198_s0 + $0x2c8] ss:$240 sps:$4 sm:$0xff]  }
 0x102   :  { %v2022_v40 = vpop.f32.mrf.mxu0 }
 0x103   :  { %v2063_v41 = vpop.f32.mrf.mxu1  ;;  %2819 = vmatpush1.bf16.msra.mxu0 %v3936_v30  ;;  %v3998_v30 = vld [vmem:[%s5198_s0 + $0xe4] ss:$240 sps:$4 sm:$0xff]   ;;  %v3996_v40 = vld [vmem:[%s5198_s0 + $0xe0] ss:$240 sps:$4 sm:$0xff]  }
 0x104   :  { %2860 = vmatpush1.bf16.msra.mxu1 %v3939_v31  ;;  %v2023_v45 = vpop.f32.mrf.mxu0  ;;  %2892 = vmatprep.subr.bf16.mxu0 %v3944_v36  ;;  %v4001_v31 = vld [vmem:[%s5198_s0 + $0xec] ss:$240 sps:$4 sm:$0xff]   ;;  %v3999_v41 = vld [vmem:[%s5198_s0 + $0xe8] ss:$240 sps:$4 sm:$0xff]  }
 0x105   :  { %v2064_v46 = vpop.f32.mrf.mxu1  ;;  %2933 = vmatprep.subr.bf16.mxu1 %v3947_v37 }
 0x106   :  { %3528 = vmatmul.mubr.msk.bf16.vlgmr.msra.gmra.mxu0 %vm1816_vm0, %v4575_v43 }
 0x107   :  { %3529 = vmatmul.mubr.msk.bf16.vlgmr.msra.gmra.mxu1 %vm1816_vm0, %v4575_v43  ;;  %2893 = vmatpush1.bf16.msra.mxu0 %v3942_v42 }
 0x108   :  { %2934 = vmatpush1.bf16.msra.mxu1 %v3945_v44  ;;  %2894 = vmatprep.subr.bf16.mxu0 %v3950_v47 }
 0x109   :  { %2935 = vmatprep.subr.bf16.mxu1 %v3953_v48  ;;  %2918 = vmatprep.mubr.bf16.mxu0 %v4003_v1 }
 0x10a   :  { %2959 = vmatprep.mubr.bf16.mxu1 %v4003_v1 }
 0x10b   :  { %2895 = vmatpush1.bf16.msra.mxu0 %v3948_v49 }
 0x10c   :  { %2936 = vmatpush1.bf16.msra.mxu1 %v3951_v50  ;;  %2896 = vmatprep.subr.bf16.mxu0 %v3956_v51 }
 0x10d   :  { %2937 = vmatprep.subr.bf16.mxu1 %v3959_v52 }
 0x10f   :  { %2897 = vmatpush1.bf16.msra.mxu0 %v3954_v53 }
 0x110   :  { %2938 = vmatpush1.bf16.msra.mxu1 %v3957_v54  ;;  %2898 = vmatprep.subr.bf16.mxu0 %v3962_v55 }
 0x111   :  { %2939 = vmatprep.subr.bf16.mxu1 %v3965_v56 }
 0x112   :  { %v4976_v61 = vpop.f32.mrf.mxu0 }
 0x113   :  { %v4978_v62 = vpop.f32.mrf.mxu1  ;;  %2899 = vmatpush1.bf16.msra.mxu0 %v3960_v57 }
 0x114   :  { %2940 = vmatpush1.bf16.msra.mxu1 %v3963_v58  ;;  %v4986_v6 = vpop.f32.mrf.mxu0  ;;  %2900 = vmatprep.subr.bf16.mxu0 %v3968_v59 }
 0x115   :  { %v4988_v7 = vpop.f32.mrf.mxu1  ;;  %2941 = vmatprep.subr.bf16.mxu1 %v3971_v60 }
 0x116   :  { %v3050_v10 = vmax.f32 %v4754_v34, %v4988_v7  ;;  %v2104_v11 = vpop.f32.mrf.mxu0 }
 0x117   :  { %v2145_v12 = vpop.f32.mrf.mxu1  ;;  %2901 = vmatpush1.bf16.msra.mxu0 %v3966_v2 }
 0x118   :  { %2942 = vmatpush1.bf16.msra.mxu1 %v3969_v3  ;;  %v2105_v15 = vpop.f32.mrf.mxu0  ;;  %2974 = vmatprep.subr.bf16.mxu0 %v3974_v8 }
 0x119   :  { %v2146_v16 = vpop.f32.mrf.mxu1  ;;  %3015 = vmatprep.subr.bf16.mxu1 %v3977_v9 }
 0x11a   :  { %3530 = vmatmul.mubr.msk.bf16.vlgmr.msra.gmra.mxu0 %vm1816_vm0, %v4575_v43 }
 0x11b   :  { %3531 = vmatmul.mubr.msk.bf16.vlgmr.msra.gmra.mxu1 %vm1816_vm0, %v4575_v43  ;;  %2975 = vmatpush1.bf16.msra.mxu0 %v3972_v13 }
 0x11c   :  { %3016 = vmatpush1.bf16.msra.mxu1 %v3975_v14  ;;  %2976 = vmatprep.subr.bf16.mxu0 %v3980_v17 }
 0x11d   :  { %3017 = vmatprep.subr.bf16.mxu1 %v3983_v18  ;;  %3000 = vmatprep.mubr.bf16.mxu0 %v4003_v1 }
 0x11e   :  { %3041 = vmatprep.mubr.bf16.mxu1 %v4003_v1  ;;  %v3995_v1 = vld [vmem:[%s5198_s0 + $0x2cc] ss:$240 sps:$4 sm:$0xff]  }
 0x11f   :  { %2977 = vmatpush1.bf16.msra.mxu0 %v3978_v19 }
 0x120   :  { %3018 = vmatpush1.bf16.msra.mxu1 %v3981_v20  ;;  %2978 = vmatprep.subr.bf16.mxu0 %v3986_v21 }
 0x121   :  { %3019 = vmatprep.subr.bf16.mxu1 %v3989_v22 }
 0x123   :  { %2979 = vmatpush1.bf16.msra.mxu0 %v3984_v24 }
 0x124   :  { %3020 = vmatpush1.bf16.msra.mxu1 %v3987_v25  ;;  %2980 = vmatprep.subr.bf16.mxu0 %v3992_v26 }
 0x125   :  { %3021 = vmatprep.subr.bf16.mxu1 %v3995_v1 }
 0x126   :  { %v5052_v36 = vpop.f32.mrf.mxu0 }
 0x127   :  { %v5054_v37 = vpop.f32.mrf.mxu1  ;;  %2981 = vmatpush1.bf16.msra.mxu0 %v3990_v23 }
 0x128   :  { %3022 = vmatpush1.bf16.msra.mxu1 %v3993_v27  ;;  %v5062_v42 = vpop.f32.mrf.mxu0  ;;  %2982 = vmatprep.subr.bf16.mxu0 %v3998_v30  ;;  %v3053_v34 = vmax.f32 %v4766_v39, %v5054_v37 }
 0x129   :  { %v5064_v44 = vpop.f32.mrf.mxu1  ;;  %3023 = vmatprep.subr.bf16.mxu1 %v4001_v31 }
 0x12a   :  { %v3054_v45 = vmax.f32 %v4828_v63, %v5064_v44  ;;  %v2186_v46 = vpop.f32.mrf.mxu0 }
 0x12b   :  { %v2227_v47 = vpop.f32.mrf.mxu1  ;;  %2983 = vmatpush1.bf16.msra.mxu0 %v3996_v40 }
 0x12c   :  { %3024 = vmatpush1.bf16.msra.mxu1 %v3999_v41  ;;  %v2187_v48 = vpop.f32.mrf.mxu0 }
 0x12d   :  { %v2228_v49 = vpop.f32.mrf.mxu1 }
 0x12e   :  { %3532 = vmatmul.mubr.msk.bf16.vlgmr.msra.gmra.mxu0 %vm1816_vm0, %v4575_v43 }
 0x12f   :  { %3533 = vmatmul.mubr.msk.bf16.vlgmr.msra.gmra.mxu1 %vm1816_vm0, %v4575_v43 }
 0x13a   :  { %v5072_v50 = vpop.f32.mrf.mxu0 }
 0x13b   :  { %v5074_v51 = vpop.f32.mrf.mxu1  ;;  %v3055_v7 = vmax.f32 %v4838_v4, %v5072_v50 }
 0x13c   :  { %v5076_v52 = vpop.f32.mrf.mxu0 }
 0x13d   :  { %v5078_v53 = vpop.f32.mrf.mxu1 }
 0x13e   :  { %v2268_v55 = vpop.f32.mrf.mxu0 }
 0x13f   :  { %v2309_v56 = vpop.f32.mrf.mxu1 }
 0x140   :  { %v2269_v57 = vpop.f32.mrf.mxu0 }
 0x141   :  { %v2310_v58 = vpop.f32.mrf.mxu1 }
 0x14e   :  { %v5082_v59 = vpop.f32.mrf.mxu0 }
 0x14f   :  { %v5084_v60 = vpop.f32.mrf.mxu1 }
 0x150   :  { %v5086_v43 = vpop.f32.mrf.mxu0 }
 0x151   :  { %v5088_v2 = vpop.f32.mrf.mxu1 }
 0x152   :  { %v2350_v8 = vpop.f32.mrf.mxu0 }
 0x153   :  { %v2391_v9 = vpop.f32.mrf.mxu1 }
 0x154   :  { %v2351_v11 = vpop.f32.mrf.mxu0 }
 0x155   :  { %v2392_v12 = vpop.f32.mrf.mxu1 }
 0x162   :  { %v5092_v13 = vpop.f32.mrf.mxu0 }
 0x163   :  { %v2469_v14 = vpop.f32.mrf.mxu1 }
 0x164   :  { %v5094_v15 = vpop.f32.mrf.mxu0 }
 0x165   :  { %v2471_v16 = vpop.f32.mrf.mxu1 }
 0x166   :  { %v2432_v17 = vpop.f32.mrf.mxu0 }
 0x167   :  { %v2473_v18 = vpop.f32.mrf.mxu1 }
 0x168   :  { %v2433_v19 = vpop.f32.mrf.mxu0 }
 0x169   :  { %v2474_v20 = vpop.f32.mrf.mxu1  ;;  %v3051_v19 = vmax.f32 %v4764_v38, %v5052_v36 }
 0x176   :  { %v2510_v21 = vpop.f32.mrf.mxu0 }
 0x177   :  { %v5096_v22 = vpop.f32.mrf.mxu1 }
 0x178   :  { %v2512_v24 = vpop.f32.mrf.mxu0 }
 0x179   :  { %v2553_v25 = vpop.f32.mrf.mxu1 }
 0x17a   :  { %v2514_v26 = vpop.f32.mrf.mxu0 }
 0x17b   :  { %v2555_v1 = vpop.f32.mrf.mxu1  ;;  %v5116_v26 = vpop.permute.xlu0 %3098 }
 0x17c   :  { %v2515_v23 = vpop.f32.mrf.mxu0 }
 0x17d   :  { %v2556_v27 = vpop.f32.mrf.mxu1 }
 0x17e   :  { %v3052_v27 = vmax.f32 %v4756_v35, %v5062_v42 }
 0x18a   :  { %v2592_v30 = vpop.f32.mrf.mxu0 }
 0x18b   :  { %v5098_v31 = vpop.f32.mrf.mxu1 }
 0x18c   :  { %v5100_v40 = vpop.f32.mrf.mxu0 }
 0x18d   :  { %v5102_v41 = vpop.f32.mrf.mxu1 }
 0x18e   :  { %v2596_v46 = vpop.f32.mrf.mxu0 }
 0x18f   :  { %v2637_v47 = vpop.f32.mrf.mxu1 }
 0x190   :  { %v2597_v48 = vpop.f32.mrf.mxu0 }
 0x191   :  { %v2638_v49 = vpop.f32.mrf.mxu1 }
 0x19e   :  { %v5104_v55 = vpop.f32.mrf.mxu0 }
 0x19f   :  { %v5106_v56 = vpop.f32.mrf.mxu1 }
 0x1a0   :  { %v5108_v57 = vpop.f32.mrf.mxu0 }
 0x1a1   :  { %v5110_v58 = vpop.f32.mrf.mxu1 }
 0x1a2   :  { %v2678_v8 = vpop.f32.mrf.mxu0 }
 0x1a3   :  { %v2719_v9 = vpop.f32.mrf.mxu1 }
 0x1a4   :  { %v2679_v11 = vpop.f32.mrf.mxu0 }
 0x1a5   :  { %v2720_v12 = vpop.f32.mrf.mxu1 }
 0x1b2   :  { %v5112_v17 = vpop.f32.mrf.mxu0 }
 0x1b3   :  { %v2797_v18 = vpop.f32.mrf.mxu1 }
 0x1b4   :  { %v3066_v20 = vmax.f32 %v2471_v16, %v2797_v18  ;;  %v2758_v1 = vpop.f32.mrf.mxu0 }
 0x1b5   :  { %v2799_v23 = vpop.f32.mrf.mxu1  ;;  %v3065_v47 = vmax.f32 %v2469_v14, %v2758_v1 }
 0x1b6   :  { %v3081_v46 = vmax.f32 %v3051_v19, %v3066_v20  ;;  %v3067_v48 = vmax.f32 %v2510_v21, %v2799_v23  ;;  %v2760_v49 = vpop.f32.mrf.mxu0  ;;  %v3056_v21 = vmax.f32 %v4830_v0, %v5076_v52 }
 0x1b7   :  { %v2801_v8 = vpop.f32.mrf.mxu1  ;;  %v3080_v9 = vmax.f32 %v3050_v10, %v3065_v47 }
 0x1b8   :  { %v3082_v11 = vmax.f32 %v3052_v27, %v3067_v48  ;;  %v3102_v38 = vadd.f32 %v5116_v26, %v3081_v46  ;;  %v2761_v36 = vpop.f32.mrf.mxu0 }
 0x1b9   :  { %v2802_v16 = vpop.f32.mrf.mxu1  ;;  %v3101_v12 = vadd.f32 %v5116_v26, %v3080_v9  ;;  %v3059_v9 = vmax.f32 %v4912_v32, %v5082_v59  ;;  %v3060_v36 = vmax.f32 %v4904_v29, %v5086_v43 }
 0x1ba   :  { %v3117_v3 = vmax.f32 %v3102_v38, 0.0  ;;  %v3103_v19 = vadd.f32 %v5116_v26, %v3082_v11 }
 0x1bb   :  { %v3116_v18 = vmax.f32 %v3101_v12, 0.0 }
 0x1bd   :  { %v3542_v54 = vpack.c.bf16 %v3117_v3, %v3116_v18 }
 0x1bf   :  { %3192 = vst [vmem:[%s5201_s3] sm:$0xff] %v3542_v54 }
 0x1c6   :  { %v2838_v35 = vpop.f32.mrf.mxu0 }
 0x1c7   :  { %v2879_v42 = vpop.f32.mrf.mxu1  ;;  %v3068_v10 = vmax.f32 %v2512_v24, %v2838_v35  ;;  %v3118_v24 = vmax.f32 %v3103_v19, 0.0 }
 0x1c8   :  { %v3070_v14 = vmax.f32 %v2553_v25, %v2879_v42  ;;  %v2840_v3 = vpop.f32.mrf.mxu0 }
 0x1c9   :  { %v2881_v20 = vpop.f32.mrf.mxu1  ;;  %v3083_v1 = vmax.f32 %v3053_v34, %v3068_v10  ;;  %v3069_v54 = vmax.f32 %v5096_v22, %v2840_v3 }
 0x1ca   :  { %v3085_v23 = vmax.f32 %v3055_v7, %v3070_v14  ;;  %v3071_v27 = vmax.f32 %v2592_v30, %v2881_v20  ;;  %v2842_v46 = vpop.f32.mrf.mxu0 }
 0x1cb   :  { %v2883_v47 = vpop.f32.mrf.mxu1  ;;  %v3104_v39 = vadd.f32 %v5116_v26, %v3083_v1  ;;  %v3084_v37 = vmax.f32 %v3054_v45, %v3069_v54  ;;  %v3057_v45 = vmax.f32 %v4840_v5, %v5074_v51  ;;  %v3061_v1 = vmax.f32 %v4914_v33, %v5084_v60 }
 0x1cc   :  { %v3106_v4 = vadd.f32 %v5116_v26, %v3085_v23  ;;  %v3086_v0 = vmax.f32 %v3056_v21, %v3071_v27  ;;  %v2843_v50 = vpop.f32.mrf.mxu0  ;;  %v3063_v23 = vmax.f32 %v4986_v6, %v5092_v13  ;;  %v3064_v46 = vmax.f32 %v4978_v62, %v5094_v15 }
 0x1cd   :  { %v2884_v52 = vpop.f32.mrf.mxu1  ;;  %v3119_v25 = vmax.f32 %v3104_v39, 0.0  ;;  %v3105_v48 = vadd.f32 %v5116_v26, %v3084_v37 }
 0x1ce   :  { %v3121_v22 = vmax.f32 %v3106_v4, 0.0  ;;  %v3107_v16 = vadd.f32 %v5116_v26, %v3086_v0 }
 0x1cf   :  { %v3543_v49 = vpack.c.bf16 %v3119_v25, %v3118_v24  ;;  %v3120_v30 = vmax.f32 %v3105_v48, 0.0 }
 0x1d0   :  { %v3122_v14 = vmax.f32 %v3107_v16, 0.0 }
 0x1d1   :  { %3193 = vst [vmem:[%s5201_s3 + $0x8] sm:$0xff] %v3543_v49  ;;  %v3544_v8 = vpack.c.bf16 %v3121_v22, %v3120_v30 }
 0x1d3   :  { %3194 = vst [vmem:[%s5201_s3 + $0x10] sm:$0xff] %v3544_v8 }
 0x1da   :  { %v2920_v63 = vpop.f32.mrf.mxu0 }
 0x1db   :  { %v2961_v44 = vpop.f32.mrf.mxu1  ;;  %v3072_v11 = vmax.f32 %v5100_v40, %v2920_v63  ;;  %v5202_v40 = vmax.f32 %v4902_v28, %v5078_v53 }
 0x1dc   :  { %v3074_v38 = vmax.f32 %v5102_v41, %v2961_v44  ;;  %v2922_v12 = vpop.f32.mrf.mxu0 }
 0x1dd   :  { %v2963_v18 = vpop.f32.mrf.mxu1  ;;  %v3087_v35 = vmax.f32 %v3057_v45, %v3072_v11  ;;  %v3073_v34 = vmax.f32 %v5098_v31, %v2922_v12 }
 0x1de   :  { %v3089_v42 = vmax.f32 %v3059_v9, %v3074_v38  ;;  %v3075_v5 = vmax.f32 %v5104_v55, %v2963_v18  ;;  %v2924_v51 = vpop.f32.mrf.mxu0 }
 0x1df   :  { %v2965_v7 = vpop.f32.mrf.mxu1  ;;  %v3108_v32 = vadd.f32 %v5116_v26, %v3087_v35  ;;  %v3088_v29 = vmax.f32 %v5202_v40, %v3073_v34 }
 0x1e0   :  { %v3110_v59 = vadd.f32 %v5116_v26, %v3089_v42  ;;  %v3090_v43 = vmax.f32 %v3060_v36, %v3075_v5  ;;  %v2925_v41 = vpop.f32.mrf.mxu0 }
 0x1e1   :  { %v2966_v10 = vpop.f32.mrf.mxu1  ;;  %v3123_v21 = vmax.f32 %v3108_v32, 0.0  ;;  %v3109_v19 = vadd.f32 %v5116_v26, %v3088_v29 }
 0x1e2   :  { %v3125_v3 = vmax.f32 %v3110_v59, 0.0  ;;  %v3111_v47 = vadd.f32 %v5116_v26, %v3090_v43 }
 0x1e3   :  { %v3545_v31 = vpack.c.bf16 %v3123_v21, %v3122_v14  ;;  %v3124_v55 = vmax.f32 %v3109_v19, 0.0 }
 0x1e4   :  { %v3126_v25 = vmax.f32 %v3111_v47, 0.0 }
 0x1e5   :  { %3195 = vst [vmem:[%s5201_s3 + $0x18] sm:$0xff] %v3545_v31  ;;  %v3546_v20 = vpack.c.bf16 %v3125_v3, %v3124_v55 }
 0x1e7   :  { %3196 = vst [vmem:[%s5201_s3 + $0x20] sm:$0xff] %v3546_v20 }
 0x1ee   :  { %v3002_v28 = vpop.f32.mrf.mxu0 }
 0x1ef   :  { %v3043_v53 = vpop.f32.mrf.mxu1  ;;  %v3076_v54 = vmax.f32 %v5108_v57, %v3002_v28  ;;  %v5203_v57 = vmax.f32 %v4976_v61, %v5088_v2 }
 0x1f0   :  { %v3078_v27 = vmax.f32 %v5110_v58, %v3043_v53  ;;  %v3004_v39 = vpop.f32.mrf.mxu0 }
 0x1f1   :  { %v3045_v4 = vpop.f32.mrf.mxu1  ;;  %v3091_v37 = vmax.f32 %v3061_v1, %v3076_v54  ;;  %v3077_v50 = vmax.f32 %v5106_v56, %v3004_v39 }
 0x1f2   :  { %v3093_v0 = vmax.f32 %v3063_v23, %v3078_v27  ;;  %v3079_v33 = vmax.f32 %v5112_v17, %v3045_v4  ;;  %v3006_v60 = vpop.f32.mrf.mxu0 }
 0x1f3   :  { %v3047_v52 = vpop.f32.mrf.mxu1  ;;  %v3112_v6 = vadd.f32 %v5116_v26, %v3091_v37  ;;  %v3092_v62 = vmax.f32 %v5203_v57, %v3077_v50 }
 0x1f4   :  { %v3114_v13 = vadd.f32 %v5116_v26, %v3093_v0  ;;  %v3094_v15 = vmax.f32 %v3064_v46, %v3079_v33  ;;  %v3007_v58 = vpop.f32.mrf.mxu0 }
 0x1f5   :  { %v3048_v24 = vpop.f32.mrf.mxu1  ;;  %v3127_v48 = vmax.f32 %v3112_v6, 0.0  ;;  %v3113_v49 = vadd.f32 %v5116_v26, %v3092_v62 }
 0x1f6   :  { %v3115_v56 = vadd.f32 %v5116_v26, %v3094_v15  ;;  %v3129_v22 = vmax.f32 %v3114_v13, 0.0 }
 0x1f7   :  { %v3547_v17 = vpack.c.bf16 %v3127_v48, %v3126_v25  ;;  %v3128_v30 = vmax.f32 %v3113_v49, 0.0 }
 0x1f8   :  { %v3130_v8 = vmax.f32 %v3115_v56, 0.0 }
 0x1f9   :  { %3197 = vst [vmem:[%s5201_s3 + $0x28] sm:$0xff] %v3547_v17  ;;  %v3548_v63 = vpack.c.bf16 %v3129_v22, %v3128_v30 }
 0x1fa   :  { %v3549_v61 = vpack.c.bf16 %v3130_v8, %v3130_v8 }
 0x1fb   :  { %3198 = vst [vmem:[%s5201_s3 + $0x30] sm:$0xff] %v3548_v63 }
 0x1fc   :  { %3199 = vst [vmem:[%s5201_s3 + $0x38] sm:$0xf] %v3549_v61 }

// kernel: three_layer_cnn_forward.4
= control target key start
LH: loop header
LB: loop body
LE: loop exit
PB: predicated region body
PF: predicated region fallthrough
CT: control target
= control target key end

     0   :  { %v1399_v1 = vmov 0   ;;  %vm746_vm0 = vcmask 261120   ;;  %s1826_s0 = inlined_call_operand.vmem [shape: bf16[160,1536], index: 0, kind: input, shape index: {}]   ;;  %s1827_s1 = inlined_call_operand.vmem [shape: bf16[16,160], index: 1, kind: input, shape index: {}]   ;;  %s1828_s2 = inlined_call_operand.vmem [shape: f32[16,1], index: 2, kind: input, shape index: {}]   ;;  %s1829_s3 = inlined_call_operand.vmem [shape: bf16[16,384], index: 3, kind: output, shape index: {}]  }
   0x1   :  { %v1216_v0 = vld [vmem:[%s1826_s0 + $0x2a4] ss:$48 sps:$4 sm:$0xff]   ;;  %1215 = vset.pattern.permute.xlu0 %v1399_v1  ;;  %v1218_v2 = vld [vmem:[%s1826_s0 + $0x2ac] ss:$48 sps:$4 sm:$0xff]   ;;  %v1220_v3 = vld [vmem:[%s1826_s0 + $0x2a0] ss:$48 sps:$4 sm:$0xff]  }
   0x2   :  { %750 = vmatprep.subr.bf16.mxu0 %v1216_v0  ;;  %v1221_v4 = vld [vmem:[%s1826_s0 + $0x2a8] ss:$48 sps:$4 sm:$0xff]   ;;  %793 = vmatprep.subr.bf16.mxu1 %v1218_v2  ;;  %v1222_v5 = vld [vmem:[%s1826_s0 + $0x244] ss:$48 sps:$4 sm:$0xff]   ;;  %v1224_v6 = vld [vmem:[%s1826_s0 + $0x24c] ss:$48 sps:$4 sm:$0xff]  }
   0x3   :  { %751 = vmatpush1.bf16.msra.mxu0 %v1220_v3  ;;  %794 = vmatpush1.bf16.msra.mxu1 %v1221_v4  ;;  %v1226_v7 = vld [vmem:[%s1826_s0 + $0x240] ss:$48 sps:$4 sm:$0xff]   ;;  %v1227_v8 = vld [vmem:[%s1826_s0 + $0x248] ss:$48 sps:$4 sm:$0xff]   ;;  %v1228_v9 = vld [vmem:[%s1826_s0 + $0x1e4] ss:$48 sps:$4 sm:$0xff]  }
   0x4   :  { %752 = vmatprep.subr.bf16.mxu0 %v1222_v5  ;;  %795 = vmatprep.subr.bf16.mxu1 %v1224_v6  ;;  %v1230_v10 = vld [vmem:[%s1826_s0 + $0x1ec] ss:$48 sps:$4 sm:$0xff]   ;;  %v1232_v11 = vld [vmem:[%s1826_s0 + $0x1e0] ss:$48 sps:$4 sm:$0xff]   ;;  %v1233_v12 = vld [vmem:[%s1826_s0 + $0x1e8] ss:$48 sps:$4 sm:$0xff]  }
   0x5   :  { %v1234_v13 = vld [vmem:[%s1826_s0 + $0x184] ss:$48 sps:$4 sm:$0xff]   ;;  %v1236_v14 = vld [vmem:[%s1826_s0 + $0x18c] ss:$48 sps:$4 sm:$0xff]   ;;  %v1238_v15 = vld [vmem:[%s1826_s0 + $0x180] ss:$48 sps:$4 sm:$0xff]  }
   0x6   :  { %v1239_v16 = vld [vmem:[%s1826_s0 + $0x188] ss:$48 sps:$4 sm:$0xff]   ;;  %v1240_v17 = vld [vmem:[%s1826_s0 + $0x124] ss:$48 sps:$4 sm:$0xff]   ;;  %v1242_v18 = vld [vmem:[%s1826_s0 + $0x12c] ss:$48 sps:$4 sm:$0xff]  }
   0x7   :  { %753 = vmatpush1.bf16.msra.mxu0 %v1226_v7  ;;  %796 = vmatpush1.bf16.msra.mxu1 %v1227_v8  ;;  %v1244_v19 = vld [vmem:[%s1826_s0 + $0x120] ss:$48 sps:$4 sm:$0xff]   ;;  %v1245_v20 = vld [vmem:[%s1826_s0 + $0x128] ss:$48 sps:$4 sm:$0xff]   ;;  %v1246_v21 = vld [vmem:[%s1826_s0 + $0xc4] ss:$48 sps:$4 sm:$0xff]  }
   0x8   :  { %754 = vmatprep.subr.bf16.mxu0 %v1228_v9  ;;  %797 = vmatprep.subr.bf16.mxu1 %v1230_v10  ;;  %v1248_v22 = vld [vmem:[%s1826_s0 + $0xcc] ss:$48 sps:$4 sm:$0xff]   ;;  %v1250_v23 = vld [vmem:[%s1826_s0 + $0xc0] ss:$48 sps:$4 sm:$0xff]   ;;  %v1251_v24 = vld [vmem:[%s1826_s0 + $0xc8] ss:$48 sps:$4 sm:$0xff]  }
   0x9   :  { %v1252_v25 = vld [vmem:[%s1826_s0 + $0x64] ss:$48 sps:$4 sm:$0xff]   ;;  %v1254_v26 = vld [vmem:[%s1826_s0 + $0x6c] ss:$48 sps:$4 sm:$0xff]   ;;  %v1256_v27 = vld [vmem:[%s1826_s0 + $0x60] ss:$48 sps:$4 sm:$0xff]  }
   0xa   :  { %v1257_v28 = vld [vmem:[%s1826_s0 + $0x68] ss:$48 sps:$4 sm:$0xff]   ;;  %v1258_v29 = vld [vmem:[%s1826_s0 + $0x4] ss:$48 sps:$4 sm:$0xff]   ;;  %v1260_v30 = vld [vmem:[%s1826_s0 + $0xc] ss:$48 sps:$4 sm:$0xff]  }
   0xb   :  { %755 = vmatpush1.bf16.msra.mxu0 %v1232_v11  ;;  %798 = vmatpush1.bf16.msra.mxu1 %v1233_v12  ;;  %v1262_v31 = vld [vmem:[%s1826_s0] ss:$48 sps:$4 sm:$0xff]   ;;  %v1263_v32 = vld [vmem:[%s1826_s0 + $0x8] ss:$48 sps:$4 sm:$0xff]   ;;  %v1519_v33 = vld [vmem:[%s1827_s1 + $0x4] ss:$8 sps:$4 sm:$0xff]  }
   0xc   :  { %756 = vmatprep.subr.bf16.mxu0 %v1234_v13  ;;  %799 = vmatprep.subr.bf16.mxu1 %v1236_v14  ;;  %v1264_v34 = vld [vmem:[%s1826_s0 + $0x364] ss:$48 sps:$4 sm:$0xff]   ;;  %v1266_v35 = vld [vmem:[%s1826_s0 + $0x36c] ss:$48 sps:$4 sm:$0xff]   ;;  %v1268_v36 = vld [vmem:[%s1826_s0 + $0x360] ss:$48 sps:$4 sm:$0xff]  }
   0xd   :  { %1200 = vmatprep.mubr.msk.bf16.mxu0 %vm746_vm0, %v1519_v33  ;;  %1201 = vmatprep.mubr.msk.bf16.mxu1 %vm746_vm0, %v1519_v33  ;;  %v1269_v37 = vld [vmem:[%s1826_s0 + $0x368] ss:$48 sps:$4 sm:$0xff]   ;;  %v1270_v38 = vld [vmem:[%s1826_s0 + $0x304] ss:$48 sps:$4 sm:$0xff]   ;;  %v1272_v39 = vld [vmem:[%s1826_s0 + $0x30c] ss:$48 sps:$4 sm:$0xff]  }
   0xe   :  { %v1274_v40 = vld [vmem:[%s1826_s0 + $0x300] ss:$48 sps:$4 sm:$0xff]   ;;  %v1275_v41 = vld [vmem:[%s1826_s0 + $0x308] ss:$48 sps:$4 sm:$0xff]   ;;  %v1281_v42 = vld [vmem:[%s1826_s0 + $0x2b4] ss:$48 sps:$4 sm:$0xff]  }
   0xf   :  { %757 = vmatpush1.bf16.msra.mxu0 %v1238_v15  ;;  %800 = vmatpush1.bf16.msra.mxu1 %v1239_v16  ;;  %v1284_v43 = vld [vmem:[%s1826_s0 + $0x2bc] ss:$48 sps:$4 sm:$0xff]   ;;  %v1558_v44 = vld [vmem:[%s1827_s1] ss:$8 sps:$4 sm:$0xff]   ;;  %v1287_v47 = vld [vmem:[%s1826_s0 + $0x254] ss:$48 sps:$4 sm:$0xff]  }
  0x10   :  { %758 = vmatprep.subr.bf16.mxu0 %v1240_v17  ;;  %801 = vmatprep.subr.bf16.mxu1 %v1242_v18  ;;  %v1279_v45 = vld [vmem:[%s1826_s0 + $0x2b0] ss:$48 sps:$4 sm:$0xff]   ;;  %v1282_v46 = vld [vmem:[%s1826_s0 + $0x2b8] ss:$48 sps:$4 sm:$0xff]   ;;  %v1290_v48 = vld [vmem:[%s1826_s0 + $0x25c] ss:$48 sps:$4 sm:$0xff]  }
  0x11   :  { %v1285_v49 = vld [vmem:[%s1826_s0 + $0x250] ss:$48 sps:$4 sm:$0xff]   ;;  %v1288_v50 = vld [vmem:[%s1826_s0 + $0x258] ss:$48 sps:$4 sm:$0xff]   ;;  %v1293_v51 = vld [vmem:[%s1826_s0 + $0x1f4] ss:$48 sps:$4 sm:$0xff]  }
  0x12   :  { %v1296_v52 = vld [vmem:[%s1826_s0 + $0x1fc] ss:$48 sps:$4 sm:$0xff]   ;;  %v1291_v53 = vld [vmem:[%s1826_s0 + $0x1f0] ss:$48 sps:$4 sm:$0xff]   ;;  %v1294_v54 = vld [vmem:[%s1826_s0 + $0x1f8] ss:$48 sps:$4 sm:$0xff]  }
  0x13   :  { %759 = vmatpush1.bf16.msra.mxu0 %v1244_v19  ;;  %802 = vmatpush1.bf16.msra.mxu1 %v1245_v20  ;;  %v1299_v55 = vld [vmem:[%s1826_s0 + $0x194] ss:$48 sps:$4 sm:$0xff]   ;;  %v1302_v56 = vld [vmem:[%s1826_s0 + $0x19c] ss:$48 sps:$4 sm:$0xff]   ;;  %v1297_v57 = vld [vmem:[%s1826_s0 + $0x190] ss:$48 sps:$4 sm:$0xff]  }
  0x14   :  { %760 = vmatprep.subr.bf16.mxu0 %v1246_v21  ;;  %803 = vmatprep.subr.bf16.mxu1 %v1248_v22  ;;  %v1300_v58 = vld [vmem:[%s1826_s0 + $0x198] ss:$48 sps:$4 sm:$0xff]   ;;  %v1305_v59 = vld [vmem:[%s1826_s0 + $0x134] ss:$48 sps:$4 sm:$0xff]   ;;  %v1308_v60 = vld [vmem:[%s1826_s0 + $0x13c] ss:$48 sps:$4 sm:$0xff]  }
  0x15   :  { %v1303_v61 = vld [vmem:[%s1826_s0 + $0x130] ss:$48 sps:$4 sm:$0xff]   ;;  %v1306_v62 = vld [vmem:[%s1826_s0 + $0x138] ss:$48 sps:$4 sm:$0xff]   ;;  %v1311_v63 = vld [vmem:[%s1826_s0 + $0xd4] ss:$48 sps:$4 sm:$0xff]  }
  0x16   :  { %v1314_v0 = vld [vmem:[%s1826_s0 + $0xdc] ss:$48 sps:$4 sm:$0xff]   ;;  %v1309_v1 = vld [vmem:[%s1826_s0 + $0xd0] ss:$48 sps:$4 sm:$0xff]   ;;  %v1312_v2 = vld [vmem:[%s1826_s0 + $0xd8] ss:$48 sps:$4 sm:$0xff]  }
  0x17   :  { %761 = vmatpush1.bf16.msra.mxu0 %v1250_v23  ;;  %804 = vmatpush1.bf16.msra.mxu1 %v1251_v24  ;;  %v1317_v3 = vld [vmem:[%s1826_s0 + $0x74] ss:$48 sps:$4 sm:$0xff]   ;;  %v1320_v4 = vld [vmem:[%s1826_s0 + $0x7c] ss:$48 sps:$4 sm:$0xff]   ;;  %v1315_v5 = vld [vmem:[%s1826_s0 + $0x70] ss:$48 sps:$4 sm:$0xff]  }
  0x18   :  { %762 = vmatprep.subr.bf16.mxu0 %v1252_v25  ;;  %805 = vmatprep.subr.bf16.mxu1 %v1254_v26  ;;  %v1318_v6 = vld [vmem:[%s1826_s0 + $0x78] ss:$48 sps:$4 sm:$0xff]   ;;  %v1323_v7 = vld [vmem:[%s1826_s0 + $0x14] ss:$48 sps:$4 sm:$0xff]   ;;  %v1326_v8 = vld [vmem:[%s1826_s0 + $0x1c] ss:$48 sps:$4 sm:$0xff]  }
  0x19   :  { %v1321_v9 = vld [vmem:[%s1826_s0 + $0x10] ss:$48 sps:$4 sm:$0xff]   ;;  %v1324_v10 = vld [vmem:[%s1826_s0 + $0x18] ss:$48 sps:$4 sm:$0xff]   ;;  %v1329_v11 = vld [vmem:[%s1826_s0 + $0x374] ss:$48 sps:$4 sm:$0xff]  }
  0x1a   :  { %v1332_v12 = vld [vmem:[%s1826_s0 + $0x37c] ss:$48 sps:$4 sm:$0xff]   ;;  %v1327_v13 = vld [vmem:[%s1826_s0 + $0x370] ss:$48 sps:$4 sm:$0xff]   ;;  %v1330_v14 = vld [vmem:[%s1826_s0 + $0x378] ss:$48 sps:$4 sm:$0xff]  }
  0x1b   :  { %763 = vmatpush1.bf16.msra.mxu0 %v1256_v27  ;;  %806 = vmatpush1.bf16.msra.mxu1 %v1257_v28  ;;  %v1335_v15 = vld [vmem:[%s1826_s0 + $0x314] ss:$48 sps:$4 sm:$0xff]   ;;  %v1338_v16 = vld [vmem:[%s1826_s0 + $0x31c] ss:$48 sps:$4 sm:$0xff]   ;;  %v1333_v17 = vld [vmem:[%s1826_s0 + $0x310] ss:$48 sps:$4 sm:$0xff]  }
  0x1c   :  { %764 = vmatprep.subr.bf16.mxu0 %v1258_v29  ;;  %807 = vmatprep.subr.bf16.mxu1 %v1260_v30  ;;  %v1336_v18 = vld [vmem:[%s1826_s0 + $0x318] ss:$48 sps:$4 sm:$0xff]   ;;  %v1341_v19 = vld [vmem:[%s1826_s0 + $0x2c4] ss:$48 sps:$4 sm:$0xff]   ;;  %v1344_v20 = vld [vmem:[%s1826_s0 + $0x2cc] ss:$48 sps:$4 sm:$0xff]  }
  0x1d   :  { %v1339_v21 = vld [vmem:[%s1826_s0 + $0x2c0] ss:$48 sps:$4 sm:$0xff]   ;;  %v1342_v22 = vld [vmem:[%s1826_s0 + $0x2c8] ss:$48 sps:$4 sm:$0xff]   ;;  %v1347_v23 = vld [vmem:[%s1826_s0 + $0x264] ss:$48 sps:$4 sm:$0xff]  }
  0x1e   :  { %v1350_v24 = vld [vmem:[%s1826_s0 + $0x26c] ss:$48 sps:$4 sm:$0xff]   ;;  %v1026_v25 = vld [vmem:[%s1828_s2] sm:$0xff]  ;;  %v1348_v27 = vld [vmem:[%s1826_s0 + $0x268] ss:$48 sps:$4 sm:$0xff]  }
  0x1f   :  { %765 = vmatpush1.bf16.msra.mxu0 %v1262_v31  ;;  %808 = vmatpush1.bf16.msra.mxu1 %v1263_v32  ;;  %v1345_v26 = vld [vmem:[%s1826_s0 + $0x260] ss:$48 sps:$4 sm:$0xff]   ;;  %v1027_v28 = vld [vmem:[%s1828_s2 + $0x8] sm:$0xff]  ;;  %v1353_v29 = vld [vmem:[%s1826_s0 + $0x204] ss:$48 sps:$4 sm:$0xff]  }
  0x20   :  { %778 = vmatprep.subr.bf16.mxu0 %v1264_v34  ;;  %821 = vmatprep.subr.bf16.mxu1 %v1266_v35  ;;  %v1356_v30 = vld [vmem:[%s1826_s0 + $0x20c] ss:$48 sps:$4 sm:$0xff]   ;;  %v1351_v31 = vld [vmem:[%s1826_s0 + $0x200] ss:$48 sps:$4 sm:$0xff]   ;;  %v1354_v32 = vld [vmem:[%s1826_s0 + $0x208] ss:$48 sps:$4 sm:$0xff]  }
  0x21   :  { %1030 = vperm.xlu0 %1215, %v1026_v25   ;;  %v1359_v34 = vld [vmem:[%s1826_s0 + $0x1a4] ss:$48 sps:$4 sm:$0xff]   ;;  %v1357_v35 = vld [vmem:[%s1826_s0 + $0x1a0] ss:$48 sps:$4 sm:$0xff]  }
  0x23   :  { %779 = vmatpush2.bf16.msra.mxu0 %v1268_v36  ;;  %822 = vmatpush2.bf16.msra.mxu1 %v1269_v37  ;;  %v1360_v36 = vld [vmem:[%s1826_s0 + $0x1a8] ss:$48 sps:$4 sm:$0xff]   ;;  %v1365_v37 = vld [vmem:[%s1826_s0 + $0x144] ss:$48 sps:$4 sm:$0xff]  }
  0x24   :  { %780 = vmatprep.subr.bf16.mxu0 %v1270_v38  ;;  %823 = vmatprep.subr.bf16.mxu1 %v1272_v39  ;;  %v1368_v38 = vld [vmem:[%s1826_s0 + $0x14c] ss:$48 sps:$4 sm:$0xff]   ;;  %v1363_v39 = vld [vmem:[%s1826_s0 + $0x140] ss:$48 sps:$4 sm:$0xff]  }
  0x25   :  { %1035 = vperm.xlu0 %1215, %v1027_v28  }
  0x27   :  { %781 = vmatpush2.bf16.msra.mxu0 %v1274_v40  ;;  %824 = vmatpush2.bf16.msra.mxu1 %v1275_v41  ;;  %v1366_v40 = vld [vmem:[%s1826_s0 + $0x148] ss:$48 sps:$4 sm:$0xff]   ;;  %v1371_v41 = vld [vmem:[%s1826_s0 + $0xe4] ss:$48 sps:$4 sm:$0xff]  }
  0x28   :  { %836 = vmatprep.subr.bf16.mxu0 %v1281_v42  ;;  %879 = vmatprep.subr.bf16.mxu1 %v1284_v43  ;;  %v1374_v42 = vld [vmem:[%s1826_s0 + $0xec] ss:$48 sps:$4 sm:$0xff]   ;;  %v1369_v43 = vld [vmem:[%s1826_s0 + $0xe0] ss:$48 sps:$4 sm:$0xff]  }
  0x2a   :  { %783 = vmatmul.mubr.bf16.vlgmr.msra.gmra.mxu0 %v1558_v44  ;;  %826 = vmatmul.mubr.bf16.vlgmr.msra.gmra.mxu1 %v1558_v44 }
  0x2b   :  { %837 = vmatpush1.bf16.msra.mxu0 %v1279_v45  ;;  %880 = vmatpush1.bf16.msra.mxu1 %v1282_v46  ;;  %v1372_v45 = vld [vmem:[%s1826_s0 + $0xe8] ss:$48 sps:$4 sm:$0xff]   ;;  %v1377_v46 = vld [vmem:[%s1826_s0 + $0x84] ss:$48 sps:$4 sm:$0xff]  }
  0x2c   :  { %838 = vmatprep.subr.bf16.mxu0 %v1287_v47  ;;  %881 = vmatprep.subr.bf16.mxu1 %v1290_v48  ;;  %v1380_v47 = vld [vmem:[%s1826_s0 + $0x8c] ss:$48 sps:$4 sm:$0xff]   ;;  %v1375_v48 = vld [vmem:[%s1826_s0 + $0x80] ss:$48 sps:$4 sm:$0xff]  }
  0x2d   :  { %1202 = vmatprep.mubr.msk.bf16.mxu0 %vm746_vm0, %v1519_v33  ;;  %1203 = vmatprep.mubr.msk.bf16.mxu1 %vm746_vm0, %v1519_v33 }
  0x2f   :  { %839 = vmatpush1.bf16.msra.mxu0 %v1285_v49  ;;  %882 = vmatpush1.bf16.msra.mxu1 %v1288_v50  ;;  %v1378_v49 = vld [vmem:[%s1826_s0 + $0x88] ss:$48 sps:$4 sm:$0xff]   ;;  %v1383_v50 = vld [vmem:[%s1826_s0 + $0x24] ss:$48 sps:$4 sm:$0xff]  }
  0x30   :  { %840 = vmatprep.subr.bf16.mxu0 %v1293_v51  ;;  %883 = vmatprep.subr.bf16.mxu1 %v1296_v52  ;;  %v1386_v51 = vld [vmem:[%s1826_s0 + $0x2c] ss:$48 sps:$4 sm:$0xff]   ;;  %v1381_v52 = vld [vmem:[%s1826_s0 + $0x20] ss:$48 sps:$4 sm:$0xff]  }
  0x33   :  { %841 = vmatpush1.bf16.msra.mxu0 %v1291_v53  ;;  %884 = vmatpush1.bf16.msra.mxu1 %v1294_v54  ;;  %v1384_v53 = vld [vmem:[%s1826_s0 + $0x28] ss:$48 sps:$4 sm:$0xff]   ;;  %v1389_v54 = vld [vmem:[%s1826_s0 + $0x384] ss:$48 sps:$4 sm:$0xff]  }
  0x34   :  { %842 = vmatprep.subr.bf16.mxu0 %v1299_v55  ;;  %885 = vmatprep.subr.bf16.mxu1 %v1302_v56  ;;  %v1392_v55 = vld [vmem:[%s1826_s0 + $0x38c] ss:$48 sps:$4 sm:$0xff]   ;;  %v1387_v56 = vld [vmem:[%s1826_s0 + $0x380] ss:$48 sps:$4 sm:$0xff]  }
  0x37   :  { %843 = vmatpush1.bf16.msra.mxu0 %v1297_v57  ;;  %886 = vmatpush1.bf16.msra.mxu1 %v1300_v58  ;;  %v1390_v57 = vld [vmem:[%s1826_s0 + $0x388] ss:$48 sps:$4 sm:$0xff]   ;;  %v1395_v58 = vld [vmem:[%s1826_s0 + $0x324] ss:$48 sps:$4 sm:$0xff]  }
  0x38   :  { %844 = vmatprep.subr.bf16.mxu0 %v1305_v59  ;;  %887 = vmatprep.subr.bf16.mxu1 %v1308_v60  ;;  %v1398_v59 = vld [vmem:[%s1826_s0 + $0x32c] ss:$48 sps:$4 sm:$0xff]   ;;  %v1393_v60 = vld [vmem:[%s1826_s0 + $0x320] ss:$48 sps:$4 sm:$0xff]  }
  0x3b   :  { %845 = vmatpush1.bf16.msra.mxu0 %v1303_v61  ;;  %888 = vmatpush1.bf16.msra.mxu1 %v1306_v62  ;;  %v1396_v61 = vld [vmem:[%s1826_s0 + $0x328] ss:$48 sps:$4 sm:$0xff]  }
  0x3c   :  { %846 = vmatprep.subr.bf16.mxu0 %v1311_v63  ;;  %889 = vmatprep.subr.bf16.mxu1 %v1314_v0 }
  0x3f   :  { %847 = vmatpush1.bf16.msra.mxu0 %v1309_v1  ;;  %890 = vmatpush1.bf16.msra.mxu1 %v1312_v2 }
  0x40   :  { %848 = vmatprep.subr.bf16.mxu0 %v1317_v3  ;;  %891 = vmatprep.subr.bf16.mxu1 %v1320_v4 }
  0x43   :  { %849 = vmatpush1.bf16.msra.mxu0 %v1315_v5  ;;  %892 = vmatpush1.bf16.msra.mxu1 %v1318_v6 }
  0x44   :  { %850 = vmatprep.subr.bf16.mxu0 %v1323_v7  ;;  %893 = vmatprep.subr.bf16.mxu1 %v1326_v8 }
  0x47   :  { %851 = vmatpush1.bf16.msra.mxu0 %v1321_v9  ;;  %894 = vmatpush1.bf16.msra.mxu1 %v1324_v10 }
  0x48   :  { %864 = vmatprep.subr.bf16.mxu0 %v1329_v11  ;;  %907 = vmatprep.subr.bf16.mxu1 %v1332_v12 }
  0x4b   :  { %865 = vmatpush2.bf16.msra.mxu0 %v1327_v13  ;;  %908 = vmatpush2.bf16.msra.mxu1 %v1330_v14 }
  0x4c   :  { %866 = vmatprep.subr.bf16.mxu0 %v1335_v15  ;;  %909 = vmatprep.subr.bf16.mxu1 %v1338_v16 }
  0x4f   :  { %867 = vmatpush2.bf16.msra.mxu0 %v1333_v17  ;;  %910 = vmatpush2.bf16.msra.mxu1 %v1336_v18 }
  0x50   :  { %922 = vmatprep.subr.bf16.mxu0 %v1341_v19  ;;  %965 = vmatprep.subr.bf16.mxu1 %v1344_v20 }
  0x52   :  { %869 = vmatmul.mubr.bf16.vlgmr.msra.gmra.mxu0 %v1558_v44  ;;  %912 = vmatmul.mubr.bf16.vlgmr.msra.gmra.mxu1 %v1558_v44 }
  0x53   :  { %923 = vmatpush1.bf16.msra.mxu0 %v1339_v21  ;;  %966 = vmatpush1.bf16.msra.mxu1 %v1342_v22 }
  0x54   :  { %924 = vmatprep.subr.bf16.mxu0 %v1347_v23  ;;  %967 = vmatprep.subr.bf16.mxu1 %v1350_v24 }
  0x55   :  { %1204 = vmatprep.mubr.msk.bf16.mxu0 %vm746_vm0, %v1519_v33  ;;  %1205 = vmatprep.mubr.msk.bf16.mxu1 %vm746_vm0, %v1519_v33  ;;  %v1362_v33 = vld [vmem:[%s1826_s0 + $0x1ac] ss:$48 sps:$4 sm:$0xff]  }
  0x57   :  { %925 = vmatpush1.bf16.msra.mxu0 %v1345_v26  ;;  %968 = vmatpush1.bf16.msra.mxu1 %v1348_v27 }
  0x58   :  { %926 = vmatprep.subr.bf16.mxu0 %v1353_v29  ;;  %969 = vmatprep.subr.bf16.mxu1 %v1356_v30 }
  0x5b   :  { %927 = vmatpush1.bf16.msra.mxu0 %v1351_v31  ;;  %970 = vmatpush1.bf16.msra.mxu1 %v1354_v32 }
  0x5c   :  { %928 = vmatprep.subr.bf16.mxu0 %v1359_v34  ;;  %971 = vmatprep.subr.bf16.mxu1 %v1362_v33 }
  0x5f   :  { %929 = vmatpush1.bf16.msra.mxu0 %v1357_v35  ;;  %972 = vmatpush1.bf16.msra.mxu1 %v1360_v36 }
  0x60   :  { %930 = vmatprep.subr.bf16.mxu0 %v1365_v37  ;;  %973 = vmatprep.subr.bf16.mxu1 %v1368_v38 }
  0x63   :  { %931 = vmatpush1.bf16.msra.mxu0 %v1363_v39  ;;  %974 = vmatpush1.bf16.msra.mxu1 %v1366_v40 }
  0x64   :  { %932 = vmatprep.subr.bf16.mxu0 %v1371_v41  ;;  %975 = vmatprep.subr.bf16.mxu1 %v1374_v42 }
  0x67   :  { %933 = vmatpush1.bf16.msra.mxu0 %v1369_v43  ;;  %976 = vmatpush1.bf16.msra.mxu1 %v1372_v45 }
  0x68   :  { %934 = vmatprep.subr.bf16.mxu0 %v1377_v46  ;;  %977 = vmatprep.subr.bf16.mxu1 %v1380_v47 }
  0x6b   :  { %935 = vmatpush1.bf16.msra.mxu0 %v1375_v48  ;;  %978 = vmatpush1.bf16.msra.mxu1 %v1378_v49 }
  0x6c   :  { %936 = vmatprep.subr.bf16.mxu0 %v1383_v50  ;;  %979 = vmatprep.subr.bf16.mxu1 %v1386_v51 }
  0x6f   :  { %937 = vmatpush1.bf16.msra.mxu0 %v1381_v52  ;;  %980 = vmatpush1.bf16.msra.mxu1 %v1384_v53 }
  0x70   :  { %950 = vmatprep.subr.bf16.mxu0 %v1389_v54  ;;  %993 = vmatprep.subr.bf16.mxu1 %v1392_v55 }
  0x73   :  { %951 = vmatpush2.bf16.msra.mxu0 %v1387_v56  ;;  %994 = vmatpush2.bf16.msra.mxu1 %v1390_v57 }
  0x74   :  { %952 = vmatprep.subr.bf16.mxu0 %v1395_v58  ;;  %995 = vmatprep.subr.bf16.mxu1 %v1398_v59 }
  0x77   :  { %953 = vmatpush2.bf16.msra.mxu0 %v1393_v60  ;;  %996 = vmatpush2.bf16.msra.mxu1 %v1396_v61 }
  0x7a   :  { %955 = vmatmul.mubr.bf16.vlgmr.msra.gmra.mxu0 %v1558_v44  ;;  %998 = vmatmul.mubr.bf16.vlgmr.msra.gmra.mxu1 %v1558_v44 }
  0x9c   :  { %v1031_v22 = vpop.permute.xlu0 %1030 }
  0xa0   :  { %v1036_v45 = vpop.permute.xlu0 %1035 }
  0xea   :  { %v784_v62 = vpop.f32.mrf.mxu0  ;;  %v827_v63 = vpop.f32.mrf.mxu1 }
  0xec   :  { %v786_v0 = vpop.f32.mrf.mxu0  ;;  %v829_v1 = vpop.f32.mrf.mxu1 }
  0xed   :  { %v1008_v17 = vmax.f32 %v784_v62, %v829_v1 }
  0xee   :  { %v788_v2 = vpop.f32.mrf.mxu0  ;;  %v831_v3 = vpop.f32.mrf.mxu1 }
  0xf0   :  { %v790_v4 = vpop.f32.mrf.mxu0  ;;  %v833_v5 = vpop.f32.mrf.mxu1 }
  0xf1   :  { %v1011_v37 = vmax.f32 %v788_v2, %v833_v5 }
 0x112   :  { %v870_v6 = vpop.f32.mrf.mxu0  ;;  %v913_v7 = vpop.f32.mrf.mxu1 }
 0x113   :  { %v1009_v16 = vmax.f32 %v786_v0, %v870_v6 }
 0x114   :  { %v872_v8 = vpop.f32.mrf.mxu0  ;;  %v915_v9 = vpop.f32.mrf.mxu1 }
 0x115   :  { %v1010_v20 = vmax.f32 %v827_v63, %v872_v8 }
 0x116   :  { %v874_v10 = vpop.f32.mrf.mxu0  ;;  %v917_v11 = vpop.f32.mrf.mxu1 }
 0x117   :  { %v1012_v25 = vmax.f32 %v790_v4, %v874_v10 }
 0x118   :  { %v876_v12 = vpop.f32.mrf.mxu0  ;;  %v919_v13 = vpop.f32.mrf.mxu1 }
 0x119   :  { %v1013_v38 = vmax.f32 %v831_v3, %v876_v12 }
 0x13a   :  { %v956_v14 = vpop.f32.mrf.mxu0  ;;  %v999_v15 = vpop.f32.mrf.mxu1 }
 0x13b   :  { %v1015_v44 = vmax.f32 %v915_v9, %v999_v15 }
 0x13c   :  { %v958_v18 = vpop.f32.mrf.mxu0  ;;  %v1001_v19 = vpop.f32.mrf.mxu1 }
 0x13d   :  { %v1021_v21 = vmax.f32 %v1009_v16, %v1015_v44  ;;  %v1014_v23 = vmax.f32 %v913_v7, %v958_v18  ;;  %v1016_v24 = vmax.f32 %v956_v14, %v1001_v19 }
 0x13e   :  { %v960_v26 = vpop.f32.mrf.mxu0  ;;  %v1003_v27 = vpop.f32.mrf.mxu1 }
 0x13f   :  { %v1039_v28 = vadd.f32 %v1031_v22, %v1021_v21  ;;  %v1020_v29 = vmax.f32 %v1008_v17, %v1014_v23  ;;  %v1022_v30 = vmax.f32 %v1010_v20, %v1016_v24  ;;  %v1018_v31 = vmax.f32 %v919_v13, %v1003_v27 }
 0x140   :  { %v962_v32 = vpop.f32.mrf.mxu0  ;;  %v1005_v34 = vpop.f32.mrf.mxu1 }
 0x141   :  { %v1038_v33 = vadd.f32 %v1031_v22, %v1020_v29  ;;  %v1040_v35 = vadd.f32 %v1031_v22, %v1022_v30  ;;  %v1024_v36 = vmax.f32 %v1012_v25, %v1018_v31  ;;  %v1017_v39 = vmax.f32 %v917_v11, %v962_v32 }
 0x142   :  { %v1019_v40 = vmax.f32 %v960_v26, %v1005_v34  ;;  %v1045_v41 = vmax.f32 %v1039_v28, 0.0 }
 0x143   :  { %v1044_v42 = vmax.f32 %v1038_v33, 0.0  ;;  %v1046_v43 = vmax.f32 %v1040_v35, 0.0  ;;  %v1042_v46 = vadd.f32 %v1036_v45, %v1024_v36  ;;  %v1023_v47 = vmax.f32 %v1011_v37, %v1017_v39 }
 0x144   :  { %v1025_v48 = vmax.f32 %v1013_v38, %v1019_v40 }
 0x145   :  { %v1210_v49 = vpack.c.bf16 %v1045_v41, %v1044_v42  ;;  %v1211_v50 = vpack.c.bf16 %v1046_v43, %v1046_v43  ;;  %v1041_v51 = vadd.f32 %v1036_v45, %v1023_v47  ;;  %v1048_v53 = vmax.f32 %v1042_v46, 0.0 }
 0x146   :  { %v1043_v52 = vadd.f32 %v1036_v45, %v1025_v48 }
 0x147   :  { %1070 = vst [vmem:[%s1829_s3] sm:$0xff] %v1210_v49  ;;  %1071 = vst [vmem:[%s1829_s3 + $0x8] sm:$0xf] %v1211_v50  ;;  %v1047_v54 = vmax.f32 %v1041_v51, 0.0 }
 0x148   :  { %v1049_v55 = vmax.f32 %v1043_v52, 0.0 }
 0x149   :  { %v1212_v56 = vpack.c.bf16 %v1048_v53, %v1047_v54 }
 0x14a   :  { %v1213_v57 = vpack.c.bf16 %v1049_v55, %v1049_v55 }
 0x14b   :  { %1072 = vst [vmem:[%s1829_s3 + $0xc] sm:$0xff] %v1212_v56 }
 0x14c   :  { %1073 = vst [vmem:[%s1829_s3 + $0x14] sm:$0xf] %v1213_v57 }

// kernel: three_layer_cnn_forward.5
= control target key start
LH: loop header
LB: loop body
LE: loop exit
PB: predicated region body
PF: predicated region fallthrough
CT: control target
= control target key end

     0   :  { %v5431_v1 = vmov 0   ;;  %s5423_s0 = inlined_call_operand.vmem [shape: bf16[512,640], index: 0, kind: input, shape index: {}]   ;;  %s5424_s1 = inlined_call_operand.vmem [shape: bf16[640,16], index: 1, kind: input, shape index: {}]   ;;  %s5425_s2 = inlined_call_operand.vmem [shape: f32[1,16], index: 2, kind: input, shape index: {}]   ;;  %s5426_s3 = inlined_call_operand.vmem [shape: bf16[16,2048], index: 3, kind: input, shape index: {}]   ;;  %s5427_s4 = inlined_call_operand.vmem [shape: f32[1,128], index: 4, kind: input, shape index: {}]   ;;  %s5428_s5 = inlined_call_operand.vmem [shape: bf16[128,2], index: 5, kind: input, shape index: {}]   ;;  %s5429_s6 = inlined_call_operand.vmem [shape: f32[1,2], index: 6, kind: input, shape index: {}]   ;;  %s5430_s7 = inlined_call_operand.hbm [shape: f32[2,2], index: 7, kind: output, shape index: {}]  }
   0x1   :  { %v3715_v0 = vld [vmem:[%s5424_s1 + $0x38] sm:$0xff]   ;;  %1372 = vmatprep.subr.bf16.mxu0 %v5431_v1  ;;  %1661 = vmatprep.subr.bf16.mxu1 %v5431_v1  ;;  %v3717_v3 = vld [vmem:[%s5424_s1 + $0x30] sm:$0xff]   ;;  %v3719_v5 = vld [vmem:[%s5424_s1 + $0x28] sm:$0xff]  }
   0x2   :  { %v3716_v2 = vld [vmem:[%s5424_s1 + $0xb8] sm:$0xff]   ;;  %1373 = vmatpush1.bf16.msra.mxu0 %v3715_v0  ;;  %v3718_v4 = vld [vmem:[%s5424_s1 + $0xb0] sm:$0xff]   ;;  %v3720_v6 = vld [vmem:[%s5424_s1 + $0xa8] sm:$0xff]  }
   0x3   :  { %1662 = vmatpush1.bf16.msra.mxu1 %v3716_v2  ;;  %1374 = vmatprep.subr.bf16.mxu0 %v5431_v1  ;;  %v3721_v7 = vld [vmem:[%s5424_s1 + $0x20] sm:$0xff]   ;;  %v3723_v9 = vld [vmem:[%s5424_s1 + $0x18] sm:$0xff]   ;;  %v3725_v11 = vld [vmem:[%s5424_s1 + $0x10] sm:$0xff]  }
   0x4   :  { %1663 = vmatprep.subr.bf16.mxu1 %v5431_v1  ;;  %v3722_v8 = vld [vmem:[%s5424_s1 + $0xa0] sm:$0xff]   ;;  %v3724_v10 = vld [vmem:[%s5424_s1 + $0x98] sm:$0xff]   ;;  %v3726_v12 = vld [vmem:[%s5424_s1 + $0x90] sm:$0xff]  }
   0x5   :  { %v3727_v13 = vld [vmem:[%s5424_s1 + $0x8] sm:$0xff]   ;;  %v3729_v15 = vld [vmem:[%s5424_s1] sm:$0xff]   ;;  %v3731_v17 = vld [vmem:[%s5424_s1 + $0x78] sm:$0xff]  }
   0x6   :  { %1375 = vmatpush1.bf16.msra.mxu0 %v3717_v3  ;;  %v3728_v14 = vld [vmem:[%s5424_s1 + $0x88] sm:$0xff]   ;;  %v3730_v16 = vld [vmem:[%s5424_s1 + $0x80] sm:$0xff]   ;;  %v3732_v18 = vld [vmem:[%s5424_s1 + $0xf8] sm:$0xff]  }
   0x7   :  { %1664 = vmatpush1.bf16.msra.mxu1 %v3718_v4  ;;  %1376 = vmatprep.subr.bf16.mxu0 %v5431_v1  ;;  %v3749_v19 = vld [vmem:[%s5423_s0 + $0x4] ss:$20 sps:$4 sm:$0xff]   ;;  %v3733_v20 = vld [vmem:[%s5424_s1 + $0x70] sm:$0xff]   ;;  %v3752_v21 = vld [vmem:[%s5423_s0 + $0xc] ss:$20 sps:$4 sm:$0xff]  }
   0x8   :  { %1665 = vmatprep.subr.bf16.mxu1 %v5431_v1  ;;  %v3734_v22 = vld [vmem:[%s5424_s1 + $0xf0] sm:$0xff]   ;;  %1404 = vmatprep.mubr.bf16.mxu0 %v3749_v19  ;;  %v3735_v23 = vld [vmem:[%s5424_s1 + $0x68] sm:$0xff]   ;;  %v3737_v25 = vld [vmem:[%s5424_s1 + $0x60] sm:$0xff]  }
   0x9   :  { %1693 = vmatprep.mubr.bf16.mxu1 %v3752_v21  ;;  %v3736_v24 = vld [vmem:[%s5424_s1 + $0xe8] sm:$0xff]   ;;  %v3738_v26 = vld [vmem:[%s5424_s1 + $0xe0] sm:$0xff]   ;;  %v3739_v27 = vld [vmem:[%s5424_s1 + $0x58] sm:$0xff]  }
   0xa   :  { %1377 = vmatpush1.bf16.msra.mxu0 %v3719_v5  ;;  %v3740_v28 = vld [vmem:[%s5424_s1 + $0xd8] sm:$0xff]   ;;  %v3741_v29 = vld [vmem:[%s5424_s1 + $0x50] sm:$0xff]   ;;  %v3743_v31 = vld [vmem:[%s5424_s1 + $0x48] sm:$0xff]  }
   0xb   :  { %1666 = vmatpush1.bf16.msra.mxu1 %v3720_v6  ;;  %1378 = vmatprep.subr.bf16.mxu0 %v5431_v1  ;;  %v3742_v30 = vld [vmem:[%s5424_s1 + $0xd0] sm:$0xff]   ;;  %v3744_v32 = vld [vmem:[%s5424_s1 + $0xc8] sm:$0xff]   ;;  %v3745_v33 = vld [vmem:[%s5424_s1 + $0x40] sm:$0xff]  }
   0xc   :  { %1667 = vmatprep.subr.bf16.mxu1 %v5431_v1  ;;  %v3746_v34 = vld [vmem:[%s5424_s1 + $0xc0] sm:$0xff]   ;;  %v3753_v35 = vld [vmem:[%s5424_s1 + $0x138] sm:$0xff]   ;;  %v3756_v39 = vld [vmem:[%s5423_s0 + $0x34] ss:$20 sps:$4 sm:$0xff]  }
   0xd   :  { %v3747_v36 = vld [vmem:[%s5423_s0] ss:$20 sps:$4 sm:$0xff]   ;;  %v3750_v37 = vld [vmem:[%s5423_s0 + $0x8] ss:$20 sps:$4 sm:$0xff]   ;;  %v3759_v43 = vld [vmem:[%s5423_s0 + $0x30] ss:$20 sps:$4 sm:$0xff]  }
   0xe   :  { %1379 = vmatpush1.bf16.msra.mxu0 %v3721_v7  ;;  %v3754_v38 = vld [vmem:[%s5423_s0 + $0x2c] ss:$20 sps:$4 sm:$0xff]   ;;  %v3778_v40 = vld [vmem:[%s5424_s1 + $0x130] sm:$0xff]   ;;  %v3758_v42 = vld [vmem:[%s5423_s0 + $0x28] ss:$20 sps:$4 sm:$0xff]  }
   0xf   :  { %1668 = vmatpush1.bf16.msra.mxu1 %v3722_v8  ;;  %1380 = vmatprep.subr.bf16.mxu0 %v5431_v1  ;;  %v3803_v41 = vld [vmem:[%s5424_s1 + $0x128] sm:$0xff]   ;;  %v3762_v45 = vld [vmem:[%s5423_s0 + $0x5c] ss:$20 sps:$4 sm:$0xff]   ;;  %v3828_v46 = vld [vmem:[%s5424_s1 + $0x120] sm:$0xff]  }
  0x10   :  { %1669 = vmatprep.subr.bf16.mxu1 %v5431_v1  ;;  %v3760_v44 = vld [vmem:[%s5423_s0 + $0x54] ss:$20 sps:$4 sm:$0xff]   ;;  %v3764_v47 = vld [vmem:[%s5423_s0 + $0x50] ss:$20 sps:$4 sm:$0xff]   ;;  %v3765_v48 = vld [vmem:[%s5423_s0 + $0x58] ss:$20 sps:$4 sm:$0xff]  }
  0x11   :  { %v3766_v49 = vld [vmem:[%s5423_s0 + $0x7c] ss:$20 sps:$4 sm:$0xff]   ;;  %v3768_v50 = vld [vmem:[%s5423_s0 + $0x84] ss:$20 sps:$4 sm:$0xff]   ;;  %v3771_v53 = vld [vmem:[%s5423_s0 + $0x80] ss:$20 sps:$4 sm:$0xff]  }
  0x12   :  { %1381 = vmatpush1.bf16.msra.mxu0 %v3723_v9  ;;  %v3853_v51 = vld [vmem:[%s5424_s1 + $0x118] sm:$0xff]   ;;  %v3774_v55 = vld [vmem:[%s5423_s0 + $0xac] ss:$20 sps:$4 sm:$0xff]   ;;  %v3781_v59 = vld [vmem:[%s5423_s0 + $0xd4] ss:$20 sps:$4 sm:$0xff]  }
  0x13   :  { %1670 = vmatpush1.bf16.msra.mxu1 %v3724_v10  ;;  %1382 = vmatprep.subr.bf16.mxu0 %v5431_v1  ;;  %v3770_v52 = vld [vmem:[%s5423_s0 + $0x78] ss:$20 sps:$4 sm:$0xff]   ;;  %v3776_v56 = vld [vmem:[%s5423_s0 + $0xa0] ss:$20 sps:$4 sm:$0xff]   ;;  %v3777_v57 = vld [vmem:[%s5423_s0 + $0xa8] ss:$20 sps:$4 sm:$0xff]  }
  0x14   :  { %1671 = vmatprep.subr.bf16.mxu1 %v5431_v1  ;;  %v3772_v54 = vld [vmem:[%s5423_s0 + $0xa4] ss:$20 sps:$4 sm:$0xff]   ;;  %v3779_v58 = vld [vmem:[%s5423_s0 + $0xcc] ss:$20 sps:$4 sm:$0xff]   ;;  %v3878_v60 = vld [vmem:[%s5424_s1 + $0x110] sm:$0xff]  }
  0x15   :  { %v3783_v61 = vld [vmem:[%s5423_s0 + $0xc8] ss:$20 sps:$4 sm:$0xff]   ;;  %v3784_v62 = vld [vmem:[%s5423_s0 + $0xd0] ss:$20 sps:$4 sm:$0xff]   ;;  %v3790_v3 = vld [vmem:[%s5423_s0 + $0xf8] ss:$20 sps:$4 sm:$0xff]  }
  0x16   :  { %1383 = vmatpush1.bf16.msra.mxu0 %v3725_v11  ;;  %v3785_v63 = vld [vmem:[%s5423_s0 + $0xf4] ss:$20 sps:$4 sm:$0xff]   ;;  %v3787_v0 = vld [vmem:[%s5423_s0 + $0xfc] ss:$20 sps:$4 sm:$0xff]   ;;  %v3793_v5 = vld [vmem:[%s5423_s0 + $0x124] ss:$20 sps:$4 sm:$0xff]  }
  0x17   :  { %1672 = vmatpush1.bf16.msra.mxu1 %v3726_v12  ;;  %1384 = vmatprep.subr.bf16.mxu0 %v5431_v1  ;;  %v3789_v2 = vld [vmem:[%s5423_s0 + $0xf0] ss:$20 sps:$4 sm:$0xff]   ;;  %v3795_v6 = vld [vmem:[%s5423_s0 + $0x118] ss:$20 sps:$4 sm:$0xff]   ;;  %v3796_v7 = vld [vmem:[%s5423_s0 + $0x120] ss:$20 sps:$4 sm:$0xff]  }
  0x18   :  { %1673 = vmatprep.subr.bf16.mxu1 %v5431_v1  ;;  %v3791_v4 = vld [vmem:[%s5423_s0 + $0x11c] ss:$20 sps:$4 sm:$0xff]   ;;  %v3797_v8 = vld [vmem:[%s5423_s0 + $0x144] ss:$20 sps:$4 sm:$0xff]   ;;  %v3799_v9 = vld [vmem:[%s5423_s0 + $0x14c] ss:$20 sps:$4 sm:$0xff]  }
  0x19   :  { %v3801_v10 = vld [vmem:[%s5423_s0 + $0x140] ss:$20 sps:$4 sm:$0xff]   ;;  %v3802_v11 = vld [vmem:[%s5423_s0 + $0x148] ss:$20 sps:$4 sm:$0xff]   ;;  %v3814_v19 = vld [vmem:[%s5423_s0 + $0x190] ss:$20 sps:$4 sm:$0xff]  }
  0x1a   :  { %1385 = vmatpush1.bf16.msra.mxu0 %v3727_v13  ;;  %v3804_v12 = vld [vmem:[%s5423_s0 + $0x16c] ss:$20 sps:$4 sm:$0xff]   ;;  %v3806_v13 = vld [vmem:[%s5423_s0 + $0x174] ss:$20 sps:$4 sm:$0xff]   ;;  %v3816_v21 = vld [vmem:[%s5423_s0 + $0x1bc] ss:$20 sps:$4 sm:$0xff]  }
  0x1b   :  { %1674 = vmatpush1.bf16.msra.mxu1 %v3728_v14  ;;  %1386 = vmatprep.subr.bf16.mxu0 %v5431_v1  ;;  %v3808_v14 = vld [vmem:[%s5423_s0 + $0x168] ss:$20 sps:$4 sm:$0xff]  }
  0x1c   :  { %1675 = vmatprep.subr.bf16.mxu1 %v5431_v1 }
  0x1e   :  { %1387 = vmatpush1.bf16.msra.mxu0 %v3729_v15  ;;  %v3903_v15 = vld [vmem:[%s5424_s1 + $0x108] sm:$0xff]  }
  0x1f   :  { %1676 = vmatpush1.bf16.msra.mxu1 %v3730_v16  ;;  %1388 = vmatprep.subr.bf16.mxu0 %v5431_v1  ;;  %v3809_v16 = vld [vmem:[%s5423_s0 + $0x170] ss:$20 sps:$4 sm:$0xff]  }
  0x20   :  { %1677 = vmatprep.subr.bf16.mxu1 %v5431_v1 }
  0x22   :  { %1389 = vmatpush2.bf16.msra.mxu0 %v3731_v17  ;;  %v3810_v17 = vld [vmem:[%s5423_s0 + $0x194] ss:$20 sps:$4 sm:$0xff]  }
  0x23   :  { %1678 = vmatpush2.bf16.msra.mxu1 %v3732_v18  ;;  %1390 = vmatprep.subr.bf16.mxu0 %v5431_v1  ;;  %v3812_v18 = vld [vmem:[%s5423_s0 + $0x19c] ss:$20 sps:$4 sm:$0xff]  }
  0x24   :  { %1679 = vmatprep.subr.bf16.mxu1 %v5431_v1 }
  0x26   :  { %1391 = vmatpush2.bf16.msra.mxu0 %v3733_v20  ;;  %v3815_v20 = vld [vmem:[%s5423_s0 + $0x198] ss:$20 sps:$4 sm:$0xff]  }
  0x27   :  { %1680 = vmatpush2.bf16.msra.mxu1 %v3734_v22  ;;  %1392 = vmatprep.subr.bf16.mxu0 %v5431_v1  ;;  %v3818_v22 = vld [vmem:[%s5423_s0 + $0x1c4] ss:$20 sps:$4 sm:$0xff]  }
  0x28   :  { %1681 = vmatprep.subr.bf16.mxu1 %v5431_v1 }
  0x2a   :  { %1393 = vmatpush2.bf16.msra.mxu0 %v3735_v23 }
  0x2b   :  { %1682 = vmatpush2.bf16.msra.mxu1 %v3736_v24  ;;  %1394 = vmatprep.subr.bf16.mxu0 %v5431_v1 }
  0x2c   :  { %1683 = vmatprep.subr.bf16.mxu1 %v5431_v1 }
  0x2e   :  { %1395 = vmatpush2.bf16.msra.mxu0 %v3737_v25 }
  0x2f   :  { %1684 = vmatpush2.bf16.msra.mxu1 %v3738_v26  ;;  %1396 = vmatprep.subr.bf16.mxu0 %v5431_v1 }
  0x30   :  { %1685 = vmatprep.subr.bf16.mxu1 %v5431_v1 }
  0x32   :  { %1397 = vmatpush2.bf16.msra.mxu0 %v3739_v27 }
  0x33   :  { %1686 = vmatpush2.bf16.msra.mxu1 %v3740_v28  ;;  %1398 = vmatprep.subr.bf16.mxu0 %v5431_v1 }
  0x34   :  { %1687 = vmatprep.subr.bf16.mxu1 %v5431_v1 }
  0x36   :  { %1399 = vmatpush2.bf16.msra.mxu0 %v3741_v29 }
  0x37   :  { %1688 = vmatpush2.bf16.msra.mxu1 %v3742_v30  ;;  %1400 = vmatprep.subr.bf16.mxu0 %v5431_v1 }
  0x38   :  { %1689 = vmatprep.subr.bf16.mxu1 %v5431_v1 }
  0x3a   :  { %1401 = vmatpush2.bf16.msra.mxu0 %v3743_v31 }
  0x3b   :  { %1690 = vmatpush2.bf16.msra.mxu1 %v3744_v32  ;;  %1402 = vmatprep.subr.bf16.mxu0 %v5431_v1 }
  0x3c   :  { %1691 = vmatprep.subr.bf16.mxu1 %v5431_v1 }
  0x3e   :  { %1403 = vmatpush2.bf16.msra.mxu0 %v3745_v33 }
  0x3f   :  { %1692 = vmatpush2.bf16.msra.mxu1 %v3746_v34  ;;  %3611 = vmatprep.subr.bf16.mxu0 %v3753_v35 }
  0x41   :  { %1405 = vmatmul.mubr.bf16.vlgmr.msra.gmra.mxu0 %v3747_v36 }
  0x42   :  { %1694 = vmatmul.mubr.bf16.vlgmr.msra.gmra.mxu1 %v3750_v37  ;;  %3612 = vmatpush3.bf16.msra.mxu0 %v3753_v35 }
  0x43   :  { %1412 = vmatprep.mubr.bf16.mxu0 %v3754_v38  ;;  %1701 = vmatprep.mubr.bf16.mxu1 %v3756_v39 }
  0x44   :  { %3613 = vmatprep.subr.bf16.mxu0 %v3778_v40 }
  0x46   :  { %3614 = vmatpush3.bf16.msra.mxu0 %v3778_v40 }
  0x47   :  { %3615 = vmatprep.subr.bf16.mxu0 %v3803_v41 }
  0x49   :  { %1413 = vmatmul.mubr.bf16.gmra.mxu0 %v3758_v42 }
  0x4a   :  { %1702 = vmatmul.mubr.bf16.gmra.mxu1 %v3759_v43  ;;  %1420 = vmatprep.mubr.bf16.mxu0 %v3760_v44 }
  0x4b   :  { %1709 = vmatprep.mubr.bf16.mxu1 %v3762_v45  ;;  %3616 = vmatpush3.bf16.msra.mxu0 %v3803_v41 }
  0x4c   :  { %3617 = vmatprep.subr.bf16.mxu0 %v3828_v46 }
  0x4f   :  { %3618 = vmatpush3.bf16.msra.mxu0 %v3828_v46 }
  0x50   :  { %3619 = vmatprep.subr.bf16.mxu0 %v3853_v51 }
  0x51   :  { %1421 = vmatmul.mubr.bf16.gmra.mxu0 %v3764_v47 }
  0x52   :  { %1710 = vmatmul.mubr.bf16.gmra.mxu1 %v3765_v48  ;;  %1428 = vmatprep.mubr.bf16.mxu0 %v3766_v49 }
  0x53   :  { %1717 = vmatprep.mubr.bf16.mxu1 %v3768_v50  ;;  %3620 = vmatpush3.bf16.msra.mxu0 %v3853_v51 }
  0x54   :  { %3621 = vmatprep.subr.bf16.mxu0 %v3878_v60 }
  0x57   :  { %3622 = vmatpush3.bf16.msra.mxu0 %v3878_v60 }
  0x58   :  { %3623 = vmatprep.subr.bf16.mxu0 %v3903_v15 }
  0x59   :  { %1429 = vmatmul.mubr.bf16.gmra.mxu0 %v3770_v52 }
  0x5a   :  { %1718 = vmatmul.mubr.bf16.gmra.mxu1 %v3771_v53  ;;  %1436 = vmatprep.mubr.bf16.mxu0 %v3772_v54 }
  0x5b   :  { %1725 = vmatprep.mubr.bf16.mxu1 %v3774_v55  ;;  %3624 = vmatpush3.bf16.msra.mxu0 %v3903_v15 }
  0x61   :  { %1437 = vmatmul.mubr.bf16.gmra.mxu0 %v3776_v56 }
  0x62   :  { %1726 = vmatmul.mubr.bf16.gmra.mxu1 %v3777_v57  ;;  %1444 = vmatprep.mubr.bf16.mxu0 %v3779_v58 }
  0x63   :  { %1733 = vmatprep.mubr.bf16.mxu1 %v3781_v59 }
  0x69   :  { %1445 = vmatmul.mubr.bf16.gmra.mxu0 %v3783_v61 }
  0x6a   :  { %1734 = vmatmul.mubr.bf16.gmra.mxu1 %v3784_v62  ;;  %1452 = vmatprep.mubr.bf16.mxu0 %v3785_v63 }
  0x6b   :  { %1741 = vmatprep.mubr.bf16.mxu1 %v3787_v0 }
  0x71   :  { %1453 = vmatmul.mubr.bf16.gmra.mxu0 %v3789_v2 }
  0x72   :  { %1742 = vmatmul.mubr.bf16.gmra.mxu1 %v3790_v3  ;;  %1460 = vmatprep.mubr.bf16.mxu0 %v3791_v4 }
  0x73   :  { %1749 = vmatprep.mubr.bf16.mxu1 %v3793_v5 }
  0x79   :  { %1461 = vmatmul.mubr.bf16.gmra.mxu0 %v3795_v6 }
  0x7a   :  { %1750 = vmatmul.mubr.bf16.gmra.mxu1 %v3796_v7  ;;  %1468 = vmatprep.mubr.bf16.mxu0 %v3797_v8 }
  0x7b   :  { %1757 = vmatprep.mubr.bf16.mxu1 %v3799_v9 }
  0x81   :  { %1469 = vmatmul.mubr.bf16.gmra.mxu0 %v3801_v10 }
  0x82   :  { %1758 = vmatmul.mubr.bf16.gmra.mxu1 %v3802_v11  ;;  %1476 = vmatprep.mubr.bf16.mxu0 %v3804_v12 }
  0x83   :  { %1765 = vmatprep.mubr.bf16.mxu1 %v3806_v13 }
  0x89   :  { %1477 = vmatmul.mubr.bf16.gmra.mxu0 %v3808_v14 }
  0x8a   :  { %1766 = vmatmul.mubr.bf16.gmra.mxu1 %v3809_v16  ;;  %1484 = vmatprep.mubr.bf16.mxu0 %v3810_v17 }
  0x8b   :  { %1773 = vmatprep.mubr.bf16.mxu1 %v3812_v18 }
  0x91   :  { %1485 = vmatmul.mubr.bf16.gmra.mxu0 %v3814_v19 }
  0x92   :  { %12 = vsyncpa [#allocation3], 0  ;;  %1774 = vmatmul.mubr.bf16.gmra.mxu1 %v3815_v20  ;;  %1492 = vmatprep.mubr.bf16.mxu0 %v3816_v21  ;;  %v3820_v23 = vld [vmem:[%s5423_s0 + $0x1b8] ss:$20 sps:$4 sm:$0xff]   ;;  %v3821_v24 = vld [vmem:[%s5423_s0 + $0x1c0] ss:$20 sps:$4 sm:$0xff]  }
  0x93   :  { %1781 = vmatprep.mubr.bf16.mxu1 %v3818_v22  ;;  %v3822_v25 = vld [vmem:[%s5423_s0 + $0x1e4] ss:$20 sps:$4 sm:$0xff]   ;;  %v3824_v26 = vld [vmem:[%s5423_s0 + $0x1ec] ss:$20 sps:$4 sm:$0xff]   ;;  %v3827_v28 = vld [vmem:[%s5423_s0 + $0x1e8] ss:$20 sps:$4 sm:$0xff]  }
  0x94   :  { %v3826_v27 = vld [vmem:[%s5423_s0 + $0x1e0] ss:$20 sps:$4 sm:$0xff]   ;;  %v3833_v32 = vld [vmem:[%s5423_s0 + $0x208] ss:$20 sps:$4 sm:$0xff]   ;;  %v3834_v33 = vld [vmem:[%s5423_s0 + $0x210] ss:$20 sps:$4 sm:$0xff]  }
  0x95   :  { %v3829_v29 = vld [vmem:[%s5423_s0 + $0x20c] ss:$20 sps:$4 sm:$0xff]   ;;  %v3831_v30 = vld [vmem:[%s5423_s0 + $0x214] ss:$20 sps:$4 sm:$0xff]   ;;  %v3837_v35 = vld [vmem:[%s5423_s0 + $0x23c] ss:$20 sps:$4 sm:$0xff]  }
  0x96   :  { %v3928_v31 = vld [vmem:[%s5424_s1 + $0x100] sm:$0xff]   ;;  %v3835_v34 = vld [vmem:[%s5423_s0 + $0x234] ss:$20 sps:$4 sm:$0xff]   ;;  %v3840_v37 = vld [vmem:[%s5423_s0 + $0x238] ss:$20 sps:$4 sm:$0xff]   ;;  %vm2430_vm0 = vcmask 130048  }
  0x97   :  { %3625 = vmatprep.subr.bf16.mxu0 %v3928_v31  ;;  %v3839_v36 = vld [vmem:[%s5423_s0 + $0x230] ss:$20 sps:$4 sm:$0xff]   ;;  %v3845_v40 = vld [vmem:[%s5423_s0 + $0x258] ss:$20 sps:$4 sm:$0xff]   ;;  %v3846_v41 = vld [vmem:[%s5423_s0 + $0x260] ss:$20 sps:$4 sm:$0xff]  }
  0x98   :  { %3626 = vmatpush3.bf16.msra.mxu0 %v3928_v31  ;;  %v3841_v38 = vld [vmem:[%s5423_s0 + $0x25c] ss:$20 sps:$4 sm:$0xff]   ;;  %v3843_v39 = vld [vmem:[%s5423_s0 + $0x264] ss:$20 sps:$4 sm:$0xff]   ;;  %v3849_v43 = vld [vmem:[%s5423_s0 + $0x28c] ss:$20 sps:$4 sm:$0xff]  }
  0x99   :  { %1493 = vmatmul.mubr.bf16.gmra.mxu0 %v3820_v23  ;;  %v3847_v42 = vld [vmem:[%s5423_s0 + $0x284] ss:$20 sps:$4 sm:$0xff]   ;;  %v3851_v44 = vld [vmem:[%s5423_s0 + $0x280] ss:$20 sps:$4 sm:$0xff]   ;;  %v3852_v45 = vld [vmem:[%s5423_s0 + $0x288] ss:$20 sps:$4 sm:$0xff]  }
  0x9a   :  { %1782 = vmatmul.mubr.bf16.gmra.mxu1 %v3821_v24  ;;  %1500 = vmatprep.mubr.bf16.mxu0 %v3822_v25  ;;  %v3854_v46 = vld [vmem:[%s5423_s0 + $0x2ac] ss:$20 sps:$4 sm:$0xff]   ;;  %v3856_v47 = vld [vmem:[%s5423_s0 + $0x2b4] ss:$20 sps:$4 sm:$0xff]   ;;  %v3859_v49 = vld [vmem:[%s5423_s0 + $0x2b0] ss:$20 sps:$4 sm:$0xff]  }
  0x9b   :  { %1789 = vmatprep.mubr.bf16.mxu1 %v3824_v26  ;;  %v3858_v48 = vld [vmem:[%s5423_s0 + $0x2a8] ss:$20 sps:$4 sm:$0xff]   ;;  %v3864_v52 = vld [vmem:[%s5423_s0 + $0x2d0] ss:$20 sps:$4 sm:$0xff]   ;;  %v3865_v53 = vld [vmem:[%s5423_s0 + $0x2d8] ss:$20 sps:$4 sm:$0xff]  }
  0x9c   :  { %v3860_v50 = vld [vmem:[%s5423_s0 + $0x2d4] ss:$20 sps:$4 sm:$0xff]   ;;  %v3862_v51 = vld [vmem:[%s5423_s0 + $0x2dc] ss:$20 sps:$4 sm:$0xff]   ;;  %v3868_v55 = vld [vmem:[%s5423_s0 + $0x304] ss:$20 sps:$4 sm:$0xff]  }
  0x9d   :  { %v3866_v54 = vld [vmem:[%s5423_s0 + $0x2fc] ss:$20 sps:$4 sm:$0xff]   ;;  %v3870_v56 = vld [vmem:[%s5423_s0 + $0x2f8] ss:$20 sps:$4 sm:$0xff]   ;;  %v3871_v57 = vld [vmem:[%s5423_s0 + $0x300] ss:$20 sps:$4 sm:$0xff]  }
  0x9e   :  { %v3872_v58 = vld [vmem:[%s5423_s0 + $0x324] ss:$20 sps:$4 sm:$0xff]   ;;  %v3874_v59 = vld [vmem:[%s5423_s0 + $0x32c] ss:$20 sps:$4 sm:$0xff]   ;;  %v3877_v61 = vld [vmem:[%s5423_s0 + $0x328] ss:$20 sps:$4 sm:$0xff]  }
  0x9f   :  { %v3876_v60 = vld [vmem:[%s5423_s0 + $0x320] ss:$20 sps:$4 sm:$0xff]   ;;  %v3883_v0 = vld [vmem:[%s5423_s0 + $0x348] ss:$20 sps:$4 sm:$0xff]   ;;  %v3884_v2 = vld [vmem:[%s5423_s0 + $0x350] ss:$20 sps:$4 sm:$0xff]  }
  0xa0   :  { %v3879_v62 = vld [vmem:[%s5423_s0 + $0x34c] ss:$20 sps:$4 sm:$0xff]   ;;  %v3881_v63 = vld [vmem:[%s5423_s0 + $0x354] ss:$20 sps:$4 sm:$0xff]   ;;  %v3887_v4 = vld [vmem:[%s5423_s0 + $0x37c] ss:$20 sps:$4 sm:$0xff]  }
  0xa1   :  { %1501 = vmatmul.mubr.bf16.gmra.mxu0 %v3826_v27  ;;  %v3885_v3 = vld [vmem:[%s5423_s0 + $0x374] ss:$20 sps:$4 sm:$0xff]   ;;  %v3889_v5 = vld [vmem:[%s5423_s0 + $0x370] ss:$20 sps:$4 sm:$0xff]   ;;  %v3890_v6 = vld [vmem:[%s5423_s0 + $0x378] ss:$20 sps:$4 sm:$0xff]  }
  0xa2   :  { %1790 = vmatmul.mubr.bf16.gmra.mxu1 %v3827_v28  ;;  %1508 = vmatprep.mubr.bf16.mxu0 %v3829_v29  ;;  %v3891_v7 = vld [vmem:[%s5423_s0 + $0x39c] ss:$20 sps:$4 sm:$0xff]   ;;  %v3893_v8 = vld [vmem:[%s5423_s0 + $0x3a4] ss:$20 sps:$4 sm:$0xff]   ;;  %v3896_v14 = vld [vmem:[%s5423_s0 + $0x3a0] ss:$20 sps:$4 sm:$0xff]  }
  0xa3   :  { %1797 = vmatprep.mubr.bf16.mxu1 %v3831_v30  ;;  %v2334_v9 = vld [vmem:[%s5426_s3] sm:$0xff]  ;;  %v3895_v11 = vld [vmem:[%s5423_s0 + $0x398] ss:$20 sps:$4 sm:$0xff]   ;;  %v3902_v18 = vld [vmem:[%s5423_s0 + $0x3c8] ss:$20 sps:$4 sm:$0xff]   ;;  %vm4011_vm1 = vmmov 0  }
  0xa4   :  { %v2342_v10 = vld [vmem:[%s5426_s3 + $0x40] sm:$0xff]  ;;  %v3906_v20 = vld [vmem:[%s5423_s0 + $0x3f4] ss:$20 sps:$4 sm:$0xff]   ;;  %s4012_s24 = smov [#allocation2]   ;;  %vm3255_vm2 = vcmask 9216  }
  0xa5   :  { %v3472_v12 = vcombine.low %v2334_v9, %v2342_v10  ;;  %v3473_v13 = vcombine.high %v2334_v9, %v2342_v10  ;;  %v3897_v15 = vld [vmem:[%s5423_s0 + $0x3c4] ss:$20 sps:$4 sm:$0xff]   ;;  %v3899_v16 = vld [vmem:[%s5423_s0 + $0x3cc] ss:$20 sps:$4 sm:$0xff]   ;;  %v3908_v27 = vld [vmem:[%s5423_s0 + $0x3e8] ss:$20 sps:$4 sm:$0xff]  }
  0xa6   :  { %v3901_v17 = vld [vmem:[%s5423_s0 + $0x3c0] ss:$20 sps:$4 sm:$0xff]   ;;  %v3909_v29 = vld [vmem:[%s5423_s0 + $0x3f0] ss:$20 sps:$4 sm:$0xff]   ;;  %s3263_s25 = sshll.u32 %s4012_s24, 4  ;;  %s3264_s25 = int_to_ptr.vmem [resolvable:$true] %s3263_s25 }
  0xa7   :  { %2469 = vmatprep.subr.bf16.mxu1 %v3473_v13  ;;  %v3904_v19 = vld [vmem:[%s5423_s0 + $0x3ec] ss:$20 sps:$4 sm:$0xff]   ;;  %v3910_v30 = vld [vmem:[%s5423_s0 + $0x414] ss:$20 sps:$4 sm:$0xff]   ;;  %s3987_s26 = scalar_lea.vmem %s3264_s25, 32  ;;  %p3992_p1 = scmp.lt.s32.totalorder %s3264_s25, %s3264_s25 }
  0xa8   :  { %2470 = vmatpush1.bf16.msra.mxu1 %v3472_v12  ;;  %v3931_v9 = vld [vmem:[%s5423_s0 + $0x48c] ss:$20 sps:$4 sm:$0xff]   ;;  %v3934_v12 = vld [vmem:[%s5423_s0 + $0x494] ss:$20 sps:$4 sm:$0xff]   ;;  %p3988_p0 = scmp.ne.s32.totalorder %s3264_s25, %s3987_s26  ;;  %p3993_p2 = scmp.lt.s32.totalorder %s3987_s26, %s3987_s26 }
  0xa9   :  { %1509 = vmatmul.mubr.bf16.gmra.mxu0 %v3833_v32 }
  0xaa   :  { %1798 = vmatmul.mubr.bf16.gmra.mxu1 %v3834_v33  ;;  %1516 = vmatprep.mubr.bf16.mxu0 %v3835_v34  ;;  %v3912_v33 = vld [vmem:[%s5423_s0 + $0x41c] ss:$20 sps:$4 sm:$0xff]   ;;  %p3994_p3 = por %p3993_p2, %p3992_p1 }
  0xab   :  { %1805 = vmatprep.mubr.bf16.mxu1 %v3837_v35 }
  0xac   :  { %p3995_p4 = pnand %p3994_p3, %p3988_p0 }
  0xb1   :  { %1517 = vmatmul.mubr.bf16.gmra.mxu0 %v3839_v36 }
  0xb2   :  { %1806 = vmatmul.mubr.bf16.gmra.mxu1 %v3840_v37  ;;  %1524 = vmatprep.mubr.bf16.mxu0 %v3841_v38 }
  0xb3   :  { %1813 = vmatprep.mubr.bf16.mxu1 %v3843_v39 }
  0xb9   :  { %1525 = vmatmul.mubr.bf16.gmra.mxu0 %v3845_v40 }
  0xba   :  { %1814 = vmatmul.mubr.bf16.gmra.mxu1 %v3846_v41  ;;  %1532 = vmatprep.mubr.bf16.mxu0 %v3847_v42  ;;  %v3914_v41 = vld [vmem:[%s5423_s0 + $0x410] ss:$20 sps:$4 sm:$0xff]  }
  0xbb   :  { %1821 = vmatprep.mubr.bf16.mxu1 %v3849_v43  ;;  %v3915_v43 = vld [vmem:[%s5423_s0 + $0x418] ss:$20 sps:$4 sm:$0xff]  }
  0xc1   :  { %1533 = vmatmul.mubr.bf16.gmra.mxu0 %v3851_v44  ;;  %v3916_v44 = vld [vmem:[%s5423_s0 + $0x43c] ss:$20 sps:$4 sm:$0xff]  }
  0xc2   :  { %1822 = vmatmul.mubr.bf16.gmra.mxu1 %v3852_v45  ;;  %1540 = vmatprep.mubr.bf16.mxu0 %v3854_v46 }
  0xc3   :  { %1829 = vmatprep.mubr.bf16.mxu1 %v3856_v47  ;;  %v3918_v47 = vld [vmem:[%s5423_s0 + $0x444] ss:$20 sps:$4 sm:$0xff]  }
  0xc9   :  { %1541 = vmatmul.mubr.bf16.gmra.mxu0 %v3858_v48 }
  0xca   :  { %1830 = vmatmul.mubr.bf16.gmra.mxu1 %v3859_v49  ;;  %1548 = vmatprep.mubr.bf16.mxu0 %v3860_v50 }
  0xcb   :  { %1837 = vmatprep.mubr.bf16.mxu1 %v3862_v51 }
  0xd1   :  { %1549 = vmatmul.mubr.bf16.gmra.mxu0 %v3864_v52 }
  0xd2   :  { %1838 = vmatmul.mubr.bf16.gmra.mxu1 %v3865_v53  ;;  %1556 = vmatprep.mubr.bf16.mxu0 %v3866_v54 }
  0xd3   :  { %1845 = vmatprep.mubr.bf16.mxu1 %v3868_v55  ;;  %v3920_v55 = vld [vmem:[%s5423_s0 + $0x438] ss:$20 sps:$4 sm:$0xff]  }
  0xd9   :  { %1557 = vmatmul.mubr.bf16.gmra.mxu0 %v3870_v56 }
  0xda   :  { %1846 = vmatmul.mubr.bf16.gmra.mxu1 %v3871_v57  ;;  %1564 = vmatprep.mubr.bf16.mxu0 %v3872_v58  ;;  %v3921_v57 = vld [vmem:[%s5423_s0 + $0x440] ss:$20 sps:$4 sm:$0xff]   ;;  %v3924_v58 = vld [vmem:[%s5423_s0 + $0x464] ss:$20 sps:$4 sm:$0xff]  }
  0xdb   :  { %1853 = vmatprep.mubr.bf16.mxu1 %v3874_v59 }
  0xe1   :  { %1565 = vmatmul.mubr.bf16.gmra.mxu0 %v3876_v60 }
  0xe2   :  { %1854 = vmatmul.mubr.bf16.gmra.mxu1 %v3877_v61  ;;  %1572 = vmatprep.mubr.bf16.mxu0 %v3879_v62  ;;  %v3927_v61 = vld [vmem:[%s5423_s0 + $0x46c] ss:$20 sps:$4 sm:$0xff]  }
  0xe3   :  { %1861 = vmatprep.mubr.bf16.mxu1 %v3881_v63 }
  0xe9   :  { %1573 = vmatmul.mubr.bf16.gmra.mxu0 %v3883_v0 }
  0xea   :  { %1862 = vmatmul.mubr.bf16.gmra.mxu1 %v3884_v2  ;;  %1580 = vmatprep.mubr.bf16.mxu0 %v3885_v3 }
  0xeb   :  { %1869 = vmatprep.mubr.bf16.mxu1 %v3887_v4 }
  0xf1   :  { %1581 = vmatmul.mubr.bf16.gmra.mxu0 %v3889_v5 }
  0xf2   :  { %1870 = vmatmul.mubr.bf16.gmra.mxu1 %v3890_v6  ;;  %1588 = vmatprep.mubr.bf16.mxu0 %v3891_v7  ;;  %v3922_v6 = vld [vmem:[%s5423_s0 + $0x460] ss:$20 sps:$4 sm:$0xff]  }
  0xf3   :  { %1877 = vmatprep.mubr.bf16.mxu1 %v3893_v8  ;;  %v3925_v8 = vld [vmem:[%s5423_s0 + $0x468] ss:$20 sps:$4 sm:$0xff]  }
  0xf9   :  { %1589 = vmatmul.mubr.bf16.gmra.mxu0 %v3895_v11 }
  0xfa   :  { %1878 = vmatmul.mubr.bf16.gmra.mxu1 %v3896_v14  ;;  %1596 = vmatprep.mubr.bf16.mxu0 %v3897_v15 }
  0xfb   :  { %1885 = vmatprep.mubr.bf16.mxu1 %v3899_v16 }
 0x101   :  { %v1406_v21 = vpop.f32.mrf.mxu0  ;;  %1597 = vmatmul.mubr.bf16.gmra.mxu0 %v3901_v17 }
 0x102   :  { %v1695_v22 = vpop.f32.mrf.mxu1  ;;  %1886 = vmatmul.mubr.bf16.gmra.mxu1 %v3902_v18  ;;  %1604 = vmatprep.mubr.bf16.mxu0 %v3904_v19 }
 0x103   :  { %v4517_v23 = vadd.f32 %v1695_v22, %v1406_v21  ;;  %v1408_v24 = vpop.f32.mrf.mxu0  ;;  %1893 = vmatprep.mubr.bf16.mxu1 %v3906_v20  ;;  %v3929_v20 = vld [vmem:[%s5423_s0 + $0x488] ss:$20 sps:$4 sm:$0xff]   ;;  %v3932_v22 = vld [vmem:[%s5423_s0 + $0x490] ss:$20 sps:$4 sm:$0xff]  }
 0x104   :  { %v1697_v25 = vpop.f32.mrf.mxu1  ;;  %v3937_v24 = vld [vmem:[%s5423_s0 + $0x4b4] ss:$20 sps:$4 sm:$0xff]  }
 0x105   :  { %v1409_v26 = vpop.f32.mrf.mxu0 }
 0x106   :  { %v1698_v28 = vpop.f32.mrf.mxu1 }
 0x107   :  { %v4528_v31 = vadd.f32 %v1698_v28, %v1409_v26  ;;  %v1411_v32 = vpop.f32.mrf.mxu0 }
 0x108   :  { %v1700_v34 = vpop.f32.mrf.mxu1 }
 0x109   :  { %v1414_v35 = vpop.f32.mrf.mxu0  ;;  %1605 = vmatmul.mubr.bf16.gmra.mxu0 %v3908_v27  ;;  %v3940_v27 = vld [vmem:[%s5423_s0 + $0x4bc] ss:$20 sps:$4 sm:$0xff]  }
 0x10a   :  { %v1703_v36 = vpop.f32.mrf.mxu1  ;;  %1894 = vmatmul.mubr.bf16.gmra.mxu1 %v3909_v29  ;;  %1612 = vmatprep.mubr.bf16.mxu0 %v3910_v30 }
 0x10b   :  { %v4533_v37 = vadd.f32 %v1703_v36, %v1414_v35  ;;  %v1416_v38 = vpop.f32.mrf.mxu0  ;;  %1901 = vmatprep.mubr.bf16.mxu1 %v3912_v33  ;;  %v3935_v36 = vld [vmem:[%s5423_s0 + $0x4b0] ss:$20 sps:$4 sm:$0xff]  }
 0x10c   :  { %v1705_v39 = vpop.f32.mrf.mxu1 }
 0x10d   :  { %v1417_v40 = vpop.f32.mrf.mxu0  ;;  %v3938_v39 = vld [vmem:[%s5423_s0 + $0x4b8] ss:$20 sps:$4 sm:$0xff]  }
 0x10e   :  { %v1706_v42 = vpop.f32.mrf.mxu1 }
 0x10f   :  { %v4544_v45 = vadd.f32 %v1706_v42, %v1417_v40  ;;  %v1419_v46 = vpop.f32.mrf.mxu0  ;;  %v3943_v40 = vld [vmem:[%s5423_s0 + $0x4dc] ss:$20 sps:$4 sm:$0xff]  }
 0x110   :  { %v1708_v48 = vpop.f32.mrf.mxu1 }
 0x111   :  { %v1422_v49 = vpop.f32.mrf.mxu0  ;;  %1613 = vmatmul.mubr.bf16.gmra.mxu0 %v3914_v41 }
 0x112   :  { %v1711_v50 = vpop.f32.mrf.mxu1  ;;  %1902 = vmatmul.mubr.bf16.gmra.mxu1 %v3915_v43  ;;  %1620 = vmatprep.mubr.bf16.mxu0 %v3916_v44  ;;  %v3946_v43 = vld [vmem:[%s5423_s0 + $0x4e4] ss:$20 sps:$4 sm:$0xff]  }
 0x113   :  { %v4549_v51 = vadd.f32 %v1711_v50, %v1422_v49  ;;  %v1424_v52 = vpop.f32.mrf.mxu0  ;;  %1909 = vmatprep.mubr.bf16.mxu1 %v3918_v47 }
 0x114   :  { %v1713_v53 = vpop.f32.mrf.mxu1 }
 0x115   :  { %v1425_v54 = vpop.f32.mrf.mxu0  ;;  %v3941_v53 = vld [vmem:[%s5423_s0 + $0x4d8] ss:$20 sps:$4 sm:$0xff]  }
 0x116   :  { %v1714_v56 = vpop.f32.mrf.mxu1 }
 0x117   :  { %v4560_v59 = vadd.f32 %v1714_v56, %v1425_v54  ;;  %v1427_v60 = vpop.f32.mrf.mxu0  ;;  %v3947_v56 = vld [vmem:[%s5423_s0 + $0x10] ss:$20 sps:$4 sm:$0xff]  }
 0x118   :  { %v1716_v62 = vpop.f32.mrf.mxu1 }
 0x119   :  { %v1430_v63 = vpop.f32.mrf.mxu0  ;;  %1621 = vmatmul.mubr.bf16.gmra.mxu0 %v3920_v55  ;;  %v3944_v55 = vld [vmem:[%s5423_s0 + $0x4e0] ss:$20 sps:$4 sm:$0xff]  }
 0x11a   :  { %v1719_v0 = vpop.f32.mrf.mxu1  ;;  %1910 = vmatmul.mubr.bf16.gmra.mxu1 %v3921_v57  ;;  %1628 = vmatprep.mubr.bf16.mxu0 %v3924_v58 }
 0x11b   :  { %v4565_v2 = vadd.f32 %v1719_v0, %v1430_v63  ;;  %v1432_v3 = vpop.f32.mrf.mxu0  ;;  %1917 = vmatprep.mubr.bf16.mxu1 %v3927_v61 }
 0x11c   :  { %v1721_v4 = vpop.f32.mrf.mxu1 }
 0x11d   :  { %v1433_v5 = vpop.f32.mrf.mxu0 }
 0x11e   :  { %v1722_v7 = vpop.f32.mrf.mxu1 }
 0x11f   :  { %v4576_v10 = vadd.f32 %v1722_v7, %v1433_v5  ;;  %v1435_v11 = vpop.f32.mrf.mxu0  ;;  %v3948_v5 = vld [vmem:[%s5423_s0 + $0x38] ss:$20 sps:$4 sm:$0xff]   ;;  %v3949_v7 = vld [vmem:[%s5423_s0 + $0x60] ss:$20 sps:$4 sm:$0xff]  }
 0x120   :  { %v1724_v13 = vpop.f32.mrf.mxu1 }
 0x121   :  { %v1438_v14 = vpop.f32.mrf.mxu0  ;;  %1629 = vmatmul.mubr.bf16.gmra.mxu0 %v3922_v6 }
 0x122   :  { %v1727_v15 = vpop.f32.mrf.mxu1  ;;  %1918 = vmatmul.mubr.bf16.gmra.mxu1 %v3925_v8  ;;  %1636 = vmatprep.mubr.bf16.mxu0 %v3931_v9 }
 0x123   :  { %v4581_v16 = vadd.f32 %v1727_v15, %v1438_v14  ;;  %v1440_v17 = vpop.f32.mrf.mxu0  ;;  %1925 = vmatprep.mubr.bf16.mxu1 %v3934_v12 }
 0x124   :  { %v1729_v18 = vpop.f32.mrf.mxu1 }
 0x125   :  { %v1441_v19 = vpop.f32.mrf.mxu0 }
 0x126   :  { %v1730_v21 = vpop.f32.mrf.mxu1 }
 0x127   :  { %v4592_v25 = vadd.f32 %v1730_v21, %v1441_v19  ;;  %v1443_v26 = vpop.f32.mrf.mxu0  ;;  %v3950_v19 = vld [vmem:[%s5423_s0 + $0x88] ss:$20 sps:$4 sm:$0xff]   ;;  %v3951_v21 = vld [vmem:[%s5423_s0 + $0xb0] ss:$20 sps:$4 sm:$0xff]  }
 0x128   :  { %v1732_v28 = vpop.f32.mrf.mxu1 }
 0x129   :  { %v1446_v29 = vpop.f32.mrf.mxu0  ;;  %1637 = vmatmul.mubr.bf16.gmra.mxu0 %v3929_v20 }
 0x12a   :  { %v1735_v30 = vpop.f32.mrf.mxu1  ;;  %1926 = vmatmul.mubr.bf16.gmra.mxu1 %v3932_v22  ;;  %1644 = vmatprep.mubr.bf16.mxu0 %v3937_v24 }
 0x12b   :  { %v4597_v32 = vadd.f32 %v1735_v30, %v1446_v29  ;;  %v1448_v33 = vpop.f32.mrf.mxu0  ;;  %1933 = vmatprep.mubr.bf16.mxu1 %v3940_v27 }
 0x12c   :  { %v1737_v34 = vpop.f32.mrf.mxu1 }
 0x12d   :  { %v1449_v35 = vpop.f32.mrf.mxu0 }
 0x12e   :  { %v1738_v38 = vpop.f32.mrf.mxu1 }
 0x12f   :  { %v4608_v41 = vadd.f32 %v1738_v38, %v1449_v35  ;;  %v1451_v42 = vpop.f32.mrf.mxu0  ;;  %v3952_v35 = vld [vmem:[%s5423_s0 + $0xd8] ss:$20 sps:$4 sm:$0xff]   ;;  %v3953_v38 = vld [vmem:[%s5423_s0 + $0x100] ss:$20 sps:$4 sm:$0xff]  }
 0x130   :  { %v1740_v44 = vpop.f32.mrf.mxu1 }
 0x131   :  { %v1454_v46 = vpop.f32.mrf.mxu0  ;;  %1645 = vmatmul.mubr.bf16.gmra.mxu0 %v3935_v36 }
 0x132   :  { %v1743_v47 = vpop.f32.mrf.mxu1  ;;  %1934 = vmatmul.mubr.bf16.gmra.mxu1 %v3938_v39  ;;  %1652 = vmatprep.mubr.bf16.mxu0 %v3943_v40 }
 0x133   :  { %v4613_v48 = vadd.f32 %v1743_v47, %v1454_v46  ;;  %v1456_v49 = vpop.f32.mrf.mxu0  ;;  %1941 = vmatprep.mubr.bf16.mxu1 %v3946_v43 }
 0x134   :  { %v1745_v50 = vpop.f32.mrf.mxu1 }
 0x135   :  { %v1457_v52 = vpop.f32.mrf.mxu0 }
 0x136   :  { %v1746_v54 = vpop.f32.mrf.mxu1 }
 0x137   :  { %v4624_v57 = vadd.f32 %v1746_v54, %v1457_v52  ;;  %v1459_v58 = vpop.f32.mrf.mxu0  ;;  %v3954_v52 = vld [vmem:[%s5423_s0 + $0x128] ss:$20 sps:$4 sm:$0xff]   ;;  %v3955_v54 = vld [vmem:[%s5423_s0 + $0x150] ss:$20 sps:$4 sm:$0xff]  }
 0x138   :  { %v1748_v60 = vpop.f32.mrf.mxu1 }
 0x139   :  { %v1462_v61 = vpop.f32.mrf.mxu0  ;;  %1653 = vmatmul.mubr.bf16.gmra.mxu0 %v3941_v53 }
 0x13a   :  { %v1751_v62 = vpop.f32.mrf.mxu1  ;;  %1942 = vmatmul.mubr.bf16.gmra.mxu1 %v3944_v55  ;;  %3627 = vmatprep.mubr.bf16.mxu0 %v3947_v56 }
 0x13b   :  { %v4626_v63 = vadd.f32 %v1751_v62, %v1462_v61  ;;  %v1464_v0 = vpop.f32.mrf.mxu0  ;;  %2487 = vmatprep.mubr.bf16.mxu1 %v5431_v1 }
 0x13c   :  { %v1753_v3 = vpop.f32.mrf.mxu1 }
 0x13d   :  { %v1465_v4 = vpop.f32.mrf.mxu0 }
 0x13e   :  { %v1754_v6 = vpop.f32.mrf.mxu1 }
 0x13f   :  { %v4635_v8 = vadd.f32 %v1754_v6, %v1465_v4  ;;  %v1467_v9 = vpop.f32.mrf.mxu0 }
 0x140   :  { %v1756_v11 = vpop.f32.mrf.mxu1 }
 0x141   :  { %v1470_v12 = vpop.f32.mrf.mxu0  ;;  %3628 = vmatmul.mubr.bf16.vlgmr.msra.gmra.mxu0 %v3948_v5  ;;  %v3956_v5 = vld [vmem:[%s5423_s0 + $0x178] ss:$20 sps:$4 sm:$0xff]  }
 0x142   :  { %v1759_v13 = vpop.f32.mrf.mxu1  ;;  %3631 = vmatprep.mubr.bf16.mxu0 %v3949_v7  ;;  %v3957_v7 = vld [vmem:[%s5423_s0 + $0x1a0] ss:$20 sps:$4 sm:$0xff]  }
 0x143   :  { %v4637_v14 = vadd.f32 %v1759_v13, %v1470_v12  ;;  %v1472_v15 = vpop.f32.mrf.mxu0 }
 0x144   :  { %v1761_v17 = vpop.f32.mrf.mxu1 }
 0x145   :  { %v1473_v18 = vpop.f32.mrf.mxu0 }
 0x146   :  { %v1762_v20 = vpop.f32.mrf.mxu1 }
 0x147   :  { %v4645_v22 = vadd.f32 %v1762_v20, %v1473_v18  ;;  %v1475_v24 = vpop.f32.mrf.mxu0 }
 0x148   :  { %v1764_v26 = vpop.f32.mrf.mxu1 }
 0x149   :  { %v1478_v27 = vpop.f32.mrf.mxu0  ;;  %3632 = vmatmul.mubr.bf16.gmra.mxu0 %v3950_v19  ;;  %v3959_v26 = vld [vmem:[%s5423_s0 + $0x1f0] ss:$20 sps:$4 sm:$0xff]  }
 0x14a   :  { %v1767_v28 = vpop.f32.mrf.mxu1  ;;  %3635 = vmatprep.mubr.bf16.mxu0 %v3951_v21  ;;  %v3958_v21 = vld [vmem:[%s5423_s0 + $0x1c8] ss:$20 sps:$4 sm:$0xff]  }
 0x14b   :  { %v4647_v29 = vadd.f32 %v1767_v28, %v1478_v27  ;;  %v1480_v30 = vpop.f32.mrf.mxu0 }
 0x14c   :  { %v1769_v33 = vpop.f32.mrf.mxu1 }
 0x14d   :  { %v1481_v34 = vpop.f32.mrf.mxu0 }
 0x14e   :  { %v1770_v36 = vpop.f32.mrf.mxu1 }
 0x14f   :  { %v4655_v39 = vadd.f32 %v1770_v36, %v1481_v34  ;;  %v1483_v40 = vpop.f32.mrf.mxu0 }
 0x150   :  { %v1772_v42 = vpop.f32.mrf.mxu1 }
 0x151   :  { %v1486_v43 = vpop.f32.mrf.mxu0  ;;  %3636 = vmatmul.mubr.bf16.gmra.mxu0 %v3952_v35  ;;  %v3960_v42 = vld [vmem:[%s5423_s0 + $0x218] ss:$20 sps:$4 sm:$0xff]  }
 0x152   :  { %v1775_v44 = vpop.f32.mrf.mxu1  ;;  %3639 = vmatprep.mubr.bf16.mxu0 %v3953_v38 }
 0x153   :  { %v4657_v46 = vadd.f32 %v1775_v44, %v1486_v43  ;;  %v1488_v47 = vpop.f32.mrf.mxu0  ;;  %v3961_v44 = vld [vmem:[%s5423_s0 + $0x240] ss:$20 sps:$4 sm:$0xff]  }
 0x154   :  { %v1777_v49 = vpop.f32.mrf.mxu1 }
 0x155   :  { %v1489_v50 = vpop.f32.mrf.mxu0 }
 0x156   :  { %v1778_v53 = vpop.f32.mrf.mxu1 }
 0x157   :  { %v4665_v55 = vadd.f32 %v1778_v53, %v1489_v50  ;;  %v1491_v56 = vpop.f32.mrf.mxu0 }
 0x158   :  { %v1780_v58 = vpop.f32.mrf.mxu1 }
 0x159   :  { %v1494_v60 = vpop.f32.mrf.mxu0  ;;  %3640 = vmatmul.mubr.bf16.gmra.mxu0 %v3954_v52 }
 0x15a   :  { %v1783_v61 = vpop.f32.mrf.mxu1  ;;  %3643 = vmatprep.mubr.bf16.mxu0 %v3955_v54 }
 0x15b   :  { %v4667_v62 = vadd.f32 %v1783_v61, %v1494_v60  ;;  %v1496_v0 = vpop.f32.mrf.mxu0  ;;  %v3962_v61 = vld [vmem:[%s5423_s0 + $0x268] ss:$20 sps:$4 sm:$0xff]  }
 0x15c   :  { %v1785_v3 = vpop.f32.mrf.mxu1 }
 0x15d   :  { %v1497_v4 = vpop.f32.mrf.mxu0  ;;  %v3963_v3 = vld [vmem:[%s5423_s0 + $0x290] ss:$20 sps:$4 sm:$0xff]  }
 0x15e   :  { %v1786_v6 = vpop.f32.mrf.mxu1 }
 0x15f   :  { %v4675_v9 = vadd.f32 %v1786_v6, %v1497_v4  ;;  %v1499_v11 = vpop.f32.mrf.mxu0 }
 0x160   :  { %v1788_v12 = vpop.f32.mrf.mxu1 }
 0x161   :  { %v1502_v13 = vpop.f32.mrf.mxu0  ;;  %3644 = vmatmul.mubr.bf16.gmra.mxu0 %v3956_v5 }
 0x162   :  { %v1791_v15 = vpop.f32.mrf.mxu1  ;;  %3647 = vmatprep.mubr.bf16.mxu0 %v3957_v7 }
 0x163   :  { %v4677_v17 = vadd.f32 %v1791_v15, %v1502_v13  ;;  %v1504_v18 = vpop.f32.mrf.mxu0 }
 0x164   :  { %v1793_v19 = vpop.f32.mrf.mxu1 }
 0x165   :  { %v1505_v20 = vpop.f32.mrf.mxu0  ;;  %v3964_v19 = vld [vmem:[%s5423_s0 + $0x2b8] ss:$20 sps:$4 sm:$0xff]  }
 0x166   :  { %v1794_v24 = vpop.f32.mrf.mxu1 }
 0x167   :  { %v4685_v27 = vadd.f32 %v1794_v24, %v1505_v20  ;;  %v1507_v28 = vpop.f32.mrf.mxu0 }
 0x168   :  { %v1796_v30 = vpop.f32.mrf.mxu1 }
 0x169   :  { %v1510_v33 = vpop.f32.mrf.mxu0  ;;  %3648 = vmatmul.mubr.bf16.gmra.mxu0 %v3958_v21  ;;  %v3965_v21 = vld [vmem:[%s5423_s0 + $0x2e0] ss:$20 sps:$4 sm:$0xff]  }
 0x16a   :  { %v1799_v34 = vpop.f32.mrf.mxu1  ;;  %3651 = vmatprep.mubr.bf16.mxu0 %v3959_v26 }
 0x16b   :  { %v4687_v35 = vadd.f32 %v1799_v34, %v1510_v33  ;;  %v1512_v36 = vpop.f32.mrf.mxu0 }
 0x16c   :  { %v1801_v38 = vpop.f32.mrf.mxu1 }
 0x16d   :  { %v1513_v40 = vpop.f32.mrf.mxu0 }
 0x16e   :  { %v1802_v43 = vpop.f32.mrf.mxu1 }
 0x16f   :  { %v4695_v47 = vadd.f32 %v1802_v43, %v1513_v40  ;;  %v1515_v49 = vpop.f32.mrf.mxu0 }
 0x170   :  { %v1804_v50 = vpop.f32.mrf.mxu1 }
 0x171   :  { %v1518_v52 = vpop.f32.mrf.mxu0  ;;  %3652 = vmatmul.mubr.bf16.gmra.mxu0 %v3960_v42  ;;  %v3966_v42 = vld [vmem:[%s5423_s0 + $0x308] ss:$20 sps:$4 sm:$0xff]  }
 0x172   :  { %v1807_v53 = vpop.f32.mrf.mxu1  ;;  %3655 = vmatprep.mubr.bf16.mxu0 %v3961_v44  ;;  %v3967_v44 = vld [vmem:[%s5423_s0 + $0x330] ss:$20 sps:$4 sm:$0xff]  }
 0x173   :  { %v4697_v54 = vadd.f32 %v1807_v53, %v1518_v52  ;;  %v1520_v56 = vpop.f32.mrf.mxu0 }
 0x174   :  { %v1809_v58 = vpop.f32.mrf.mxu1 }
 0x175   :  { %v1521_v60 = vpop.f32.mrf.mxu0 }
 0x176   :  { %v1810_v0 = vpop.f32.mrf.mxu1 }
 0x177   :  { %v4705_v4 = vadd.f32 %v1810_v0, %v1521_v60  ;;  %v1523_v5 = vpop.f32.mrf.mxu0 }
 0x178   :  { %v1812_v6 = vpop.f32.mrf.mxu1 }
 0x179   :  { %v1526_v7 = vpop.f32.mrf.mxu0  ;;  %3656 = vmatmul.mubr.bf16.gmra.mxu0 %v3962_v61  ;;  %v3969_v6 = vld [vmem:[%s5423_s0 + $0x380] ss:$20 sps:$4 sm:$0xff]  }
 0x17a   :  { %v1815_v11 = vpop.f32.mrf.mxu1  ;;  %3659 = vmatprep.mubr.bf16.mxu0 %v3963_v3  ;;  %v3968_v3 = vld [vmem:[%s5423_s0 + $0x358] ss:$20 sps:$4 sm:$0xff]  }
 0x17b   :  { %v4707_v12 = vadd.f32 %v1815_v11, %v1526_v7  ;;  %v1528_v13 = vpop.f32.mrf.mxu0 }
 0x17c   :  { %v1817_v15 = vpop.f32.mrf.mxu1 }
 0x17d   :  { %v1529_v18 = vpop.f32.mrf.mxu0 }
 0x17e   :  { %v1818_v20 = vpop.f32.mrf.mxu1 }
 0x17f   :  { %v4715_v24 = vadd.f32 %v1818_v20, %v1529_v18  ;;  %v1531_v26 = vpop.f32.mrf.mxu0 }
 0x180   :  { %v1820_v28 = vpop.f32.mrf.mxu1 }
 0x181   :  { %v1534_v30 = vpop.f32.mrf.mxu0  ;;  %3660 = vmatmul.mubr.bf16.gmra.mxu0 %v3964_v19  ;;  %v3970_v28 = vld [vmem:[%s5423_s0 + $0x3a8] ss:$20 sps:$4 sm:$0xff]  }
 0x182   :  { %v1823_v33 = vpop.f32.mrf.mxu1  ;;  %3663 = vmatprep.mubr.bf16.mxu0 %v3965_v21 }
 0x183   :  { %v4717_v34 = vadd.f32 %v1823_v33, %v1534_v30  ;;  %v1536_v36 = vpop.f32.mrf.mxu0  ;;  %v3971_v33 = vld [vmem:[%s5423_s0 + $0x3d0] ss:$20 sps:$4 sm:$0xff]  }
 0x184   :  { %v1825_v38 = vpop.f32.mrf.mxu1 }
 0x185   :  { %v1537_v40 = vpop.f32.mrf.mxu0 }
 0x186   :  { %v1826_v43 = vpop.f32.mrf.mxu1 }
 0x187   :  { %v4725_v49 = vadd.f32 %v1826_v43, %v1537_v40  ;;  %v1539_v50 = vpop.f32.mrf.mxu0 }
 0x188   :  { %v1828_v52 = vpop.f32.mrf.mxu1 }
 0x189   :  { %v1542_v53 = vpop.f32.mrf.mxu0  ;;  %3664 = vmatmul.mubr.bf16.gmra.mxu0 %v3966_v42 }
 0x18a   :  { %v1831_v56 = vpop.f32.mrf.mxu1  ;;  %3667 = vmatprep.mubr.bf16.mxu0 %v3967_v44 }
 0x18b   :  { %v4727_v58 = vadd.f32 %v1831_v56, %v1542_v53  ;;  %v1544_v60 = vpop.f32.mrf.mxu0  ;;  %v3972_v56 = vld [vmem:[%s5423_s0 + $0x3f8] ss:$20 sps:$4 sm:$0xff]  }
 0x18c   :  { %v1833_v61 = vpop.f32.mrf.mxu1 }
 0x18d   :  { %v1545_v0 = vpop.f32.mrf.mxu0  ;;  %v3973_v61 = vld [vmem:[%s5423_s0 + $0x420] ss:$20 sps:$4 sm:$0xff]  }
 0x18e   :  { %v1834_v5 = vpop.f32.mrf.mxu1 }
 0x18f   :  { %v4735_v7 = vadd.f32 %v1834_v5, %v1545_v0  ;;  %v1547_v11 = vpop.f32.mrf.mxu0 }
 0x190   :  { %v1836_v13 = vpop.f32.mrf.mxu1 }
 0x191   :  { %v1550_v15 = vpop.f32.mrf.mxu0  ;;  %3668 = vmatmul.mubr.bf16.gmra.mxu0 %v3968_v3 }
 0x192   :  { %v1839_v18 = vpop.f32.mrf.mxu1  ;;  %3671 = vmatprep.mubr.bf16.mxu0 %v3969_v6 }
 0x193   :  { %v4737_v19 = vadd.f32 %v1839_v18, %v1550_v15  ;;  %v1552_v20 = vpop.f32.mrf.mxu0 }
 0x194   :  { %v1841_v21 = vpop.f32.mrf.mxu1 }
 0x195   :  { %v1553_v26 = vpop.f32.mrf.mxu0  ;;  %v3974_v21 = vld [vmem:[%s5423_s0 + $0x448] ss:$20 sps:$4 sm:$0xff]  }
 0x196   :  { %v1842_v30 = vpop.f32.mrf.mxu1 }
 0x197   :  { %v4745_v36 = vadd.f32 %v1842_v30, %v1553_v26  ;;  %v1555_v38 = vpop.f32.mrf.mxu0 }
 0x198   :  { %v1844_v40 = vpop.f32.mrf.mxu1 }
 0x199   :  { %5443 = vst [vmem:[#allocation5_spill] sm:$0xff] %v4745_v36  ;;  %v1558_v42 = vpop.f32.mrf.mxu0  ;;  %3672 = vmatmul.mubr.bf16.gmra.mxu0 %v3970_v28  ;;  %v3975_v28 = vld [vmem:[%s5423_s0 + $0x470] ss:$20 sps:$4 sm:$0xff]  }
 0x19a   :  { %v1847_v43 = vpop.f32.mrf.mxu1  ;;  %3675 = vmatprep.mubr.bf16.mxu0 %v3971_v33 }
 0x19b   :  { %v4747_v44 = vadd.f32 %v1847_v43, %v1558_v42  ;;  %v1560_v50 = vpop.f32.mrf.mxu0 }
 0x19c   :  { %v1849_v52 = vpop.f32.mrf.mxu1 }
 0x19d   :  { %v1561_v53 = vpop.f32.mrf.mxu0 }
 0x19e   :  { %v1850_v60 = vpop.f32.mrf.mxu1 }
 0x19f   :  { %v4755_v0 = vadd.f32 %v1850_v60, %v1561_v53  ;;  %v1563_v3 = vpop.f32.mrf.mxu0 }
 0x1a0   :  { %v1852_v5 = vpop.f32.mrf.mxu1 }
 0x1a1   :  { %5444 = vst [vmem:[#allocation6_spill] sm:$0xff] %v4755_v0  ;;  %v1566_v6 = vpop.f32.mrf.mxu0  ;;  %3676 = vmatmul.mubr.bf16.gmra.mxu0 %v3972_v56  ;;  %v3976_v56 = vld [vmem:[%s5423_s0 + $0x498] ss:$20 sps:$4 sm:$0xff]  }
 0x1a2   :  { %v1855_v11 = vpop.f32.mrf.mxu1  ;;  %3679 = vmatprep.mubr.bf16.mxu0 %v3973_v61  ;;  %v3977_v61 = vld [vmem:[%s5423_s0 + $0x4c0] ss:$20 sps:$4 sm:$0xff]  }
 0x1a3   :  { %v4757_v13 = vadd.f32 %v1855_v11, %v1566_v6  ;;  %v1568_v15 = vpop.f32.mrf.mxu0 }
 0x1a4   :  { %v1857_v18 = vpop.f32.mrf.mxu1 }
 0x1a5   :  { %5445 = vst [vmem:[#allocation7_spill] sm:$0xff] %v4757_v13  ;;  %v1569_v20 = vpop.f32.mrf.mxu0 }
 0x1a6   :  { %v1858_v26 = vpop.f32.mrf.mxu1 }
 0x1a7   :  { %v4765_v30 = vadd.f32 %v1858_v26, %v1569_v20  ;;  %v1571_v33 = vpop.f32.mrf.mxu0 }
 0x1a8   :  { %v1860_v38 = vpop.f32.mrf.mxu1 }
 0x1a9   :  { %5446 = vst [vmem:[#allocation8_spill] sm:$0xff] %v4765_v30  ;;  %v1574_v40 = vpop.f32.mrf.mxu0  ;;  %3680 = vmatmul.mubr.bf16.gmra.mxu0 %v3974_v21 }
 0x1aa   :  { %v1863_v42 = vpop.f32.mrf.mxu1  ;;  %3683 = vmatprep.mubr.bf16.mxu0 %v3975_v28  ;;  %v3978_v28 = vld [vmem:[%s5423_s0 + $0x4e8] ss:$20 sps:$4 sm:$0xff]  }
 0x1ab   :  { %v4767_v43 = vadd.f32 %v1863_v42, %v1574_v40  ;;  %v1576_v50 = vpop.f32.mrf.mxu0 }
 0x1ac   :  { %v1865_v52 = vpop.f32.mrf.mxu1 }
 0x1ad   :  { %5447 = vst [vmem:[#allocation9_spill] sm:$0xff] %v4767_v43  ;;  %v1577_v53 = vpop.f32.mrf.mxu0 }
 0x1ae   :  { %v1866_v60 = vpop.f32.mrf.mxu1 }
 0x1af   :  { %v4775_v3 = vadd.f32 %v1866_v60, %v1577_v53  ;;  %v1579_v5 = vpop.f32.mrf.mxu0 }
 0x1b0   :  { %v1868_v6 = vpop.f32.mrf.mxu1 }
 0x1b1   :  { %5448 = vst [vmem:[#allocation10_spill] sm:$0xff] %v4775_v3  ;;  %v1582_v11 = vpop.f32.mrf.mxu0  ;;  %3684 = vmatmul.mubr.bf16.gmra.mxu0 %v3976_v56 }
 0x1b2   :  { %v1871_v15 = vpop.f32.mrf.mxu1  ;;  %3687 = vmatprep.mubr.bf16.mxu0 %v3977_v61 }
 0x1b3   :  { %v4777_v18 = vadd.f32 %v1871_v15, %v1582_v11  ;;  %v1584_v20 = vpop.f32.mrf.mxu0 }
 0x1b4   :  { %v1873_v21 = vpop.f32.mrf.mxu1 }
 0x1b5   :  { %5449 = vst [vmem:[#allocation11_spill] sm:$0xff] %v4777_v18  ;;  %v1585_v26 = vpop.f32.mrf.mxu0 }
 0x1b6   :  { %v1874_v33 = vpop.f32.mrf.mxu1 }
 0x1b7   :  { %v4782_v38 = vadd.f32 %v1874_v33, %v1585_v26  ;;  %v1587_v40 = vpop.f32.mrf.mxu0 }
 0x1b8   :  { %v1876_v42 = vpop.f32.mrf.mxu1 }
 0x1b9   :  { %5450 = vst [vmem:[#allocation12_spill] sm:$0xff] %v4782_v38  ;;  %v1590_v50 = vpop.f32.mrf.mxu0  ;;  %3688 = vmatmul.mubr.bf16.gmra.mxu0 %v3978_v28 }
 0x1ba   :  { %v1879_v52 = vpop.f32.mrf.mxu1  ;;  %2653 = vmatprep.mubr.bf16.mxu0 %v5431_v1 }
 0x1bb   :  { %v4785_v53 = vadd.f32 %v1879_v52, %v1590_v50  ;;  %v1592_v56 = vpop.f32.mrf.mxu0 }
 0x1bc   :  { %v1881_v60 = vpop.f32.mrf.mxu1 }
 0x1bd   :  { %v1593_v61 = vpop.f32.mrf.mxu0 }
 0x1be   :  { %v1882_v5 = vpop.f32.mrf.mxu1 }
 0x1bf   :  { %v4787_v6 = vadd.f32 %v1882_v5, %v1593_v61  ;;  %v1595_v11 = vpop.f32.mrf.mxu0 }
 0x1c0   :  { %v1884_v15 = vpop.f32.mrf.mxu1 }
 0x1c1   :  { %v1598_v20 = vpop.f32.mrf.mxu0 }
 0x1c2   :  { %v1887_v21 = vpop.f32.mrf.mxu1 }
 0x1c3   :  { %v4789_v26 = vadd.f32 %v1887_v21, %v1598_v20  ;;  %v1600_v33 = vpop.f32.mrf.mxu0 }
 0x1c4   :  { %v1889_v40 = vpop.f32.mrf.mxu1 }
 0x1c5   :  { %v1601_v28 = vpop.f32.mrf.mxu0 }
 0x1c6   :  { %v1890_v42 = vpop.f32.mrf.mxu1 }
 0x1c7   :  { %v4791_v38 = vadd.f32 %v1890_v42, %v1601_v28  ;;  %v1603_v50 = vpop.f32.mrf.mxu0 }
 0x1c8   :  { %v1892_v52 = vpop.f32.mrf.mxu1 }
 0x1c9   :  { %v1606_v56 = vpop.f32.mrf.mxu0 }
 0x1ca   :  { %v1895_v60 = vpop.f32.mrf.mxu1 }
 0x1cb   :  { %v4793_v1 = vadd.f32 %v1895_v60, %v1606_v56  ;;  %v1608_v61 = vpop.f32.mrf.mxu0 }
 0x1cc   :  { %v1897_v5 = vpop.f32.mrf.mxu1 }
 0x1cd   :  { %v1609_v11 = vpop.f32.mrf.mxu0 }
 0x1ce   :  { %v1898_v15 = vpop.f32.mrf.mxu1 }
 0x1cf   :  { %v4795_v18 = vadd.f32 %v1898_v15, %v1609_v11  ;;  %v1611_v20 = vpop.f32.mrf.mxu0 }
 0x1d0   :  { %v1900_v21 = vpop.f32.mrf.mxu1 }
 0x1d1   :  { %v1614_v33 = vpop.f32.mrf.mxu0 }
 0x1d2   :  { %v1903_v40 = vpop.f32.mrf.mxu1 }
 0x1d3   :  { %v4797_v30 = vadd.f32 %v1903_v40, %v1614_v33  ;;  %v1616_v28 = vpop.f32.mrf.mxu0 }
 0x1d4   :  { %v1905_v42 = vpop.f32.mrf.mxu1 }
 0x1d5   :  { %5451 = vst [vmem:[#allocation13_spill] sm:$0xff] %v4797_v30  ;;  %v1617_v50 = vpop.f32.mrf.mxu0 }
 0x1d6   :  { %v1906_v52 = vpop.f32.mrf.mxu1 }
 0x1d7   :  { %v4799_v3 = vadd.f32 %v1906_v52, %v1617_v50  ;;  %v1619_v56 = vpop.f32.mrf.mxu0 }
 0x1d8   :  { %v1908_v60 = vpop.f32.mrf.mxu1 }
 0x1d9   :  { %5452 = vst [vmem:[#allocation14_spill] sm:$0xff] %v4799_v3  ;;  %v1622_v61 = vpop.f32.mrf.mxu0 }
 0x1da   :  { %v1911_v5 = vpop.f32.mrf.mxu1 }
 0x1db   :  { %v4801_v13 = vadd.f32 %v1911_v5, %v1622_v61  ;;  %v1624_v11 = vpop.f32.mrf.mxu0 }
 0x1dc   :  { %v1913_v15 = vpop.f32.mrf.mxu1 }
 0x1dd   :  { %v1625_v20 = vpop.f32.mrf.mxu0 }
 0x1de   :  { %v1914_v21 = vpop.f32.mrf.mxu1 }
 0x1df   :  { %v4803_v43 = vadd.f32 %v1914_v21, %v1625_v20  ;;  %v1627_v33 = vpop.f32.mrf.mxu0 }
 0x1e0   :  { %v1916_v40 = vpop.f32.mrf.mxu1 }
 0x1e1   :  { %5453 = vst [vmem:[#allocation15_spill] sm:$0xff] %v4803_v43  ;;  %v1630_v28 = vpop.f32.mrf.mxu0 }
 0x1e2   :  { %v1919_v42 = vpop.f32.mrf.mxu1 }
 0x1e3   :  { %v4805_v36 = vadd.f32 %v1919_v42, %v1630_v28  ;;  %v1632_v50 = vpop.f32.mrf.mxu0  ;;  %v2336_v28 = vld [vmem:[%s5426_s3 + $0x10] sm:$0xff] }
 0x1e4   :  { %v1921_v52 = vpop.f32.mrf.mxu1  ;;  %v2344_v42 = vld [vmem:[%s5426_s3 + $0x50] sm:$0xff] }
 0x1e5   :  { %5454 = vst [vmem:[#allocation16_spill] sm:$0xff] %v4805_v36  ;;  %v1633_v56 = vpop.f32.mrf.mxu0 }
 0x1e6   :  { %v1922_v60 = vpop.f32.mrf.mxu1 }
 0x1e7   :  { %v4807_v3 = vadd.f32 %v1922_v60, %v1633_v56  ;;  %v1635_v61 = vpop.f32.mrf.mxu0  ;;  %v3477_v56 = vcombine.high %v2336_v28, %v2344_v42 }
 0x1e8   :  { %v1924_v5 = vpop.f32.mrf.mxu1  ;;  %v3476_v61 = vcombine.low %v2336_v28, %v2344_v42  ;;  %v4828_v42 = vld [vmem:[%s5426_s3 + $0x8] sm:$0xff] }
 0x1e9   :  { %5455 = vst [vmem:[#allocation17_spill] sm:$0xff] %v4807_v3  ;;  %v1638_v11 = vpop.f32.mrf.mxu0  ;;  %2635 = vmatprep.subr.bf16.mxu0 %v3477_v56  ;;  %v4833_v56 = vld [vmem:[%s5426_s3 + $0x48] sm:$0xff] }
 0x1ea   :  { %v1927_v15 = vpop.f32.mrf.mxu1  ;;  %2636 = vmatpush1.bf16.msra.mxu0 %v3476_v61 }
 0x1eb   :  { %v4809_v0 = vadd.f32 %v1927_v15, %v1638_v11  ;;  %v1640_v20 = vpop.f32.mrf.mxu0 }
 0x1ec   :  { %v1929_v21 = vpop.f32.mrf.mxu1 }
 0x1ed   :  { %5456 = vst [vmem:[#allocation18_spill] sm:$0xff] %v4809_v0  ;;  %v1641_v33 = vpop.f32.mrf.mxu0 }
 0x1ee   :  { %v1930_v40 = vpop.f32.mrf.mxu1 }
 0x1ef   :  { %v4817_v50 = vadd.f32 %v1930_v40, %v1641_v33  ;;  %v1643_v52 = vpop.f32.mrf.mxu0 }
 0x1f0   :  { %v1932_v60 = vpop.f32.mrf.mxu1 }
 0x1f1   :  { %v1646_v5 = vpop.f32.mrf.mxu0 }
 0x1f2   :  { %v1935_v11 = vpop.f32.mrf.mxu1 }
 0x1f3   :  { %v4819_v15 = vadd.f32 %v1935_v11, %v1646_v5  ;;  %v1648_v20 = vpop.f32.mrf.mxu0 }
 0x1f4   :  { %v1937_v21 = vpop.f32.mrf.mxu1 }
 0x1f5   :  { %5457 = vst [vmem:[#allocation19_spill] sm:$0xff] %v4819_v15  ;;  %v1649_v3 = vpop.f32.mrf.mxu0 }
 0x1f6   :  { %v1938_v36 = vpop.f32.mrf.mxu1 }
 0x1f7   :  { %v4821_v0 = vadd.f32 %v1938_v36, %v1649_v3  ;;  %v1651_v43 = vpop.f32.mrf.mxu0 }
 0x1f8   :  { %v1940_v30 = vpop.f32.mrf.mxu1  ;;  %v3475_v43 = vcombine.high %v4828_v42, %v4833_v56 }
 0x1f9   :  { %5458 = vst [vmem:[#allocation20_spill] sm:$0xff] %v4821_v0  ;;  %v1654_v33 = vpop.f32.mrf.mxu0 }
 0x1fa   :  { %v1943_v40 = vpop.f32.mrf.mxu1  ;;  %2552 = vmatprep.subr.bf16.mxu1 %v3475_v43 }
 0x1fb   :  { %v4823_v52 = vadd.f32 %v1943_v40, %v1654_v33  ;;  %v1656_v60 = vpop.f32.mrf.mxu0 }
 0x1fc   :  { %v1945_v28 = vpop.f32.mrf.mxu1 }
 0x1fd   :  { %5459 = vst [vmem:[#allocation21_spill] sm:$0xff] %v4823_v52  ;;  %v1657_v36 = vpop.f32.mrf.mxu0 }
 0x1fe   :  { %v1946_v3 = vpop.f32.mrf.mxu1 }
 0x1ff   :  { %v4839_v61 = vadd.f32 %v1946_v3, %v1657_v36  ;;  %v1659_v5 = vpop.f32.mrf.mxu0 }
 0x200   :  { %v1948_v11 = vpop.f32.mrf.mxu1 }
 0x201   :  { %5460 = vst [vmem:[#allocation22_spill] sm:$0xff] %v4839_v61  ;;  %v3629_v20 = vpop.f32.mrf.mxu0 }
 0x202   :  { %v4842_v21 = vadd.f32 %v3629_v20, %v4533_v37 }
 0x203   :  { %v1984_v33 = vpop.f32.mrf.mxu0 }
 0x204   :  { %v4845_v40 = vadd.f32 %v1984_v33, %v4517_v23 }
 0x205   :  { %v3630_v60 = vpop.f32.mrf.mxu0 }
 0x206   :  { %v4848_v28 = vadd.f32 %v3630_v60, %v4544_v45 }
 0x207   :  { %v1987_v30 = vpop.f32.mrf.mxu0 }
 0x209   :  { %v3633_v0 = vpop.f32.mrf.mxu0 }
 0x20a   :  { %v4851_v36 = vadd.f32 %v3633_v0, %v4565_v2 }
 0x20b   :  { %v2000_v3 = vpop.f32.mrf.mxu0 }
 0x20c   :  { %v4854_v43 = vadd.f32 %v2000_v3, %v4549_v51 }
 0x20d   :  { %v3634_v5 = vpop.f32.mrf.mxu0 }
 0x20e   :  { %v4857_v37 = vadd.f32 %v3634_v5, %v4576_v10 }
 0x20f   :  { %v2003_v11 = vpop.f32.mrf.mxu0 }
 0x211   :  { %v3637_v23 = vpop.f32.mrf.mxu0 }
 0x212   :  { %v4860_v20 = vadd.f32 %v3637_v23, %v4597_v32 }
 0x213   :  { %v2016_v45 = vpop.f32.mrf.mxu0 }
 0x214   :  { %v4863_v33 = vadd.f32 %v2016_v45, %v4581_v16 }
 0x215   :  { %v3638_v60 = vpop.f32.mrf.mxu0 }
 0x216   :  { %v4866_v2 = vadd.f32 %v3638_v60, %v4608_v41 }
 0x217   :  { %v2019_v0 = vpop.f32.mrf.mxu0 }
 0x218   :  { %v4951_v15 = vadd.f32 %v2019_v0, %v4592_v25 }
 0x219   :  { %v3641_v51 = vpop.f32.mrf.mxu0 }
 0x21a   :  { %v4869_v3 = vadd.f32 %v3641_v51, %v4626_v63  ;;  %5464 = vst [vmem:[#allocation26_spill] sm:$0xff] %v4951_v15 }
 0x21b   :  { %v2032_v10 = vpop.f32.mrf.mxu0 }
 0x21c   :  { %5461 = vst [vmem:[#allocation23_spill] sm:$0xff] %v4869_v3  ;;  %v4872_v5 = vadd.f32 %v2032_v10, %v4613_v48 }
 0x21d   :  { %v3642_v61 = vpop.f32.mrf.mxu0 }
 0x21e   :  { %5462 = vst [vmem:[#allocation24_spill] sm:$0xff] %v4872_v5  ;;  %v4875_v32 = vadd.f32 %v3642_v61, %v4635_v8  ;;  %v4891_v61 = vadd.f32 %v1987_v30, %v4528_v31  ;;  %v4911_v30 = vld [vmem:[%s5426_s3 + $0x20] sm:$0xff] }
 0x21f   :  { %v2035_v23 = vpop.f32.mrf.mxu0 }
 0x220   :  { %5463 = vst [vmem:[#allocation25_spill] sm:$0xff] %v4875_v32 }
 0x221   :  { %v3645_v16 = vpop.f32.mrf.mxu0 }
 0x222   :  { %v4878_v45 = vadd.f32 %v3645_v16, %v4647_v29 }
 0x223   :  { %v2048_v41 = vpop.f32.mrf.mxu0 }
 0x224   :  { %v4883_v63 = vadd.f32 %v2048_v41, %v4637_v14 }
 0x225   :  { %v3646_v51 = vpop.f32.mrf.mxu0 }
 0x226   :  { %v4888_v10 = vadd.f32 %v3646_v51, %v4655_v39  ;;  %v4928_v39 = vadd.f32 %v2003_v11, %v4560_v59 }
 0x227   :  { %v2051_v8 = vpop.f32.mrf.mxu0 }
 0x228   :  { %v4896_v16 = vadd.f32 %v2051_v8, %v4645_v22  ;;  %v4916_v22 = vld [vmem:[%s5426_s3 + $0x60] sm:$0xff] }
 0x229   :  { %v3649_v60 = vpop.f32.mrf.mxu0 }
 0x22a   :  { %v4901_v41 = vadd.f32 %v3649_v60, %v4667_v62  ;;  %v3481_v60 = vcombine.high %v4911_v30, %v4916_v22 }
 0x22b   :  { %v2064_v48 = vpop.f32.mrf.mxu0 }
 0x22c   :  { %v4906_v31 = vadd.f32 %v2064_v48, %v4657_v46  ;;  %2801 = vmatprep.subr.bf16.mxu0 %v3481_v60 }
 0x22d   :  { %v3650_v51 = vpop.f32.mrf.mxu0 }
 0x22e   :  { %v4925_v48 = vadd.f32 %v3650_v51, %v4675_v9 }
 0x22f   :  { %v2067_v8 = vpop.f32.mrf.mxu0 }
 0x230   :  { %v4933_v29 = vadd.f32 %v2067_v8, %v4665_v55 }
 0x231   :  { %v3653_v62 = vpop.f32.mrf.mxu0 }
 0x232   :  { %v4938_v46 = vadd.f32 %v3653_v62, %v4687_v35 }
 0x233   :  { %v2080_v9 = vpop.f32.mrf.mxu0 }
 0x234   :  { %v4943_v59 = vadd.f32 %v2080_v9, %v4677_v17  ;;  %v4974_v17 = vadd.f32 %v2035_v23, %v4624_v57 }
 0x235   :  { %v3654_v11 = vpop.f32.mrf.mxu0 }
 0x236   :  { %v4948_v55 = vadd.f32 %v3654_v11, %v4695_v47  ;;  %5469 = vst [vmem:[#allocation31_spill] sm:$0xff] %v4974_v17 }
 0x237   :  { %v2083_v8 = vpop.f32.mrf.mxu0 }
 0x238   :  { %v4956_v62 = vadd.f32 %v2083_v8, %v4685_v27 }
 0x239   :  { %v3657_v51 = vpop.f32.mrf.mxu0 }
 0x23a   :  { %5465 = vst [vmem:[#allocation27_spill] sm:$0xff] %v4956_v62  ;;  %v4961_v9 = vadd.f32 %v3657_v51, %v4707_v12 }
 0x23b   :  { %v2096_v60 = vpop.f32.mrf.mxu0 }
 0x23c   :  { %5466 = vst [vmem:[#allocation28_spill] sm:$0xff] %v4961_v9  ;;  %v4966_v25 = vadd.f32 %v2096_v60, %v4697_v54 }
 0x23d   :  { %v3658_v0 = vpop.f32.mrf.mxu0 }
 0x23e   :  { %5467 = vst [vmem:[#allocation29_spill] sm:$0xff] %v4966_v25  ;;  %v4971_v27 = vadd.f32 %v3658_v0, %v4715_v24 }
 0x23f   :  { %v2099_v8 = vpop.f32.mrf.mxu0 }
 0x240   :  { %5468 = vst [vmem:[#allocation30_spill] sm:$0xff] %v4971_v27  ;;  %v4979_v51 = vadd.f32 %v2099_v8, %v4705_v4 }
 0x241   :  { %v3661_v47 = vpop.f32.mrf.mxu0 }
 0x242   :  { %5470 = vst [vmem:[#allocation32_spill] sm:$0xff] %v4979_v51  ;;  %v2121_v9 = vadd.f32 %v3661_v47, %v4727_v58 }
 0x243   :  { %v2112_v60 = vpop.f32.mrf.mxu0 }
 0x244   :  { %v2113_v15 = vadd.f32 %v2112_v60, %v4717_v34  ;;  %v5477_v60 = vld [vmem:[#allocation13_spill] sm:$0xff] }
 0x245   :  { %v3662_v35 = vpop.f32.mrf.mxu0 }
 0x247   :  { %v2115_v11 = vpop.f32.mrf.mxu0 }
 0x248   :  { %v2116_v34 = vadd.f32 %v2115_v11, %v4725_v49 }
 0x249   :  { %v3665_v14 = vpop.f32.mrf.mxu0 }
 0x24b   :  { %v2128_v24 = vpop.f32.mrf.mxu0 }
 0x24d   :  { %v3666_v0 = vpop.f32.mrf.mxu0 }
 0x24f   :  { %v2131_v25 = vpop.f32.mrf.mxu0 }
 0x251   :  { %v4983_v5 = vpop.f32.mrf.mxu0 }
 0x253   :  { %v4985_v57 = vpop.f32.mrf.mxu0 }
 0x255   :  { %v4987_v23 = vpop.f32.mrf.mxu0 }
 0x257   :  { %v4989_v12 = vpop.f32.mrf.mxu0 }
 0x259   :  { %v3673_v4 = vpop.f32.mrf.mxu0 }
 0x25a   :  { %v4992_v8 = vadd.f32 %v3673_v4, %v4785_v53 }
 0x25b   :  { %v4994_v54 = vpop.f32.mrf.mxu0 }
 0x25c   :  { %5471 = vst [vmem:[#allocation33_spill] sm:$0xff] %v4992_v8  ;;  %v2124_v8 = vadd.f32 %v3662_v35, %v4735_v7 }
 0x25d   :  { %v3674_v51 = vpop.f32.mrf.mxu0 }
 0x25e   :  { %v4997_v17 = vadd.f32 %v3674_v51, %v4787_v6  ;;  %v5473_v6 = vmax.f32 %v4842_v21, %v4878_v45  ;;  %v5475_v45 = vmax.f32 %v4848_v28, %v4888_v10  ;;  %v5478_v28 = vld [vmem:[#allocation6_spill] sm:$0xff] }
 0x25f   :  { %v4999_v27 = vpop.f32.mrf.mxu0  ;;  %v2140_v10 = vadd.f32 %v3666_v0, %v5478_v28 }
 0x260   :  { %5472 = vst [vmem:[#allocation34_spill] sm:$0xff] %v4999_v27  ;;  %v5012_v27 = vld [vmem:[%s5425_s2] ss:$0 sm:$0xff] }
 0x261   :  { %v3677_v32 = vpop.f32.mrf.mxu0 }
 0x262   :  { %v2185_v3 = vadd.f32 %v3677_v32, %v4793_v1 }
 0x263   :  { %v2176_v62 = vpop.f32.mrf.mxu0 }
 0x264   :  { %v2257_v52 = vmax.f32 %v2121_v9, %v2185_v3  ;;  %v2177_v53 = vadd.f32 %v2176_v62, %v4789_v26  ;;  %v5474_v26 = vmax.f32 %v4845_v40, %v4883_v63  ;;  %v2129_v40 = vadd.f32 %v2128_v24, %v4737_v19 }
 0x265   :  { %v3678_v4 = vpop.f32.mrf.mxu0  ;;  %v5480_v24 = vmax.f32 %v4851_v36, %v4901_v41  ;;  %v5057_v36 = vld [vmem:[%s5426_s3 + $0x30] sm:$0xff] }
 0x266   :  { %v2273_v51 = vmax.f32 %v5473_v6, %v2257_v52  ;;  %v2255_v58 = vmax.f32 %v2113_v15, %v2177_v53  ;;  %v2188_v1 = vadd.f32 %v3678_v4, %v4795_v18  ;;  %v2137_v18 = vadd.f32 %v3665_v14, %v4747_v44  ;;  %v5062_v41 = vld [vmem:[%s5426_s3 + $0x70] sm:$0xff] }
 0x267   :  { %v2179_v32 = vpop.f32.mrf.mxu0 }
 0x268   :  { %v2271_v3 = vmax.f32 %v5474_v26, %v2255_v58  ;;  %v2258_v7 = vmax.f32 %v2124_v8, %v2188_v1  ;;  %v2180_v35 = vadd.f32 %v2179_v32, %v4791_v38  ;;  %v2296_v52 = vadd.f32 %v5012_v27, %v2273_v51  ;;  %v5479_v51 = vld [vmem:[#allocation15_spill] sm:$0xff] }
 0x269   :  { %v3681_v21 = vpop.f32.mrf.mxu0  ;;  %v5476_v38 = vmax.f32 %v4891_v61, %v4896_v16  ;;  %v5042_v16 = vld [vmem:[%s5426_s3 + $0x18] sm:$0xff] }
 0x26a   :  { %v2274_v62 = vmax.f32 %v5475_v45, %v2258_v7  ;;  %v2256_v15 = vmax.f32 %v2116_v34, %v2180_v35  ;;  %v2294_v9 = vadd.f32 %v5012_v27, %v2271_v3  ;;  %v2201_v49 = vadd.f32 %v3681_v21, %v4801_v13  ;;  %v5052_v7 = vld [vmem:[%s5426_s3 + $0x58] sm:$0xff]  ;;  %v5482_v35 = vld [vmem:[#allocation5_spill] sm:$0xff] }
 0x26b   :  { %v2192_v47 = vpop.f32.mrf.mxu0  ;;  %v2312_v53 = vmax.f32 %v2296_v52, 0.0  ;;  %v5481_v34 = vmax.f32 %v4854_v43, %v4906_v31  ;;  %v2132_v52 = vadd.f32 %v2131_v25, %v5482_v35  ;;  %v5483_v31 = vld [vmem:[#allocation14_spill] sm:$0xff] }
 0x26c   :  { %v2297_v63 = vadd.f32 %v5012_v27, %v2274_v62  ;;  %v2272_v11 = vmax.f32 %v5476_v38, %v2256_v15  ;;  %v2193_v8 = vadd.f32 %v2192_v47, %v5477_v60  ;;  %v2261_v4 = vmax.f32 %v2137_v18, %v2201_v49  ;;  %v5484_v62 = vld [vmem:[#allocation9_spill] sm:$0xff]  ;;  %v5486_v47 = vld [vmem:[#allocation18_spill] sm:$0xff] }
 0x26d   :  { %v3682_v44 = vpop.f32.mrf.mxu0  ;;  %v2310_v19 = vmax.f32 %v2294_v9, 0.0  ;;  %v2153_v15 = vadd.f32 %v4983_v5, %v5484_v62  ;;  %v5485_v9 = vmax.f32 %v4857_v37, %v4925_v48  ;;  %v3479_v60 = vcombine.high %v5042_v16, %v5052_v7  ;;  %v5489_v37 = vld [vmem:[#allocation10_spill] sm:$0xff] }
 0x26e   :  { %v2313_v14 = vmax.f32 %v2297_v63, 0.0  ;;  %v2295_v6 = vadd.f32 %v5012_v27, %v2272_v11  ;;  %v2259_v13 = vmax.f32 %v2129_v40, %v2193_v8  ;;  %v2204_v58 = vadd.f32 %v3682_v44, %v5479_v51  ;;  %v5487_v63 = vld [vmem:[#allocation7_spill] sm:$0xff] }
 0x26f   :  { %v2277_v1 = vmax.f32 %v5480_v24, %v2261_v4  ;;  %v2195_v61 = vpop.f32.mrf.mxu0  ;;  %v2145_v25 = vadd.f32 %v4985_v57, %v5487_v63  ;;  %v3485_v8 = vcombine.high %v5057_v36, %v5062_v41  ;;  %v2156_v48 = vadd.f32 %v4987_v23, %v5489_v37  ;;  %v5504_v63 = vld [vmem:[#allocation27_spill] sm:$0xff]  ;;  %v5509_v37 = vld [vmem:[#allocation22_spill] sm:$0xff] }
 0x270   :  { %v5044_v0 = vpack.c.bf16 %v2313_v14, %v2312_v53  ;;  %v2311_v32 = vmax.f32 %v2295_v6, 0.0  ;;  %v2275_v26 = vmax.f32 %v5481_v34, %v2259_v13  ;;  %v2262_v3 = vmax.f32 %v2140_v10, %v2204_v58  ;;  %v5488_v10 = vld [vmem:[#allocation16_spill] sm:$0xff] }
 0x271   :  { %v2300_v43 = vadd.f32 %v5012_v27, %v2277_v1  ;;  %v2196_v21 = vadd.f32 %v2195_v61, %v5483_v31  ;;  %v3685_v45 = vpop.f32.mrf.mxu0  ;;  %v5490_v44 = vmax.f32 %v4928_v39, %v4933_v29  ;;  %v5491_v13 = vcombine.low %v4828_v42, %v4833_v56  ;;  %v5495_v56 = vld [vmem:[#allocation8_spill] sm:$0xff]  ;;  %v5499_v31 = vld [vmem:[#allocation21_spill] sm:$0xff] }
 0x272   :  { %v5069_v18 = vpack.c.bf16 %v2311_v32, %v2310_v19  ;;  %v2278_v49 = vmax.f32 %v5485_v9, %v2262_v3  ;;  %v2217_v40 = vadd.f32 %v3685_v45, %v5486_v47  ;;  %v2298_v4 = vadd.f32 %v5012_v27, %v2275_v26  ;;  %v5501_v9 = vld [vmem:[#allocation33_spill] sm:$0xff]  ;;  %v5502_v47 = vld [vmem:[#allocation19_spill] sm:$0xff] }
 0x273   :  { %v2260_v38 = vmax.f32 %v2132_v52, %v2196_v21  ;;  %v2208_v11 = vpop.f32.mrf.mxu0  ;;  %v2316_v57 = vmax.f32 %v2300_v43, 0.0  ;;  %v5492_v51 = vmov 0   ;;  %v5493_v19 = vmax.f32 %v4860_v20, %v4938_v46  ;;  %v5500_v21 = vld [vmem:[#allocation11_spill] sm:$0xff] }
 0x274   :  { %v2301_v5 = vadd.f32 %v5012_v27, %v2278_v49  ;;  %v2265_v28 = vmax.f32 %v2153_v15, %v2217_v40  ;;  %v2209_v53 = vadd.f32 %v2208_v11, %v5488_v10  ;;  %3488 = vmatmul.mubr.msk.bf16.vlgmr.msra.gmra.mxu1 %vm2430_vm0, %v5069_v18  ;;  %3504 = vmatmul.mubr.msk.bf16.vlgmr.msra.gmra.mxu0 %vm2430_vm0, %v5069_v18  ;;  %v2314_v34 = vmax.f32 %v2298_v4, 0.0 }
 0x275   :  { %v2276_v14 = vmax.f32 %v5490_v44, %v2260_v38  ;;  %v3686_v6 = vpop.f32.mrf.mxu0  ;;  %2553 = vmatpush1.bf16.msra.mxu1 %v5491_v13  ;;  %2495 = vmatprep.mubr.bf16.mxu1 %v5492_v51  ;;  %v5494_v29 = vcombine.low %v4911_v30, %v4916_v22  ;;  %v2148_v61 = vadd.f32 %v4989_v12, %v5495_v56  ;;  %v5497_v22 = vld [vmem:[#allocation17_spill] sm:$0xff] }
 0x276   :  { %v2317_v58 = vmax.f32 %v2301_v5, 0.0  ;;  %v2281_v24 = vmax.f32 %v5493_v19, %v2265_v28  ;;  %v2263_v23 = vmax.f32 %v2145_v25, %v2209_v53  ;;  %v2220_v1 = vadd.f32 %v3686_v6, %v4817_v50  ;;  %2659 = vmatprep.mubr.bf16.mxu0 %v5492_v51  ;;  %2718 = vmatprep.subr.bf16.mxu1 %v3479_v60  ;;  %v5507_v5 = vld [vmem:[#allocation28_spill] sm:$0xff]  ;;  %v5511_v6 = vld [vmem:[#allocation29_spill] sm:$0xff] }
 0x277   :  { %2802 = vmatpush1.bf16.msra.mxu0 %v5494_v29  ;;  %v2299_v39 = vadd.f32 %v5012_v27, %v2276_v14  ;;  %v2211_v42 = vpop.f32.mrf.mxu0  ;;  %v5496_v20 = vmax.f32 %v4863_v33, %v4943_v59  ;;  %v5498_v52 = vmax.f32 %v4866_v2, %v4948_v55  ;;  %v2161_v45 = vadd.f32 %v4994_v54, %v5500_v21  ;;  %v5503_v54 = vld [vmem:[#allocation26_spill] sm:$0xff]  ;;  %v5510_v14 = vld [vmem:[#allocation24_spill] sm:$0xff] }
 0x278   :  { %2967 = vmatprep.subr.bf16.mxu0 %v3485_v8  ;;  %v5108_v32 = vpack.c.bf16 %v2317_v58, %v2316_v57  ;;  %v2266_v46 = vmax.f32 %v2156_v48, %v2220_v1  ;;  %v2304_v30 = vadd.f32 %v5012_v27, %v2281_v24  ;;  %v2212_v3 = vadd.f32 %v2211_v42, %v5497_v22  ;;  %v5506_v8 = vld [vmem:[#allocation23_spill] sm:$0xff]  ;;  %v5513_v24 = vld [vmem:[#allocation12_spill] sm:$0xff] }
 0x279   :  { %v2279_v50 = vmax.f32 %v5496_v20, %v2263_v23  ;;  %v2315_v26 = vmax.f32 %v2299_v39, 0.0  ;;  %v3689_v35 = vpop.f32.mrf.mxu0  ;;  %v5505_v25 = vmax.f32 %v5503_v54, %v5504_v63  ;;  %v5508_v28 = vmax.f32 %v5506_v8, %v5507_v5  ;;  %v5514_v23 = vld [vmem:[#allocation34_spill] sm:$0xff]  ;;  %v5515_v42 = vld [vmem:[#allocation20_spill] sm:$0xff]  ;;  %v5516_v20 = vld [vmem:[#allocation25_spill] sm:$0xff] }
 0x27a   :  { %v2282_v43 = vmax.f32 %v5498_v52, %v2266_v46  ;;  %v2233_v12 = vadd.f32 %v3689_v35, %v5499_v31  ;;  %v2264_v33 = vmax.f32 %v2148_v61, %v2212_v3  ;;  %v2320_v2 = vmax.f32 %v2304_v30, 0.0  ;;  %v5519_v3 = vld [vmem:[#allocation31_spill] sm:$0xff]  ;;  %v5520_v35 = vld [vmem:[#allocation32_spill] sm:$0xff] }
 0x27b   :  { %v5121_v62 = vpack.c.bf16 %v2315_v26, %v2314_v34  ;;  %v2224_v59 = vpop.f32.mrf.mxu0  ;;  %v2302_v55 = vadd.f32 %v5012_v27, %v2279_v50  ;;  %v5512_v13 = vmax.f32 %v5510_v14, %v5511_v6  ;;  %v2164_v1 = vadd.f32 %v5514_v23, %v5513_v24  ;;  %v5517_v50 = vld [vmem:[#allocation30_spill] sm:$0xff] }
 0x27c   :  { %v2305_v15 = vadd.f32 %v5012_v27, %v2282_v43  ;;  %v2269_v49 = vmax.f32 %v5501_v9, %v2233_v12  ;;  %v2225_v40 = vadd.f32 %v2224_v59, %v5502_v47  ;;  %3489 = vmatmul.mubr.msk.bf16.gmra.mxu1 %vm2430_vm0, %v5044_v0  ;;  %3505 = vmatmul.mubr.msk.bf16.gmra.mxu0 %vm2430_vm0, %v5044_v0  ;;  %v2347_v9 = vld [vmem:[%s5426_s3 + $0x68] sm:$0xff] }
 0x27d   :  { %v2280_v38 = vmax.f32 %v5505_v25, %v2264_v33  ;;  %v3690_v11 = vpop.f32.mrf.mxu0  ;;  %2501 = vmatprep.mubr.bf16.mxu1 %v5492_v51  ;;  %2665 = vmatprep.mubr.bf16.mxu0 %v5492_v51  ;;  %v2318_v29 = vmax.f32 %v2302_v55, 0.0  ;;  %v5518_v46 = vmax.f32 %v5516_v20, %v5517_v50  ;;  %v5521_v52 = vmax.f32 %v5519_v3, %v5520_v35 }
 0x27e   :  { %v2321_v60 = vmax.f32 %v2305_v15, 0.0  ;;  %v2285_v10 = vmax.f32 %v5508_v28, %v2269_v49  ;;  %v2267_v53 = vmax.f32 %v2161_v45, %v2225_v40  ;;  %v2236_v48 = vadd.f32 %v3690_v11, %v5509_v37 }
 0x27f   :  { %v2303_v57 = vadd.f32 %v5012_v27, %v2280_v38  ;;  %v2227_v4 = vpop.f32.mrf.mxu0  ;;  %v3478_v49 = vcombine.low %v5042_v16, %v5052_v7  ;;  %v3484_v47 = vcombine.low %v5057_v36, %v5062_v41  ;;  %v2341_v16 = vld [vmem:[%s5426_s3 + $0x38] sm:$0xff] }
 0x280   :  { %v5141_v44 = vpack.c.bf16 %v2321_v60, %v2320_v2  ;;  %v2283_v58 = vmax.f32 %v5512_v13, %v2267_v53  ;;  %v2270_v19 = vmax.f32 %v4997_v17, %v2236_v48  ;;  %v2228_v56 = vadd.f32 %v2227_v4, %v5515_v42  ;;  %v2349_v7 = vld [vmem:[%s5426_s3 + $0x78] sm:$0xff] }
 0x281   :  { %v2319_v39 = vmax.f32 %v2303_v57, 0.0  ;;  %v2308_v61 = vadd.f32 %v5012_v27, %v2285_v10  ;;  %v3487_v41 = vcombine.high %v2341_v16, %v2349_v7  ;;  %v3486_v2 = vcombine.low %v2341_v16, %v2349_v7 }
 0x282   :  { %v2286_v34 = vmax.f32 %v5518_v46, %v2270_v19  ;;  %v2268_v30 = vmax.f32 %v2164_v1, %v2228_v56  ;;  %v2306_v17 = vadd.f32 %v5012_v27, %v2283_v58 }
 0x283   :  { %v5154_v26 = vpack.c.bf16 %v2319_v39, %v2318_v29  ;;  %v2324_v31 = vmax.f32 %v2308_v61, 0.0 }
 0x284   :  { %v2309_v22 = vadd.f32 %v5012_v27, %v2286_v34  ;;  %3490 = vmatmul.mubr.msk.bf16.gmra.mxu1 %vm2430_vm0, %v5121_v62  ;;  %3506 = vmatmul.mubr.msk.bf16.gmra.mxu0 %vm2430_vm0, %v5121_v62  ;;  %v2284_v43 = vmax.f32 %v5521_v52, %v2268_v30  ;;  %v2322_v33 = vmax.f32 %v2306_v17, 0.0 }
 0x285   :  { %2507 = vmatprep.mubr.bf16.mxu1 %v5492_v51  ;;  %2673 = vmatprep.mubr.bf16.mxu0 %v5492_v51 }
 0x286   :  { %v2325_v12 = vmax.f32 %v2309_v22, 0.0  ;;  %v2307_v21 = vadd.f32 %v5012_v27, %v2284_v43  ;;  %v2339_v27 = vld [vmem:[%s5426_s3 + $0x28] sm:$0xff] }
 0x287   :  { %v3483_v40 = vcombine.high %v2339_v27, %v2347_v9  ;;  %v3482_v36 = vcombine.low %v2339_v27, %v2347_v9 }
 0x288   :  { %v5168_v45 = vpack.c.bf16 %v2325_v12, %v2324_v31  ;;  %v2323_v59 = vmax.f32 %v2307_v21, 0.0 }
 0x28a   :  { %v5170_v15 = vpack.c.bf16 %v2323_v59, %v2322_v33 }
 0x28c   :  { %3491 = vmatmul.mubr.msk.bf16.gmra.mxu1 %vm2430_vm0, %v5108_v32  ;;  %3507 = vmatmul.mubr.msk.bf16.gmra.mxu0 %vm2430_vm0, %v5108_v32 }
 0x28d   :  { %2513 = vmatprep.mubr.bf16.mxu1 %v5492_v51  ;;  %2679 = vmatprep.mubr.bf16.mxu0 %v5492_v51 }
 0x294   :  { %3492 = vmatmul.mubr.msk.bf16.gmra.mxu1 %vm2430_vm0, %v5154_v26  ;;  %3508 = vmatmul.mubr.msk.bf16.gmra.mxu0 %vm2430_vm0, %v5154_v26 }
 0x295   :  { %2519 = vmatprep.mubr.bf16.mxu1 %v5492_v51  ;;  %2685 = vmatprep.mubr.bf16.mxu0 %v5492_v51 }
 0x29c   :  { %3493 = vmatmul.mubr.msk.bf16.gmra.mxu1 %vm2430_vm0, %v5141_v44  ;;  %3509 = vmatmul.mubr.msk.bf16.gmra.mxu0 %vm2430_vm0, %v5141_v44 }
 0x29d   :  { %2525 = vmatprep.mubr.bf16.mxu1 %v5492_v51  ;;  %2691 = vmatprep.mubr.bf16.mxu0 %v5492_v51 }
 0x2a4   :  { %3494 = vmatmul.mubr.msk.bf16.gmra.mxu1 %vm2430_vm0, %v5170_v15  ;;  %3510 = vmatmul.mubr.msk.bf16.gmra.mxu0 %vm2430_vm0, %v5170_v15 }
 0x2a5   :  { %2531 = vmatprep.mubr.bf16.mxu1 %v5492_v51  ;;  %2697 = vmatprep.mubr.bf16.mxu0 %v5492_v51 }
 0x2ac   :  { %3495 = vmatmul.mubr.msk.bf16.gmra.mxu1 %vm2430_vm0, %v5168_v45  ;;  %3511 = vmatmul.mubr.msk.bf16.gmra.mxu0 %vm2430_vm0, %v5168_v45 }
 0x2ad   :  { %2570 = vmatprep.mubr.bf16.mxu1 %v5492_v51  ;;  %2819 = vmatprep.mubr.bf16.mxu0 %v5492_v51 }
 0x2b4   :  { %3496 = vmatmul.mubr.msk.bf16.vlgmr.msra.gmra.mxu1 %vm2430_vm0, %v5069_v18  ;;  %3520 = vmatmul.mubr.msk.bf16.vlgmr.msra.gmra.mxu0 %vm2430_vm0, %v5069_v18 }
 0x2b5   :  { %2719 = vmatpush1.bf16.msra.mxu1 %v3478_v49  ;;  %2576 = vmatprep.mubr.bf16.mxu1 %v5492_v51 }
 0x2b6   :  { %2825 = vmatprep.mubr.bf16.mxu0 %v5492_v51  ;;  %2968 = vmatpush1.bf16.msra.mxu0 %v3484_v47 }
 0x2b7   :  { %2884 = vmatprep.subr.bf16.mxu1 %v3483_v40 }
 0x2bc   :  { %3497 = vmatmul.mubr.msk.bf16.gmra.mxu1 %vm2430_vm0, %v5044_v0  ;;  %3521 = vmatmul.mubr.msk.bf16.gmra.mxu0 %vm2430_vm0, %v5044_v0 }
 0x2bd   :  { %2584 = vmatprep.mubr.bf16.mxu1 %v5492_v51  ;;  %2831 = vmatprep.mubr.bf16.mxu0 %v5492_v51 }
 0x2c4   :  { %3498 = vmatmul.mubr.msk.bf16.gmra.mxu1 %vm2430_vm0, %v5121_v62  ;;  %3522 = vmatmul.mubr.msk.bf16.gmra.mxu0 %vm2430_vm0, %v5121_v62 }
 0x2c5   :  { %2590 = vmatprep.mubr.bf16.mxu1 %v5492_v51  ;;  %2837 = vmatprep.mubr.bf16.mxu0 %v5492_v51 }
 0x2cc   :  { %3499 = vmatmul.mubr.msk.bf16.gmra.mxu1 %vm2430_vm0, %v5108_v32  ;;  %3523 = vmatmul.mubr.msk.bf16.gmra.mxu0 %vm2430_vm0, %v5108_v32 }
 0x2cd   :  { %2596 = vmatprep.mubr.bf16.mxu1 %v5492_v51  ;;  %2843 = vmatprep.mubr.bf16.mxu0 %v5492_v51 }
 0x2d4   :  { %3500 = vmatmul.mubr.msk.bf16.gmra.mxu1 %vm2430_vm0, %v5154_v26  ;;  %3524 = vmatmul.mubr.msk.bf16.gmra.mxu0 %vm2430_vm0, %v5154_v26 }
 0x2d5   :  { %2602 = vmatprep.mubr.bf16.mxu1 %v5492_v51  ;;  %2851 = vmatprep.mubr.bf16.mxu0 %v5492_v51 }
 0x2dc   :  { %3501 = vmatmul.mubr.msk.bf16.gmra.mxu1 %vm2430_vm0, %v5141_v44  ;;  %3525 = vmatmul.mubr.msk.bf16.gmra.mxu0 %vm2430_vm0, %v5141_v44 }
 0x2dd   :  { %2608 = vmatprep.mubr.bf16.mxu1 %v5492_v51  ;;  %2857 = vmatprep.mubr.bf16.mxu0 %v5492_v51 }
 0x2e4   :  { %3502 = vmatmul.mubr.msk.bf16.gmra.mxu1 %vm2430_vm0, %v5170_v15  ;;  %3526 = vmatmul.mubr.msk.bf16.gmra.mxu0 %vm2430_vm0, %v5170_v15 }
 0x2e5   :  { %2614 = vmatprep.mubr.bf16.mxu1 %v5492_v51  ;;  %2863 = vmatprep.mubr.bf16.mxu0 %v5492_v51 }
 0x2ec   :  { %3503 = vmatmul.mubr.msk.bf16.gmra.mxu1 %vm2430_vm0, %v5168_v45  ;;  %3527 = vmatmul.mubr.msk.bf16.gmra.mxu0 %vm2430_vm0, %v5168_v45 }
 0x2ed   :  { %2736 = vmatprep.mubr.bf16.mxu1 %v5492_v51  ;;  %2985 = vmatprep.mubr.bf16.mxu0 %v5492_v51 }
 0x2f4   :  { %3512 = vmatmul.mubr.msk.bf16.vlgmr.msra.gmra.mxu1 %vm2430_vm0, %v5069_v18  ;;  %3536 = vmatmul.mubr.msk.bf16.vlgmr.msra.gmra.mxu0 %vm2430_vm0, %v5069_v18 }
 0x2f5   :  { %2885 = vmatpush1.bf16.msra.mxu1 %v3482_v36  ;;  %2742 = vmatprep.mubr.bf16.mxu1 %v5492_v51 }
 0x2f6   :  { %2991 = vmatprep.mubr.bf16.mxu0 %v5492_v51  ;;  %3050 = vmatprep.subr.bf16.mxu1 %v3487_v41 }
 0x2fc   :  { %3513 = vmatmul.mubr.msk.bf16.gmra.mxu1 %vm2430_vm0, %v5044_v0  ;;  %3537 = vmatmul.mubr.msk.bf16.gmra.mxu0 %vm2430_vm0, %v5044_v0 }
 0x2fd   :  { %2748 = vmatprep.mubr.bf16.mxu1 %v5492_v51  ;;  %2997 = vmatprep.mubr.bf16.mxu0 %v5492_v51 }
 0x304   :  { %3514 = vmatmul.mubr.msk.bf16.gmra.mxu1 %vm2430_vm0, %v5121_v62  ;;  %3538 = vmatmul.mubr.msk.bf16.gmra.mxu0 %vm2430_vm0, %v5121_v62 }
 0x305   :  { %2754 = vmatprep.mubr.bf16.mxu1 %v5492_v51  ;;  %3003 = vmatprep.mubr.bf16.mxu0 %v5492_v51 }
 0x30c   :  { %3515 = vmatmul.mubr.msk.bf16.gmra.mxu1 %vm2430_vm0, %v5108_v32  ;;  %3539 = vmatmul.mubr.msk.bf16.gmra.mxu0 %vm2430_vm0, %v5108_v32 }
 0x30d   :  { %2762 = vmatprep.mubr.bf16.mxu1 %v5492_v51  ;;  %3009 = vmatprep.mubr.bf16.mxu0 %v5492_v51 }
 0x314   :  { %3516 = vmatmul.mubr.msk.bf16.gmra.mxu1 %vm2430_vm0, %v5154_v26  ;;  %3540 = vmatmul.mubr.msk.bf16.gmra.mxu0 %vm2430_vm0, %v5154_v26 }
 0x315   :  { %2768 = vmatprep.mubr.bf16.mxu1 %v5492_v51  ;;  %3015 = vmatprep.mubr.bf16.mxu0 %v5492_v51 }
 0x31c   :  { %3517 = vmatmul.mubr.msk.bf16.gmra.mxu1 %vm2430_vm0, %v5141_v44  ;;  %3541 = vmatmul.mubr.msk.bf16.gmra.mxu0 %vm2430_vm0, %v5141_v44 }
 0x31d   :  { %2774 = vmatprep.mubr.bf16.mxu1 %v5492_v51  ;;  %3021 = vmatprep.mubr.bf16.mxu0 %v5492_v51 }
 0x324   :  { %3518 = vmatmul.mubr.msk.bf16.gmra.mxu1 %vm2430_vm0, %v5170_v15  ;;  %3542 = vmatmul.mubr.msk.bf16.gmra.mxu0 %vm2430_vm0, %v5170_v15 }
 0x325   :  { %2780 = vmatprep.mubr.bf16.mxu1 %v5492_v51  ;;  %3029 = vmatprep.mubr.bf16.mxu0 %v5492_v51 }
 0x32c   :  { %3519 = vmatmul.mubr.msk.bf16.gmra.mxu1 %vm2430_vm0, %v5168_v45  ;;  %3543 = vmatmul.mubr.msk.bf16.gmra.mxu0 %vm2430_vm0, %v5168_v45 }
 0x32d   :  { %2902 = vmatprep.mubr.bf16.mxu1 %v5492_v51 }
 0x334   :  { %v2489_v55 = vpop.f32.mrf.mxu1  ;;  %v2655_v54 = vpop.f32.mrf.mxu0  ;;  %3528 = vmatmul.mubr.msk.bf16.vlgmr.msra.gmra.mxu1 %vm2430_vm0, %v5069_v18 }
 0x335   :  { %3051 = vmatpush1.bf16.msra.mxu1 %v3486_v2  ;;  %2908 = vmatprep.mubr.bf16.mxu1 %v5492_v51 }
 0x336   :  { %v2491_v63 = vpop.f32.mrf.mxu1  ;;  %v2656_v25 = vpop.f32.mrf.mxu0 }
 0x338   :  { %v2492_v38 = vpop.f32.mrf.mxu1  ;;  %v2657_v11 = vpop.f32.mrf.mxu0 }
 0x33a   :  { %v2493_v60 = vpop.f32.mrf.mxu1  ;;  %v2658_v8 = vpop.f32.mrf.mxu0 }
 0x33b   :  { %v5316_v5 = vadd.f32 %v2493_v60, %v2489_v55 }
 0x33c   :  { %v2497_v28 = vpop.f32.mrf.mxu1  ;;  %v2661_v10 = vpop.f32.mrf.mxu0  ;;  %3529 = vmatmul.mubr.msk.bf16.gmra.mxu1 %vm2430_vm0, %v5044_v0 }
 0x33d   :  { %2914 = vmatprep.mubr.bf16.mxu1 %v5492_v51 }
 0x33e   :  { %v2498_v53 = vpop.f32.mrf.mxu1  ;;  %v2662_v37 = vpop.f32.mrf.mxu0 }
 0x340   :  { %v2499_v48 = vpop.f32.mrf.mxu1  ;;  %v2663_v57 = vpop.f32.mrf.mxu0 }
 0x342   :  { %v2500_v4 = vpop.f32.mrf.mxu1  ;;  %v2664_v14 = vpop.f32.mrf.mxu0 }
 0x344   :  { %v2503_v6 = vpop.f32.mrf.mxu1  ;;  %v5321_v13 = vpop.f32.mrf.mxu0  ;;  %3530 = vmatmul.mubr.msk.bf16.gmra.mxu1 %vm2430_vm0, %v5121_v62 }
 0x345   :  { %2920 = vmatprep.mubr.bf16.mxu1 %v5492_v51 }
 0x346   :  { %v2504_v58 = vpop.f32.mrf.mxu1  ;;  %v2669_v19 = vpop.f32.mrf.mxu0 }
 0x348   :  { %v2505_v24 = vpop.f32.mrf.mxu1  ;;  %v2670_v23 = vpop.f32.mrf.mxu0 }
 0x34a   :  { %v2506_v1 = vpop.f32.mrf.mxu1  ;;  %v5326_v29 = vpop.f32.mrf.mxu0 }
 0x34c   :  { %v2509_v39 = vpop.f32.mrf.mxu1  ;;  %v2675_v42 = vpop.f32.mrf.mxu0  ;;  %3531 = vmatmul.mubr.msk.bf16.gmra.mxu1 %vm2430_vm0, %v5108_v32 }
 0x34d   :  { %2926 = vmatprep.mubr.bf16.mxu1 %v5492_v51 }
 0x34e   :  { %v2510_v56 = vpop.f32.mrf.mxu1  ;;  %v2676_v61 = vpop.f32.mrf.mxu0 }
 0x350   :  { %v2511_v20 = vpop.f32.mrf.mxu1  ;;  %v2677_v50 = vpop.f32.mrf.mxu0 }
 0x352   :  { %v2512_v46 = vpop.f32.mrf.mxu1  ;;  %v2678_v34 = vpop.f32.mrf.mxu0 }
 0x354   :  { %v2515_v30 = vpop.f32.mrf.mxu1  ;;  %v2681_v22 = vpop.f32.mrf.mxu0  ;;  %3532 = vmatmul.mubr.msk.bf16.gmra.mxu1 %vm2430_vm0, %v5154_v26 }
 0x355   :  { %2932 = vmatprep.mubr.bf16.mxu1 %v5492_v51 }
 0x356   :  { %v2516_v17 = vpop.f32.mrf.mxu1  ;;  %v2682_v3 = vpop.f32.mrf.mxu0 }
 0x358   :  { %v2517_v35 = vpop.f32.mrf.mxu1  ;;  %v2683_v52 = vpop.f32.mrf.mxu0 }
 0x35a   :  { %v2518_v43 = vpop.f32.mrf.mxu1  ;;  %v2684_v31 = vpop.f32.mrf.mxu0 }
 0x35c   :  { %v2521_v12 = vpop.f32.mrf.mxu1  ;;  %v2687_v21 = vpop.f32.mrf.mxu0  ;;  %3533 = vmatmul.mubr.msk.bf16.gmra.mxu1 %vm2430_vm0, %v5141_v44 }
 0x35d   :  { %2940 = vmatprep.mubr.bf16.mxu1 %v5492_v51 }
 0x35e   :  { %v2522_v33 = vpop.f32.mrf.mxu1  ;;  %v2688_v59 = vpop.f32.mrf.mxu0 }
 0x360   :  { %v2523_v27 = vpop.f32.mrf.mxu1  ;;  %v2689_v9 = vpop.f32.mrf.mxu0 }
 0x362   :  { %v2524_v49 = vpop.f32.mrf.mxu1  ;;  %v2690_v47 = vpop.f32.mrf.mxu0 }
 0x364   :  { %v2527_v40 = vpop.f32.mrf.mxu1  ;;  %v2693_v16 = vpop.f32.mrf.mxu0  ;;  %3534 = vmatmul.mubr.msk.bf16.gmra.mxu1 %vm2430_vm0, %v5170_v15 }
 0x365   :  { %2946 = vmatprep.mubr.bf16.mxu1 %v5492_v51 }
 0x366   :  { %v2528_v7 = vpop.f32.mrf.mxu1  ;;  %v2694_v36 = vpop.f32.mrf.mxu0 }
 0x368   :  { %v2529_v41 = vpop.f32.mrf.mxu1  ;;  %v2695_v2 = vpop.f32.mrf.mxu0 }
 0x36a   :  { %v2530_v55 = vpop.f32.mrf.mxu1  ;;  %v2696_v54 = vpop.f32.mrf.mxu0 }
 0x36c   :  { %v2533_v63 = vpop.f32.mrf.mxu1  ;;  %v2699_v25 = vpop.f32.mrf.mxu0  ;;  %3535 = vmatmul.mubr.msk.bf16.gmra.mxu1 %vm2430_vm0, %v5168_v45 }
 0x36d   :  { %3068 = vmatprep.mubr.bf16.mxu1 %v5492_v51 }
 0x36e   :  { %v2534_v38 = vpop.f32.mrf.mxu1  ;;  %v2700_v11 = vpop.f32.mrf.mxu0 }
 0x370   :  { %v2535_v60 = vpop.f32.mrf.mxu1  ;;  %v2701_v8 = vpop.f32.mrf.mxu0 }
 0x372   :  { %v2536_v28 = vpop.f32.mrf.mxu1  ;;  %v2702_v10 = vpop.f32.mrf.mxu0 }
 0x374   :  { %v2572_v53 = vpop.f32.mrf.mxu1  ;;  %v2821_v37 = vpop.f32.mrf.mxu0  ;;  %3544 = vmatmul.mubr.msk.bf16.vlgmr.msra.gmra.mxu1 %vm2430_vm0, %v5069_v18 }
 0x375   :  { %3074 = vmatprep.mubr.bf16.mxu1 %v5492_v51 }
 0x376   :  { %v2573_v48 = vpop.f32.mrf.mxu1  ;;  %v2822_v57 = vpop.f32.mrf.mxu0 }
 0x378   :  { %v2574_v4 = vpop.f32.mrf.mxu1  ;;  %v2823_v14 = vpop.f32.mrf.mxu0 }
 0x37a   :  { %v2575_v6 = vpop.f32.mrf.mxu1  ;;  %v2824_v58 = vpop.f32.mrf.mxu0 }
 0x37c   :  { %v2578_v19 = vpop.f32.mrf.mxu1  ;;  %v2827_v24 = vpop.f32.mrf.mxu0  ;;  %3545 = vmatmul.mubr.msk.bf16.gmra.mxu1 %vm2430_vm0, %v5044_v0 }
 0x37d   :  { %v3120_v23 = vadd.f32 %v5316_v5, %v2578_v19  ;;  %3080 = vmatprep.mubr.bf16.mxu1 %v5492_v51 }
 0x37e   :  { %v2580_v1 = vpop.f32.mrf.mxu1  ;;  %v2828_v39 = vpop.f32.mrf.mxu0 }
 0x380   :  { %v2581_v18 = vpop.f32.mrf.mxu1  ;;  %v2829_v42 = vpop.f32.mrf.mxu0 }
 0x381   :  { %v4010_v18 = vmov 0.0  }
 0x382   :  { %v2582_v56 = vpop.f32.mrf.mxu1  ;;  %v2830_v61 = vpop.f32.mrf.mxu0  ;;  %3691 = vmatprep.subr.bf16.mxu0 %v4010_v18  ;;  %3707 = vmatprep.mubr.msk.bf16.mxu0 %vm4011_vm1, %v4010_v18 }
 0x383   :  { %v3121_v20 = vadd.f32 %v3120_v23, %v2582_v56 }
 0x384   :  { %v2586_v50 = vpop.f32.mrf.mxu1  ;;  %v2833_v46 = vpop.f32.mrf.mxu0  ;;  %3546 = vmatmul.mubr.msk.bf16.gmra.mxu1 %vm2430_vm0, %v5121_v62 }
 0x385   :  { %v3122_v34 = vadd.f32 %v3121_v20, %v5321_v13  ;;  %3086 = vmatprep.mubr.bf16.mxu1 %v5492_v51 }
 0x386   :  { %v2587_v0 = vpop.f32.mrf.mxu1  ;;  %v2834_v5 = vpop.f32.mrf.mxu0 }
 0x387   :  { %v5355_v30 = vadd.f32 %v3122_v34, %v5326_v29 }
 0x388   :  { %v2588_v22 = vpop.f32.mrf.mxu1  ;;  %v2835_v17 = vpop.f32.mrf.mxu0 }
 0x389   :  { %v3980_v17 = vld [vmem:[%s5428_s5 + $0x30] sm:$0xff]  }
 0x38a   :  { %v2589_v3 = vpop.f32.mrf.mxu1  ;;  %v2836_v35 = vpop.f32.mrf.mxu0 }
 0x38c   :  { %v2592_v52 = vpop.f32.mrf.mxu1  ;;  %v2839_v43 = vpop.f32.mrf.mxu0  ;;  %3547 = vmatmul.mubr.msk.bf16.gmra.mxu1 %vm2430_vm0, %v5108_v32 }
 0x38d   :  { %3092 = vmatprep.mubr.bf16.mxu1 %v5492_v51 }
 0x38e   :  { %v2593_v62 = vpop.f32.mrf.mxu1  ;;  %v2840_v13 = vpop.f32.mrf.mxu0 }
 0x390   :  { %v2594_v31 = vpop.f32.mrf.mxu1  ;;  %v2841_v12 = vpop.f32.mrf.mxu0 }
 0x392   :  { %v2595_v21 = vpop.f32.mrf.mxu1  ;;  %v2842_v33 = vpop.f32.mrf.mxu0 }
 0x393   :  { %v3981_v21 = vld [vmem:[%s5428_s5 + $0x28] sm:$0xff]  }
 0x394   :  { %v2598_v59 = vpop.f32.mrf.mxu1  ;;  %v5360_v29 = vpop.f32.mrf.mxu0  ;;  %3548 = vmatmul.mubr.msk.bf16.gmra.mxu1 %vm2430_vm0, %v5154_v26 }
 0x395   :  { %3098 = vmatprep.mubr.bf16.mxu1 %v5492_v51 }
 0x396   :  { %v2599_v27 = vpop.f32.mrf.mxu1  ;;  %v2847_v9 = vpop.f32.mrf.mxu0 }
 0x398   :  { %v2600_v49 = vpop.f32.mrf.mxu1  ;;  %v2848_v32 = vpop.f32.mrf.mxu0 }
 0x39a   :  { %v2601_v47 = vpop.f32.mrf.mxu1  ;;  %v5365_v40 = vpop.f32.mrf.mxu0 }
 0x39c   :  { %v2604_v16 = vpop.f32.mrf.mxu1  ;;  %v2853_v7 = vpop.f32.mrf.mxu0  ;;  %3549 = vmatmul.mubr.msk.bf16.gmra.mxu1 %vm2430_vm0, %v5141_v44 }
 0x39d   :  { %3104 = vmatprep.mubr.bf16.mxu1 %v5492_v51 }
 0x39e   :  { %v2605_v36 = vpop.f32.mrf.mxu1  ;;  %v2854_v41 = vpop.f32.mrf.mxu0 }
 0x39f   :  { %v3982_v41 = vld [vmem:[%s5428_s5 + $0x20] sm:$0xff]  }
 0x3a0   :  { %v2606_v2 = vpop.f32.mrf.mxu1  ;;  %v2855_v26 = vpop.f32.mrf.mxu0 }
 0x3a2   :  { %v2607_v55 = vpop.f32.mrf.mxu1  ;;  %v2856_v54 = vpop.f32.mrf.mxu0 }
 0x3a4   :  { %v2610_v63 = vpop.f32.mrf.mxu1  ;;  %v2859_v25 = vpop.f32.mrf.mxu0  ;;  %3550 = vmatmul.mubr.msk.bf16.gmra.mxu1 %vm2430_vm0, %v5170_v15 }
 0x3a5   :  { %3110 = vmatprep.mubr.bf16.mxu1 %v5492_v51 }
 0x3a6   :  { %v2611_v38 = vpop.f32.mrf.mxu1  ;;  %v2860_v11 = vpop.f32.mrf.mxu0 }
 0x3a8   :  { %v2612_v60 = vpop.f32.mrf.mxu1  ;;  %v2861_v8 = vpop.f32.mrf.mxu0 }
 0x3a9   :  { %v3983_v8 = vld [vmem:[%s5428_s5 + $0x18] sm:$0xff]  }
 0x3aa   :  { %v2613_v44 = vpop.f32.mrf.mxu1  ;;  %v2862_v28 = vpop.f32.mrf.mxu0 }
 0x3ac   :  { %v2616_v10 = vpop.f32.mrf.mxu1  ;;  %v2865_v53 = vpop.f32.mrf.mxu0  ;;  %3551 = vmatmul.mubr.msk.bf16.gmra.mxu1 %vm2430_vm0, %v5168_v45  ;;  %v3979_v45 = vld [vmem:[%s5428_s5 + $0x38] sm:$0xff]  }
 0x3ad   :  { %3692 = vmatpush3.bf16.msra.mxu0 %v3979_v45 }
 0x3ae   :  { %v2617_v37 = vpop.f32.mrf.mxu1  ;;  %v2866_v48 = vpop.f32.mrf.mxu0  ;;  %3693 = vmatprep.subr.bf16.mxu0 %v4010_v18 }
 0x3b0   :  { %v2618_v57 = vpop.f32.mrf.mxu1  ;;  %v2867_v4 = vpop.f32.mrf.mxu0 }
 0x3b1   :  { %3694 = vmatpush3.bf16.msra.mxu0 %v3980_v17  ;;  %v3984_v57 = vld [vmem:[%s5428_s5 + $0x10] sm:$0xff]  }
 0x3b2   :  { %v2619_v14 = vpop.f32.mrf.mxu1  ;;  %v2868_v6 = vpop.f32.mrf.mxu0  ;;  %3695 = vmatprep.subr.bf16.mxu0 %v4010_v18 }
 0x3b4   :  { %v2738_v15 = vpop.f32.mrf.mxu1  ;;  %v2987_v58 = vpop.f32.mrf.mxu0 }
 0x3b5   :  { %3696 = vmatpush3.bf16.msra.mxu0 %v3981_v21 }
 0x3b6   :  { %v2739_v51 = vpop.f32.mrf.mxu1  ;;  %v2988_v19 = vpop.f32.mrf.mxu0  ;;  %3697 = vmatprep.subr.bf16.mxu0 %v4010_v18 }
 0x3b8   :  { %v2740_v24 = vpop.f32.mrf.mxu1  ;;  %v2989_v23 = vpop.f32.mrf.mxu0 }
 0x3b9   :  { %3698 = vmatpush3.bf16.msra.mxu0 %v3982_v41  ;;  %v3985_v23 = vld [vmem:[%s5428_s5 + $0x8] sm:$0xff]  }
 0x3ba   :  { %v2741_v1 = vpop.f32.mrf.mxu1  ;;  %v2990_v39 = vpop.f32.mrf.mxu0  ;;  %3699 = vmatprep.subr.bf16.mxu0 %v4010_v18 }
 0x3bc   :  { %v2744_v42 = vpop.f32.mrf.mxu1  ;;  %v2993_v56 = vpop.f32.mrf.mxu0 }
 0x3bd   :  { %3700 = vmatpush3.bf16.msra.mxu0 %v3983_v8 }
 0x3be   :  { %v2745_v61 = vpop.f32.mrf.mxu1  ;;  %v2994_v20 = vpop.f32.mrf.mxu0  ;;  %3701 = vmatprep.subr.bf16.mxu0 %v4010_v18 }
 0x3c0   :  { %v2746_v50 = vpop.f32.mrf.mxu1  ;;  %v2995_v46 = vpop.f32.mrf.mxu0 }
 0x3c1   :  { %3702 = vmatpush3.bf16.msra.mxu0 %v3984_v57  ;;  %v3986_v46 = vld [vmem:[%s5428_s5] sm:$0xff]  }
 0x3c2   :  { %v2747_v34 = vpop.f32.mrf.mxu1  ;;  %v2996_v0 = vpop.f32.mrf.mxu0  ;;  %3703 = vmatprep.subr.bf16.mxu0 %v4010_v18 }
 0x3c4   :  { %v2750_v5 = vpop.f32.mrf.mxu1  ;;  %v2999_v22 = vpop.f32.mrf.mxu0 }
 0x3c5   :  { %3704 = vmatpush3.bf16.msra.mxu0 %v3985_v23 }
 0x3c6   :  { %v2751_v3 = vpop.f32.mrf.mxu1  ;;  %v3000_v35 = vpop.f32.mrf.mxu0  ;;  %3705 = vmatprep.subr.bf16.mxu0 %v4010_v18 }
 0x3c8   :  { %v2752_v52 = vpop.f32.mrf.mxu1  ;;  %v3001_v43 = vpop.f32.mrf.mxu0 }
 0x3c9   :  { %3706 = vmatpush3.bf16.msra.mxu0 %v3986_v46 }
 0x3ca   :  { %v2753_v62 = vpop.f32.mrf.mxu1  ;;  %v3002_v13 = vpop.f32.mrf.mxu0 }
 0x3cc   :  { %v2756_v31 = vpop.f32.mrf.mxu1  ;;  %v3005_v12 = vpop.f32.mrf.mxu0 }
 0x3cd   :  { %v3124_v33 = vadd.f32 %v5355_v30, %v2756_v31 }
 0x3ce   :  { %v2758_v59 = vpop.f32.mrf.mxu1  ;;  %v3006_v27 = vpop.f32.mrf.mxu0 }
 0x3d0   :  { %v2759_v9 = vpop.f32.mrf.mxu1  ;;  %v3007_v49 = vpop.f32.mrf.mxu0 }
 0x3d2   :  { %v2760_v32 = vpop.f32.mrf.mxu1  ;;  %v3008_v47 = vpop.f32.mrf.mxu0 }
 0x3d3   :  { %v3125_v16 = vadd.f32 %v3124_v33, %v2760_v32 }
 0x3d4   :  { %v2764_v7 = vpop.f32.mrf.mxu1  ;;  %v3011_v36 = vpop.f32.mrf.mxu0 }
 0x3d5   :  { %v3126_v2 = vadd.f32 %v3125_v16, %v5360_v29 }
 0x3d6   :  { %v2765_v26 = vpop.f32.mrf.mxu1  ;;  %v3012_v30 = vpop.f32.mrf.mxu0 }
 0x3d7   :  { %v5394_v55 = vadd.f32 %v3126_v2, %v5365_v40 }
 0x3d8   :  { %v2766_v54 = vpop.f32.mrf.mxu1  ;;  %v3013_v63 = vpop.f32.mrf.mxu0 }
 0x3da   :  { %v2767_v25 = vpop.f32.mrf.mxu1  ;;  %v3014_v38 = vpop.f32.mrf.mxu0 }
 0x3dc   :  { %v2770_v11 = vpop.f32.mrf.mxu1  ;;  %v3017_v60 = vpop.f32.mrf.mxu0 }
 0x3de   :  { %v2771_v44 = vpop.f32.mrf.mxu1  ;;  %v3018_v29 = vpop.f32.mrf.mxu0 }
 0x3e0   :  { %v2772_v28 = vpop.f32.mrf.mxu1  ;;  %v3019_v40 = vpop.f32.mrf.mxu0 }
 0x3e2   :  { %v2773_v10 = vpop.f32.mrf.mxu1  ;;  %v3020_v53 = vpop.f32.mrf.mxu0 }
 0x3e4   :  { %v2776_v37 = vpop.f32.mrf.mxu1  ;;  %v3023_v48 = vpop.f32.mrf.mxu0 }
 0x3e6   :  { %v2777_v4 = vpop.f32.mrf.mxu1  ;;  %v3025_v14 = vpop.f32.mrf.mxu0 }
 0x3e8   :  { %v2778_v6 = vpop.f32.mrf.mxu1  ;;  %v3026_v15 = vpop.f32.mrf.mxu0 }
 0x3ea   :  { %v2779_v58 = vpop.f32.mrf.mxu1  ;;  %v3027_v51 = vpop.f32.mrf.mxu0 }
 0x3ec   :  { %v2782_v19 = vpop.f32.mrf.mxu1  ;;  %v3031_v24 = vpop.f32.mrf.mxu0 }
 0x3ee   :  { %v2783_v1 = vpop.f32.mrf.mxu1  ;;  %v3032_v39 = vpop.f32.mrf.mxu0 }
 0x3f0   :  { %v2784_v42 = vpop.f32.mrf.mxu1  ;;  %v3033_v56 = vpop.f32.mrf.mxu0 }
 0x3f2   :  { %v2785_v45 = vpop.f32.mrf.mxu1  ;;  %v3034_v61 = vpop.f32.mrf.mxu0 }
 0x3f4   :  { %v2904_v20 = vpop.f32.mrf.mxu1 }
 0x3f6   :  { %v2905_v50 = vpop.f32.mrf.mxu1 }
 0x3f8   :  { %v2906_v34 = vpop.f32.mrf.mxu1 }
 0x3fa   :  { %v2907_v0 = vpop.f32.mrf.mxu1 }
 0x3fc   :  { %v2910_v5 = vpop.f32.mrf.mxu1 }
 0x3fe   :  { %v2911_v22 = vpop.f32.mrf.mxu1 }
 0x3ff   :  { %v3552_v22 = vld [vmem:[%s5427_s4] ss:$0 sm:$0xff] }
 0x400   :  { %v2912_v17 = vpop.f32.mrf.mxu1 }
 0x402   :  { %v2913_v3 = vpop.f32.mrf.mxu1 }
 0x404   :  { %v2916_v35 = vpop.f32.mrf.mxu1 }
 0x406   :  { %v2917_v52 = vpop.f32.mrf.mxu1 }
 0x408   :  { %v2918_v43 = vpop.f32.mrf.mxu1 }
 0x409   :  { %v3553_v43 = vld [vmem:[%s5429_s6] ss:$0 sm:$0xff] }
 0x40a   :  { %v2919_v62 = vpop.f32.mrf.mxu1 }
 0x40c   :  { %v2922_v13 = vpop.f32.mrf.mxu1 }
 0x40e   :  { %v2923_v31 = vpop.f32.mrf.mxu1 }
 0x410   :  { %v2924_v12 = vpop.f32.mrf.mxu1 }
 0x412   :  { %v2925_v21 = vpop.f32.mrf.mxu1 }
 0x414   :  { %v2928_v33 = vpop.f32.mrf.mxu1 }
 0x416   :  { %v2929_v59 = vpop.f32.mrf.mxu1 }
 0x418   :  { %v2930_v27 = vpop.f32.mrf.mxu1 }
 0x41a   :  { %v2931_v9 = vpop.f32.mrf.mxu1 }
 0x41c   :  { %v2934_v49 = vpop.f32.mrf.mxu1 }
 0x41d   :  { %v3128_v32 = vadd.f32 %v5394_v55, %v2934_v49 }
 0x41e   :  { %v2936_v18 = vpop.f32.mrf.mxu1 }
 0x420   :  { %v2937_v47 = vpop.f32.mrf.mxu1 }
 0x422   :  { %v2938_v16 = vpop.f32.mrf.mxu1 }
 0x423   :  { %v3129_v7 = vadd.f32 %v3128_v32, %v2938_v16 }
 0x424   :  { %v2942_v36 = vpop.f32.mrf.mxu1 }
 0x425   :  { %v3130_v41 = vadd.f32 %v3129_v7, %v3023_v48 }
 0x426   :  { %v2943_v2 = vpop.f32.mrf.mxu1 }
 0x427   :  { %v3131_v26 = vadd.f32 %v3130_v41, %v3027_v51 }
 0x428   :  { %v2944_v30 = vpop.f32.mrf.mxu1 }
 0x42a   :  { %v2945_v54 = vpop.f32.mrf.mxu1 }
 0x42c   :  { %v2948_v63 = vpop.f32.mrf.mxu1 }
 0x42e   :  { %v2949_v25 = vpop.f32.mrf.mxu1 }
 0x430   :  { %v2950_v38 = vpop.f32.mrf.mxu1 }
 0x432   :  { %v2951_v11 = vpop.f32.mrf.mxu1 }
 0x434   :  { %v3070_v60 = vpop.f32.mrf.mxu1 }
 0x436   :  { %v3071_v8 = vpop.f32.mrf.mxu1 }
 0x438   :  { %v3072_v44 = vpop.f32.mrf.mxu1 }
 0x43a   :  { %v3073_v29 = vpop.f32.mrf.mxu1 }
 0x43c   :  { %v3076_v28 = vpop.f32.mrf.mxu1 }
 0x43e   :  { %v3077_v55 = vpop.f32.mrf.mxu1 }
 0x440   :  { %v3078_v40 = vpop.f32.mrf.mxu1 }
 0x442   :  { %v3079_v10 = vpop.f32.mrf.mxu1 }
 0x444   :  { %v3082_v53 = vpop.f32.mrf.mxu1 }
 0x446   :  { %v3083_v37 = vpop.f32.mrf.mxu1 }
 0x448   :  { %v3084_v57 = vpop.f32.mrf.mxu1 }
 0x44a   :  { %v3085_v48 = vpop.f32.mrf.mxu1 }
 0x44c   :  { %v3088_v4 = vpop.f32.mrf.mxu1 }
 0x44e   :  { %v3089_v14 = vpop.f32.mrf.mxu1 }
 0x450   :  { %v3090_v6 = vpop.f32.mrf.mxu1 }
 0x452   :  { %v3091_v15 = vpop.f32.mrf.mxu1 }
 0x454   :  { %v3094_v58 = vpop.f32.mrf.mxu1 }
 0x456   :  { %v3095_v51 = vpop.f32.mrf.mxu1 }
 0x458   :  { %v3096_v19 = vpop.f32.mrf.mxu1 }
 0x45a   :  { %v3097_v24 = vpop.f32.mrf.mxu1 }
 0x45c   :  { %v3100_v23 = vpop.f32.mrf.mxu1 }
 0x45e   :  { %v3101_v1 = vpop.f32.mrf.mxu1 }
 0x460   :  { %v3102_v39 = vpop.f32.mrf.mxu1 }
 0x462   :  { %v3103_v42 = vpop.f32.mrf.mxu1 }
 0x464   :  { %v3106_v56 = vpop.f32.mrf.mxu1 }
 0x466   :  { %v3107_v45 = vpop.f32.mrf.mxu1 }
 0x468   :  { %v3108_v61 = vpop.f32.mrf.mxu1 }
 0x46a   :  { %v3109_v20 = vpop.f32.mrf.mxu1 }
 0x46c   :  { %v3112_v50 = vpop.f32.mrf.mxu1 }
 0x46d   :  { %v3132_v0 = vadd.f32 %v3131_v26, %v3112_v50 }
 0x46e   :  { %v3114_v46 = vpop.f32.mrf.mxu1 }
 0x470   :  { %v3115_v34 = vpop.f32.mrf.mxu1 }
 0x472   :  { %v3116_v5 = vpop.f32.mrf.mxu1 }
 0x473   :  { %v3133_v17 = vadd.f32 %v3132_v0, %v3116_v5 }
 0x475   :  { %v3141_v3 = vadd.f32 %v3552_v22, %v3133_v17 }
 0x477   :  { %v3142_v35 = vmax.f32 %v3141_v3, 0.0 }
 0x479   :  { %v3143_v52 = vpack.c.bf16 %v3142_v35, %v3142_v35 }
 0x47b   :  { %3708 = vmatmul.mubr.bf16.vlgmr.msra.gmra.mxu0 %v3143_v52 }
 0x53b   :  { %v3249_v62 = vpop.f32.mrf.mxu0 }
 0x53c   :  { %v3250_v13 = vadd.f32 %v3553_v43, %v3249_v62 }
 0x53d   :  { %v3709_v31 = vpop.f32.mrf.mxu0 }
 0x53e   :  { %3256 = vst.msk [vmem:[#allocation2] sm:$0x3] %vm3255_vm2, %v3250_v13 }
 0x53f   :  { %v3252_v12 = vpop.f32.mrf.mxu0 }
 0x540   :  { %3998 = shalt.err (!%p3995_p4)
}
 0x541   :  { %3266 = dma.vmem_to_hbm [thread:$0]  %s3264_s25, 32, %s5430_s7, [#allocation3]   ;;  %v3710_v21 = vpop.f32.mrf.mxu0 }
 0x542   :  { %4007 = dma.done.wait [#allocation3], 32  }
 0x543   :  { %4008 = vsyncadd [#allocation3], 4294967264 }
 0x544   :  { %3270 = vsyncpa [#allocation3], 1 }

</bundles_post_ra>
